<compile_context>
chip_gen: v7x
topology: tpu7x:2x2x1
jax: 0.10.0
libtpu: 0.0.40
codegen_flags: <defaults>
</compile_context>

<pallas_src>
import functools

import jax
import jax.numpy as jnp
from jax import lax
from jax.experimental import pallas as pl
from jax.experimental.pallas import tpu as pltpu


# ----------------------------------------------------------------------------
# Fully fused forward kernel: all conv blocks + classifier head, one batch tile
# of `nb` images per grid step.
# ----------------------------------------------------------------------------
def _fused_cnn_kernel(*refs, layer_cfgs, nb):
    """
    refs (pallas_call order):
      inputs : xp0                       (NB, H0+2p, W0+2p, Cin0) bf16, pre-padded
               (w_i, b_i) per conv layer (k*k*Cin, Cout) bf16 / (1, Cout) f32
               fc1w (Fin, D) f32, fc1b (1, D) f32, fc2w (D, C) f32, fc2b (1, C) f32
      outputs: logits                    (1, NB, C) f32
      scratch: patch_i per conv layer    (NB, H, W, k*k*Cin) bf16
               pad_i  for layers 1..L-1  (NB, H+2p, W+2p, Cin) bf16
               flat                      (NB, Fin) f32
    """
    L = len(layer_cfgs)
    n_in = 1 + 2 * L + 4
    xp0 = refs[0]
    conv_w = [refs[1 + 2 * i] for i in range(L)]
    conv_b = [refs[2 + 2 * i] for i in range(L)]
    fc1w_ref, fc1b_ref, fc2w_ref, fc2b_ref = refs[n_in - 4:n_in]
    out_ref = refs[n_in]
    patch = list(refs[n_in + 1:n_in + 1 + L])
    pads = list(refs[n_in + 1 + L:n_in + 2 * L])          # L-1 refs
    flat_ref = refs[n_in + 2 * L]

    src = xp0                                              # current padded activation
    for li, (k, H, W, Cin, Cout) in enumerate(layer_cfgs):
        Ho, Wo = H // 2, W // 2

        # --- im2col: k*k windowed copies into VMEM, then ONE MXU matmul ----------
        for t in range(k * k):
            di, dj = t // k, t % k
            patch[li][:, :, :, t * Cin:(t + 1) * Cin] = src[:, di:di + H, dj:dj + W, :]
        acc = jnp.dot(patch[li][...].reshape(nb * H * W, k * k * Cin),
                      conv_w[li][...], preferred_element_type=jnp.float32)

        # --- fused 2x2 / stride-2 maxpool (commutes with the folded shift + ReLU) -
        a4 = acc.reshape(nb * Ho, 2, W, Cout)              # rows: (n*Ho+ho, r, w)
        zh = jnp.maximum(a4[:, 0], a4[:, 1])               # H pool -> (nb*Ho, W, Cout)
        z4 = zh.reshape(nb * Ho, Wo, 2, Cout)              # w = 2*wo + s
        pooled = jnp.maximum(z4[:, :, 0, :], z4[:, :, 1, :])  # W pool -> (nb*Ho, Wo, Cout)

        # --- folded conv-bias / BatchNorm shift, then ReLU (f32 epilogue) ---------
        act = jnp.maximum(pooled + conv_b[li][...], 0.0)

        if li + 1 < L:
            # Next layer's padded input: zero only the 4 halo strips and write the
            # pooled activation straight into the interior (buffer written once).
            pn = layer_cfgs[li + 1][0] // 2
            nxt = pads[li]
            Hp, Wp = Ho + 2 * pn, Wo + 2 * pn
            zrow = jnp.zeros((nb, pn, Wp, Cout), nxt.dtype)
            zcol = jnp.zeros((nb, Hp, pn, Cout), nxt.dtype)
            nxt[:, 0:pn, :, :] = zrow
            nxt[:, pn + Ho:Hp, :, :] = zrow
            nxt[:, :, 0:pn, :] = zcol
            nxt[:, :, pn + Wo:Wp, :] = zcol
            nxt[:, pn:pn + Ho, pn:pn + Wo, :] = (
                act.reshape(nb, Ho, Wo, Cout).astype(nxt.dtype))
            src = nxt
        else:
            # NHWC flatten into a lane-dense (NB, Ho*Wo*Cout) scratch via plain
            # lane-offset stores (fc1's columns were pre-permuted to this order).
            act4 = act.reshape(nb, Ho, Wo, Cout)
            for ho in range(Ho):
                for wo in range(Wo):
                    j = (ho * Wo + wo) * Cout
                    flat_ref[:, j:j + Cout] = act4[:, ho, wo, :]

    # --- classifier head: Linear + ReLU + (Dropout = identity in eval) + Linear ---
    # TODO(synk): training-mode dropout (random mask + 1/(1-p) scaling) not implemented.
    flat = flat_ref[...]
    h = jnp.maximum(
        jnp.dot(flat, fc1w_ref[...], preferred_element_type=jnp.float32)
        + fc1b_ref[...], 0.0)
    logits = (jnp.dot(h, fc2w_ref[...], preferred_element_type=jnp.float32)
              + fc2b_ref[...])
    # The final (NB, num_classes) store is the only narrow-lane HBM store left.
    out_ref[0] = logits.astype(out_ref.dtype)


def _batch_tiling(n):
    # Two "parallel" grid steps when the batch splits evenly (v7x has two
    # TensorCores per chip); otherwise a single step (v5e/v6e have one TC, where
    # parallel vs arbitrary is a measured no-op).
    if n >= 2 and n % 2 == 0:
        return n // 2, 2
    return n, 1


# ----------------------------------------------------------------------------
# Forward pass (eval mode) — one fused pallas_call for the whole network.
# ----------------------------------------------------------------------------
@functools.partial(jax.jit, static_argnums=(2,))
def class_cnn_forward(x_nchw, prepped, filter_sizes):
    x = jnp.transpose(x_nchw, (0, 2, 3, 1)).astype(jnp.float32)      # NCHW -> NHWC
    n, hh, ww, cin = x.shape

    # Static per-layer configs (k, H, W, Cin, Cout).
    layer_cfgs = []
    h, w, ci = hh, ww, cin
    for i, k in enumerate(filter_sizes):
        co = prepped["conv"][i]["w"].shape[-1]
        assert k % 2 == 1, "SAME padding path assumes odd filter sizes"
        assert h % 2 == 0 and w % 2 == 0, "maxpool(2,2) path assumes even H, W"
        layer_cfgs.append((k, h, w, ci, co))
        h, w, ci = h // 2, w // 2, co
    layer_cfgs = tuple(layer_cfgs)
    fc_in = h * w * ci
    num_classes = prepped["b2"].shape[-1]

    # Pre-pad the network input once (tiny) so the kernel never pads layer 0.
    p0 = filter_sizes[0] // 2
    xp0 = jnp.pad(x, ((0, 0), (p0, p0), (p0, p0), (0, 0))).astype(jnp.bfloat16)

    nb, g = _batch_tiling(n)

    in_specs = [pl.BlockSpec((nb,) + xp0.shape[1:], lambda i: (i, 0, 0, 0))]
    operands = [xp0]
    for li in range(len(filter_sizes)):
        cw = prepped["conv"][li]
        in_specs += [pl.BlockSpec(cw["w"].shape, lambda i: (0, 0)),
                     pl.BlockSpec(cw["b"].shape, lambda i: (0, 0))]
        operands += [cw["w"], cw["b"]]
    for name in ("w1", "b1", "w2", "b2"):
        in_specs.append(pl.BlockSpec(prepped[name].shape, lambda i: (0, 0)))
        operands.append(prepped[name])

    scratch = [pltpu.VMEM((nb, H, W, k * k * ci2), jnp.bfloat16)
               for (k, H, W, ci2, _) in layer_cfgs]
    scratch += [pltpu.VMEM((nb, H + 2 * (k // 2), W + 2 * (k // 2), ci2), jnp.bfloat16)
                for (k, H, W, ci2, _) in layer_cfgs[1:]]
    scratch += [pltpu.VMEM((nb, fc_in), jnp.float32)]

    kernel = functools.partial(_fused_cnn_kernel, layer_cfgs=layer_cfgs, nb=nb)
    # Weights + activations + scratch are well under 1 MiB, so no vmem_limit
    # override is needed on any generation (v7x's 64 MiB included).
    logits = pl.pallas_call(
        kernel,
        out_shape=jax.ShapeDtypeStruct((g, nb, num_classes), jnp.float32),
        grid=(g,),
        in_specs=in_specs,
        out_specs=pl.BlockSpec((1, nb, num_classes), lambda i: (i, 0, 0)),
        scratch_shapes=scratch,
        compiler_params=pltpu.CompilerParams(dimension_semantics=("parallel",)),
    )(*operands)
    return logits.reshape(n, num_classes)


# ----------------------------------------------------------------------------
# One-time parameter preparation (fold BN, build im2col weights, permute fc1)
# ----------------------------------------------------------------------------
def prepare_params(params, filter_sizes, batch_norm, feat_shape):
    prepped = {"conv": []}
    for i, k in enumerate(filter_sizes):
        p = params["conv"][i]
        cout, cin = p["w"].shape[0], p["w"].shape[1]
        if batch_norm:
            s = p["bn_gamma"] * lax.rsqrt(p["bn_var"] + 1e-5)
            shift = (p["b"] - p["bn_mean"]) * s + p["bn_beta"]
        else:
            s = jnp.ones((cout,), jnp.float32)
            shift = p["b"]
        # (Cout, Cin, kh, kw) -> (kh, kw, Cin, Cout) -> (k*k*Cin, Cout).  Row order
        # (di*k + dj)*Cin + c matches the kernel's im2col column order.  BN scale is
        # folded into the columns; conv operands are bf16 (f32 MXU accumulation).
        w_eff = jnp.transpose(p["w"], (2, 3, 1, 0)).reshape(k * k * cin, cout) * s
        prepped["conv"].append({"w": w_eff.astype(jnp.bfloat16),
                                "b": shift.reshape(1, cout).astype(jnp.float32)})

    # fc1 consumes PyTorch's NCHW flatten; the kernel produces an NHWC flatten,
    # so permute fc1's columns once (and transpose both FC weights once).
    cf, hf, wf = feat_shape
    w1, b1 = params["fc1"]["w"], params["fc1"]["b"]
    w1_perm = w1.reshape(-1, cf, hf, wf).transpose(0, 2, 3, 1).reshape(w1.shape[0], -1)
    prepped["w1"] = jnp.transpose(w1_perm).astype(jnp.float32)            # (fc_in, dense)
    prepped["b1"] = b1.reshape(1, -1).astype(jnp.float32)
    prepped["w2"] = jnp.transpose(params["fc2"]["w"]).astype(jnp.float32)  # (dense, classes)
    prepped["b2"] = params["fc2"]["b"].reshape(1, -1).astype(jnp.float32)
    return prepped


# ----------------------------------------------------------------------------
# Pure-JAX (XLA) reference, mirrors the PyTorch module in eval mode
# ----------------------------------------------------------------------------
def reference_forward(x_nchw, params, filter_sizes, batch_norm):
    x = jnp.transpose(x_nchw, (0, 2, 3, 1)).astype(jnp.float32)
    for i, k in enumerate(filter_sizes):
        p = params["conv"][i]
        w_hwio = jnp.transpose(p["w"], (2, 3, 1, 0))
        pad = k // 2
        x = lax.conv_general_dilated(
            x, w_hwio, window_strides=(1, 1),
            padding=[(pad, pad), (pad, pad)],
            dimension_numbers=("NHWC", "HWIO", "NHWC"),
            precision=lax.Precision.HIGHEST) + p["b"]
        if batch_norm:
            x = (x - p["bn_mean"]) * lax.rsqrt(p["bn_var"] + 1e-5) * p["bn_gamma"] + p["bn_beta"]
        x = jnp.maximum(x, 0.0)
        x = jnp.maximum(jnp.maximum(x[:, 0::2, 0::2, :], x[:, 0::2, 1::2, :]),
                        jnp.maximum(x[:, 1::2, 0::2, :], x[:, 1::2, 1::2, :]))
    flat = jnp.transpose(x, (0, 3, 1, 2)).reshape(x.shape[0], -1)      # NCHW flatten
    h = jnp.maximum(
        jnp.dot(flat, params["fc1"]["w"].T, precision=lax.Precision.HIGHEST)
        + params["fc1"]["b"], 0.0)
    return (jnp.dot(h, params["fc2"]["w"].T, precision=lax.Precision.HIGHEST)
            + params["fc2"]["b"])


# ----------------------------------------------------------------------------
# Deterministic synthetic parameters (mirrors the module __init__)
# ----------------------------------------------------------------------------
def init_params(key, num_filters, filter_multiplier, filter_sizes,
                dense_size, num_classes, image_size, batch_norm):
    params = {"conv": []}
    current_channels = 3
    output_size = image_size
    for i, k in enumerate(filter_sizes):
        out_channels = max(1, int(num_filters * filter_multiplier ** i))
        key, kw, kb, kg, kbt, km, kv = jax.random.split(key, 7)
        conv = {
            "w": 0.1 * jax.random.normal(kw, (out_channels, current_channels, k, k), jnp.float32),
            "b": 0.1 * jax.random.normal(kb, (out_channels,), jnp.float32),
        }
        if batch_norm:
            conv["bn_gamma"] = 1.0 + 0.1 * jax.random.normal(kg, (out_channels,), jnp.float32)
            conv["bn_beta"] = 0.1 * jax.random.normal(kbt, (out_channels,), jnp.float32)
            conv["bn_mean"] = 0.1 * jax.random.normal(km, (out_channels,), jnp.float32)
            conv["bn_var"] = jnp.abs(jax.random.normal(kv, (out_channels,), jnp.float32)) + 0.5
        params["conv"].append(conv)
        current_channels = out_channels
        output_size = output_size // 2

    fc_input = current_channels * output_size * output_size
    key, k1, k2, k3, k4 = jax.random.split(key, 5)
    params["fc1"] = {
        "w": 0.1 * jax.random.normal(k1, (dense_size, fc_input), jnp.float32),
        "b": 0.1 * jax.random.normal(k2, (dense_size,), jnp.float32),
    }
    params["fc2"] = {
        "w": 0.1 * jax.random.normal(k3, (num_classes, dense_size), jnp.float32),
        "b": 0.1 * jax.random.normal(k4, (num_classes,), jnp.float32),
    }
    return params


if __name__ == "__main__":
    # Config: num_filters=4, ReLU, filter_multiplier=2, filter_sizes=(3, 3),
    # dropout=0.5 (eval -> identity), batch_norm=True, dense_size=32,
    # num_classes=10, image_size=16, batch=2.
    num_filters = 4
    filter_multiplier = 2.0
    filter_sizes = (3, 3)
    batch_norm = True
    dense_size = 32
    num_classes = 10
    image_size = 16
    batch = 2

    key = jax.random.PRNGKey(0)
    key, kx = jax.random.split(key)
    x = jax.random.normal(kx, (batch, 3, image_size, image_size), jnp.float32)  # NCHW

    params = init_params(key, num_filters, filter_multiplier, filter_sizes,
                         dense_size, num_classes, image_size, batch_norm)

    # Final feature-map shape (C, H, W) after the conv blocks, for fc1 permutation.
    c_f, s_f = 3, image_size
    for i in range(len(filter_sizes)):
        c_f = max(1, int(num_filters * filter_multiplier ** i))
        s_f //= 2
    prepped = prepare_params(params, filter_sizes, batch_norm, (c_f, s_f, s_f))

    logits = class_cnn_forward(x, prepped, filter_sizes)
    logits = jax.block_until_ready(logits)

    assert logits.shape == (batch, num_classes), logits.shape
    assert bool(jnp.all(jnp.isfinite(logits)))

    ref = reference_forward(x, params, filter_sizes, batch_norm)
    assert bool(jnp.allclose(logits, ref, rtol=2e-2, atol=2e-2)), (
        "Pallas forward mismatch vs XLA reference:\n"
        f"pallas={logits}\nref={ref}")

    print("KERNEL_OK")
</pallas_src>

<mosaic_0001>
module attributes {stable_mosaic.version = 11 : i64} {
  func.func @_fused_cnn_kernel(%arg0: i32, %arg1: memref<1x18x18x3xbf16, #tpu.memory_space<vmem>>, %arg2: memref<27x4xbf16, #tpu.memory_space<vmem>>, %arg3: memref<1x4xf32, #tpu.memory_space<vmem>>, %arg4: memref<36x8xbf16, #tpu.memory_space<vmem>>, %arg5: memref<1x8xf32, #tpu.memory_space<vmem>>, %arg6: memref<128x32xf32, #tpu.memory_space<vmem>>, %arg7: memref<1x32xf32, #tpu.memory_space<vmem>>, %arg8: memref<32x10xf32, #tpu.memory_space<vmem>>, %arg9: memref<1x10xf32, #tpu.memory_space<vmem>>, %arg10: memref<1x1x10xf32, #tpu.memory_space<vmem>>, %arg11: memref<1x16x16x27xbf16, #tpu.memory_space<vmem>>, %arg12: memref<1x8x8x36xbf16, #tpu.memory_space<vmem>>, %arg13: memref<1x10x10x4xbf16, #tpu.memory_space<vmem>>, %arg14: memref<1x128xf32, #tpu.memory_space<vmem>>) attributes {dimension_semantics = [#tpu.dimension_semantics<parallel>], iteration_bounds = array<i64: 2>, scalar_prefetch = 0 : i64, scratch_operands = 4 : i64, tpu.core_type = #tpu.core_type<tc>, window_params = [{transform_indices = @transform_0, window_bounds = array<i64: 1, 18, 18, 3>}, {pipeline_mode = #tpu.pipeline_mode<synchronous>, transform_indices = @transform_1, window_bounds = array<i64: 27, 4>}, {pipeline_mode = #tpu.pipeline_mode<synchronous>, transform_indices = @transform_2, window_bounds = array<i64: 1, 4>}, {pipeline_mode = #tpu.pipeline_mode<synchronous>, transform_indices = @transform_3, window_bounds = array<i64: 36, 8>}, {pipeline_mode = #tpu.pipeline_mode<synchronous>, transform_indices = @transform_4, window_bounds = array<i64: 1, 8>}, {pipeline_mode = #tpu.pipeline_mode<synchronous>, transform_indices = @transform_5, window_bounds = array<i64: 128, 32>}, {pipeline_mode = #tpu.pipeline_mode<synchronous>, transform_indices = @transform_6, window_bounds = array<i64: 1, 32>}, {pipeline_mode = #tpu.pipeline_mode<synchronous>, transform_indices = @transform_7, window_bounds = array<i64: 32, 10>}, {pipeline_mode = #tpu.pipeline_mode<synchronous>, transform_indices = @transform_8, window_bounds = array<i64: 1, 10>}, {transform_indices = @transform_9, window_bounds = array<i64: 1, 1, 10>}]} {
    %c0 = arith.constant 0 : index
    %c0_0 = arith.constant 0 : index
    %c0_1 = arith.constant 0 : index
    %c0_2 = arith.constant 0 : index
    %0 = vector.load %arg1[%c0, %c0_0, %c0_1, %c0_2] : memref<1x18x18x3xbf16, #tpu.memory_space<vmem>>, vector<1x16x16x3xbf16>
    %c0_3 = arith.constant 0 : index
    %c0_4 = arith.constant 0 : index
    %c0_5 = arith.constant 0 : index
    %c0_6 = arith.constant 0 : index
    %1 = vector.load %arg11[%c0_3, %c0_4, %c0_5, %c0_6] : memref<1x16x16x27xbf16, #tpu.memory_space<vmem>>, vector<1x16x16x3xbf16>
    tpu.vector_store %arg11[%c0_3, %c0_4, %c0_5, %c0_6], %0 {strides = array<i32>} : memref<1x16x16x27xbf16, #tpu.memory_space<vmem>>, vector<1x16x16x3xbf16>,
    %c0_7 = arith.constant 0 : index
    %c0_8 = arith.constant 0 : index
    %c1 = arith.constant 1 : index
    %c0_9 = arith.constant 0 : index
    %2 = vector.load %arg1[%c0_7, %c0_8, %c1, %c0_9] : memref<1x18x18x3xbf16, #tpu.memory_space<vmem>>, vector<1x16x16x3xbf16>
    %c0_10 = arith.constant 0 : index
    %c0_11 = arith.constant 0 : index
    %c0_12 = arith.constant 0 : index
    %c3 = arith.constant 3 : index
    %3 = vector.load %arg11[%c0_10, %c0_11, %c0_12, %c3] : memref<1x16x16x27xbf16, #tpu.memory_space<vmem>>, vector<1x16x16x3xbf16>
    tpu.vector_store %arg11[%c0_10, %c0_11, %c0_12, %c3], %2 {strides = array<i32>} : memref<1x16x16x27xbf16, #tpu.memory_space<vmem>>, vector<1x16x16x3xbf16>,
    %c0_13 = arith.constant 0 : index
    %c0_14 = arith.constant 0 : index
    %c2 = arith.constant 2 : index
    %c0_15 = arith.constant 0 : index
    %4 = vector.load %arg1[%c0_13, %c0_14, %c2, %c0_15] : memref<1x18x18x3xbf16, #tpu.memory_space<vmem>>, vector<1x16x16x3xbf16>
    %c0_16 = arith.constant 0 : index
    %c0_17 = arith.constant 0 : index
    %c0_18 = arith.constant 0 : index
    %c6 = arith.constant 6 : index
    %5 = vector.load %arg11[%c0_16, %c0_17, %c0_18, %c6] : memref<1x16x16x27xbf16, #tpu.memory_space<vmem>>, vector<1x16x16x3xbf16>
    tpu.vector_store %arg11[%c0_16, %c0_17, %c0_18, %c6], %4 {strides = array<i32>} : memref<1x16x16x27xbf16, #tpu.memory_space<vmem>>, vector<1x16x16x3xbf16>,
    %c0_19 = arith.constant 0 : index
    %c1_20 = arith.constant 1 : index
    %c0_21 = arith.constant 0 : index
    %c0_22 = arith.constant 0 : index
    %6 = vector.load %arg1[%c0_19, %c1_20, %c0_21, %c0_22] : memref<1x18x18x3xbf16, #tpu.memory_space<vmem>>, vector<1x16x16x3xbf16>
    %c0_23 = arith.constant 0 : index
    %c0_24 = arith.constant 0 : index
    %c0_25 = arith.constant 0 : index
    %c9 = arith.constant 9 : index
    %7 = vector.load %arg11[%c0_23, %c0_24, %c0_25, %c9] : memref<1x16x16x27xbf16, #tpu.memory_space<vmem>>, vector<1x16x16x3xbf16>
    tpu.vector_store %arg11[%c0_23, %c0_24, %c0_25, %c9], %6 {strides = array<i32>} : memref<1x16x16x27xbf16, #tpu.memory_space<vmem>>, vector<1x16x16x3xbf16>,
    %c0_26 = arith.constant 0 : index
    %c1_27 = arith.constant 1 : index
    %c1_28 = arith.constant 1 : index
    %c0_29 = arith.constant 0 : index
    %8 = vector.load %arg1[%c0_26, %c1_27, %c1_28, %c0_29] : memref<1x18x18x3xbf16, #tpu.memory_space<vmem>>, vector<1x16x16x3xbf16>
    %c0_30 = arith.constant 0 : index
    %c0_31 = arith.constant 0 : index
    %c0_32 = arith.constant 0 : index
    %c12 = arith.constant 12 : index
    %9 = vector.load %arg11[%c0_30, %c0_31, %c0_32, %c12] : memref<1x16x16x27xbf16, #tpu.memory_space<vmem>>, vector<1x16x16x3xbf16>
    tpu.vector_store %arg11[%c0_30, %c0_31, %c0_32, %c12], %8 {strides = array<i32>} : memref<1x16x16x27xbf16, #tpu.memory_space<vmem>>, vector<1x16x16x3xbf16>,
    %c0_33 = arith.constant 0 : index
    %c1_34 = arith.constant 1 : index
    %c2_35 = arith.constant 2 : index
    %c0_36 = arith.constant 0 : index
    %10 = vector.load %arg1[%c0_33, %c1_34, %c2_35, %c0_36] : memref<1x18x18x3xbf16, #tpu.memory_space<vmem>>, vector<1x16x16x3xbf16>
    %c0_37 = arith.constant 0 : index
    %c0_38 = arith.constant 0 : index
    %c0_39 = arith.constant 0 : index
    %c15 = arith.constant 15 : index
    %11 = vector.load %arg11[%c0_37, %c0_38, %c0_39, %c15] : memref<1x16x16x27xbf16, #tpu.memory_space<vmem>>, vector<1x16x16x3xbf16>
    tpu.vector_store %arg11[%c0_37, %c0_38, %c0_39, %c15], %10 {strides = array<i32>} : memref<1x16x16x27xbf16, #tpu.memory_space<vmem>>, vector<1x16x16x3xbf16>,
    %c0_40 = arith.constant 0 : index
    %c2_41 = arith.constant 2 : index
    %c0_42 = arith.constant 0 : index
    %c0_43 = arith.constant 0 : index
    %12 = vector.load %arg1[%c0_40, %c2_41, %c0_42, %c0_43] : memref<1x18x18x3xbf16, #tpu.memory_space<vmem>>, vector<1x16x16x3xbf16>
    %c0_44 = arith.constant 0 : index
    %c0_45 = arith.constant 0 : index
    %c0_46 = arith.constant 0 : index
    %c18 = arith.constant 18 : index
    %13 = vector.load %arg11[%c0_44, %c0_45, %c0_46, %c18] : memref<1x16x16x27xbf16, #tpu.memory_space<vmem>>, vector<1x16x16x3xbf16>
    tpu.vector_store %arg11[%c0_44, %c0_45, %c0_46, %c18], %12 {strides = array<i32>} : memref<1x16x16x27xbf16, #tpu.memory_space<vmem>>, vector<1x16x16x3xbf16>,
    %c0_47 = arith.constant 0 : index
    %c2_48 = arith.constant 2 : index
    %c1_49 = arith.constant 1 : index
    %c0_50 = arith.constant 0 : index
    %14 = vector.load %arg1[%c0_47, %c2_48, %c1_49, %c0_50] : memref<1x18x18x3xbf16, #tpu.memory_space<vmem>>, vector<1x16x16x3xbf16>
    %c0_51 = arith.constant 0 : index
    %c0_52 = arith.constant 0 : index
    %c0_53 = arith.constant 0 : index
    %c21 = arith.constant 21 : index
    %15 = vector.load %arg11[%c0_51, %c0_52, %c0_53, %c21] : memref<1x16x16x27xbf16, #tpu.memory_space<vmem>>, vector<1x16x16x3xbf16>
    tpu.vector_store %arg11[%c0_51, %c0_52, %c0_53, %c21], %14 {strides = array<i32>} : memref<1x16x16x27xbf16, #tpu.memory_space<vmem>>, vector<1x16x16x3xbf16>,
    %c0_54 = arith.constant 0 : index
    %c2_55 = arith.constant 2 : index
    %c2_56 = arith.constant 2 : index
    %c0_57 = arith.constant 0 : index
    %16 = vector.load %arg1[%c0_54, %c2_55, %c2_56, %c0_57] : memref<1x18x18x3xbf16, #tpu.memory_space<vmem>>, vector<1x16x16x3xbf16>
    %c0_58 = arith.constant 0 : index
    %c0_59 = arith.constant 0 : index
    %c0_60 = arith.constant 0 : index
    %c24 = arith.constant 24 : index
    %17 = vector.load %arg11[%c0_58, %c0_59, %c0_60, %c24] : memref<1x16x16x27xbf16, #tpu.memory_space<vmem>>, vector<1x16x16x3xbf16>
    tpu.vector_store %arg11[%c0_58, %c0_59, %c0_60, %c24], %16 {strides = array<i32>} : memref<1x16x16x27xbf16, #tpu.memory_space<vmem>>, vector<1x16x16x3xbf16>,
    %c0_61 = arith.constant 0 : index
    %c0_62 = arith.constant 0 : index
    %c0_63 = arith.constant 0 : index
    %c0_64 = arith.constant 0 : index
    %18 = vector.load %arg11[%c0_61, %c0_62, %c0_63, %c0_64] : memref<1x16x16x27xbf16, #tpu.memory_space<vmem>>, vector<1x16x16x27xbf16>
    %19 = vector.shape_cast %18 : vector<1x16x16x27xbf16> to vector<256x27xbf16>
    %c0_65 = arith.constant 0 : index
    %c0_66 = arith.constant 0 : index
    %20 = vector.load %arg2[%c0_65, %c0_66] : memref<27x4xbf16, #tpu.memory_space<vmem>>, vector<27x4xbf16>
    %cst = arith.constant dense<0.000000e+00> : vector<256x4xf32>
    %21 = tpu.matmul %19, %20, %cst {dimension_numbers = #tpu.dot_dimension_numbers<[1], [0], [0], [1], [0, 0, 1, 1], [], []>} : vector<256x27xbf16>, vector<27x4xbf16>, vector<256x4xf32> -> vector<256x4xf32>
    %22 = vector.shape_cast %21 : vector<256x4xf32> to vector<8x2x16x4xf32>
    %23 = vector.extract_strided_slice %22 {offsets = [0, 0, 0, 0], sizes = [8, 1, 16, 4], strides = [1, 1, 1, 1]} : vector<8x2x16x4xf32> to vector<8x1x16x4xf32>
    %24 = vector.shape_cast %23 : vector<8x1x16x4xf32> to vector<8x16x4xf32>
    %25 = vector.extract_strided_slice %22 {offsets = [0, 1, 0, 0], sizes = [8, 1, 16, 4], strides = [1, 1, 1, 1]} : vector<8x2x16x4xf32> to vector<8x1x16x4xf32>
    %26 = vector.shape_cast %25 : vector<8x1x16x4xf32> to vector<8x16x4xf32>
    %27 = arith.maximumf %24, %26 : vector<8x16x4xf32>
    %28 = vector.shape_cast %27 : vector<8x16x4xf32> to vector<8x8x2x4xf32>
    %29 = vector.extract_strided_slice %28 {offsets = [0, 0, 0, 0], sizes = [8, 8, 1, 4], strides = [1, 1, 1, 1]} : vector<8x8x2x4xf32> to vector<8x8x1x4xf32>
    %30 = vector.shape_cast %29 : vector<8x8x1x4xf32> to vector<8x8x4xf32>
    %31 = vector.extract_strided_slice %28 {offsets = [0, 0, 1, 0], sizes = [8, 8, 1, 4], strides = [1, 1, 1, 1]} : vector<8x8x2x4xf32> to vector<8x8x1x4xf32>
    %32 = vector.shape_cast %31 : vector<8x8x1x4xf32> to vector<8x8x4xf32>
    %33 = arith.maximumf %30, %32 : vector<8x8x4xf32>
    %c0_67 = arith.constant 0 : index
    %c0_68 = arith.constant 0 : index
    %34 = vector.load %arg3[%c0_67, %c0_68] : memref<1x4xf32, #tpu.memory_space<vmem>>, vector<1x4xf32>
    %35 = vector.shape_cast %34 : vector<1x4xf32> to vector<1x1x4xf32>
    %36 = vector.broadcast %35 : vector<1x1x4xf32> to vector<8x8x4xf32>
    %37 = arith.addf %33, %36 : vector<8x8x4xf32>
    %cst_69 = arith.constant 0.000000e+00 : f32
    %38 = vector.broadcast %cst_69 : f32 to vector<8x8x4xf32>
    %39 = arith.maximumf %37, %38 : vector<8x8x4xf32>
    %cst_70 = arith.constant 0.000000e+00 : bf16
    %40 = vector.broadcast %cst_70 : bf16 to vector<1x1x10x4xbf16>
    %cst_71 = arith.constant 0.000000e+00 : bf16
    %41 = vector.broadcast %cst_71 : bf16 to vector<1x10x1x4xbf16>
    %c0_72 = arith.constant 0 : index
    %c0_73 = arith.constant 0 : index
    %c0_74 = arith.constant 0 : index
    %c0_75 = arith.constant 0 : index
    %42 = vector.load %arg13[%c0_72, %c0_73, %c0_74, %c0_75] : memref<1x10x10x4xbf16, #tpu.memory_space<vmem>>, vector<1x1x10x4xbf16>
    tpu.vector_store %arg13[%c0_72, %c0_73, %c0_74, %c0_75], %40 {strides = array<i32>} : memref<1x10x10x4xbf16, #tpu.memory_space<vmem>>, vector<1x1x10x4xbf16>,
    %c0_76 = arith.constant 0 : index
    %c9_77 = arith.constant 9 : index
    %c0_78 = arith.constant 0 : index
    %c0_79 = arith.constant 0 : index
    %43 = vector.load %arg13[%c0_76, %c9_77, %c0_78, %c0_79] : memref<1x10x10x4xbf16, #tpu.memory_space<vmem>>, vector<1x1x10x4xbf16>
    tpu.vector_store %arg13[%c0_76, %c9_77, %c0_78, %c0_79], %40 {strides = array<i32>} : memref<1x10x10x4xbf16, #tpu.memory_space<vmem>>, vector<1x1x10x4xbf16>,
    %c0_80 = arith.constant 0 : index
    %c0_81 = arith.constant 0 : index
    %c0_82 = arith.constant 0 : index
    %c0_83 = arith.constant 0 : index
    %44 = vector.load %arg13[%c0_80, %c0_81, %c0_82, %c0_83] : memref<1x10x10x4xbf16, #tpu.memory_space<vmem>>, vector<1x10x1x4xbf16>
    tpu.vector_store %arg13[%c0_80, %c0_81, %c0_82, %c0_83], %41 {strides = array<i32>} : memref<1x10x10x4xbf16, #tpu.memory_space<vmem>>, vector<1x10x1x4xbf16>,
    %c0_84 = arith.constant 0 : index
    %c0_85 = arith.constant 0 : index
    %c9_86 = arith.constant 9 : index
    %c0_87 = arith.constant 0 : index
    %45 = vector.load %arg13[%c0_84, %c0_85, %c9_86, %c0_87] : memref<1x10x10x4xbf16, #tpu.memory_space<vmem>>, vector<1x10x1x4xbf16>
    tpu.vector_store %arg13[%c0_84, %c0_85, %c9_86, %c0_87], %41 {strides = array<i32>} : memref<1x10x10x4xbf16, #tpu.memory_space<vmem>>, vector<1x10x1x4xbf16>,
    %46 = vector.shape_cast %39 : vector<8x8x4xf32> to vector<1x8x8x4xf32>
    %47 = arith.truncf %46 : vector<1x8x8x4xf32> to vector<1x8x8x4xbf16>
    %c0_88 = arith.constant 0 : index
    %c1_89 = arith.constant 1 : index
    %c1_90 = arith.constant 1 : index
    %c0_91 = arith.constant 0 : index
    %48 = vector.load %arg13[%c0_88, %c1_89, %c1_90, %c0_91] : memref<1x10x10x4xbf16, #tpu.memory_space<vmem>>, vector<1x8x8x4xbf16>
    tpu.vector_store %arg13[%c0_88, %c1_89, %c1_90, %c0_91], %47 {strides = array<i32>} : memref<1x10x10x4xbf16, #tpu.memory_space<vmem>>, vector<1x8x8x4xbf16>,
    %c0_92 = arith.constant 0 : index
    %c0_93 = arith.constant 0 : index
    %c0_94 = arith.constant 0 : index
    %c0_95 = arith.constant 0 : index
    %49 = vector.load %arg13[%c0_92, %c0_93, %c0_94, %c0_95] : memref<1x10x10x4xbf16, #tpu.memory_space<vmem>>, vector<1x8x8x4xbf16>
    %c0_96 = arith.constant 0 : index
    %c0_97 = arith.constant 0 : index
    %c0_98 = arith.constant 0 : index
    %c0_99 = arith.constant 0 : index
    %50 = vector.load %arg12[%c0_96, %c0_97, %c0_98, %c0_99] : memref<1x8x8x36xbf16, #tpu.memory_space<vmem>>, vector<1x8x8x4xbf16>
    tpu.vector_store %arg12[%c0_96, %c0_97, %c0_98, %c0_99], %49 {strides = array<i32>} : memref<1x8x8x36xbf16, #tpu.memory_space<vmem>>, vector<1x8x8x4xbf16>,
    %c0_100 = arith.constant 0 : index
    %c0_101 = arith.constant 0 : index
    %c1_102 = arith.constant 1 : index
    %c0_103 = arith.constant 0 : index
    %51 = vector.load %arg13[%c0_100, %c0_101, %c1_102, %c0_103] : memref<1x10x10x4xbf16, #tpu.memory_space<vmem>>, vector<1x8x8x4xbf16>
    %c0_104 = arith.constant 0 : index
    %c0_105 = arith.constant 0 : index
    %c0_106 = arith.constant 0 : index
    %c4 = arith.constant 4 : index
    %52 = vector.load %arg12[%c0_104, %c0_105, %c0_106, %c4] : memref<1x8x8x36xbf16, #tpu.memory_space<vmem>>, vector<1x8x8x4xbf16>
    tpu.vector_store %arg12[%c0_104, %c0_105, %c0_106, %c4], %51 {strides = array<i32>} : memref<1x8x8x36xbf16, #tpu.memory_space<vmem>>, vector<1x8x8x4xbf16>,
    %c0_107 = arith.constant 0 : index
    %c0_108 = arith.constant 0 : index
    %c2_109 = arith.constant 2 : index
    %c0_110 = arith.constant 0 : index
    %53 = vector.load %arg13[%c0_107, %c0_108, %c2_109, %c0_110] : memref<1x10x10x4xbf16, #tpu.memory_space<vmem>>, vector<1x8x8x4xbf16>
    %c0_111 = arith.constant 0 : index
    %c0_112 = arith.constant 0 : index
    %c0_113 = arith.constant 0 : index
    %c8 = arith.constant 8 : index
    %54 = vector.load %arg12[%c0_111, %c0_112, %c0_113, %c8] : memref<1x8x8x36xbf16, #tpu.memory_space<vmem>>, vector<1x8x8x4xbf16>
    tpu.vector_store %arg12[%c0_111, %c0_112, %c0_113, %c8], %53 {strides = array<i32>} : memref<1x8x8x36xbf16, #tpu.memory_space<vmem>>, vector<1x8x8x4xbf16>,
    %c0_114 = arith.constant 0 : index
    %c1_115 = arith.constant 1 : index
    %c0_116 = arith.constant 0 : index
    %c0_117 = arith.constant 0 : index
    %55 = vector.load %arg13[%c0_114, %c1_115, %c0_116, %c0_117] : memref<1x10x10x4xbf16, #tpu.memory_space<vmem>>, vector<1x8x8x4xbf16>
    %c0_118 = arith.constant 0 : index
    %c0_119 = arith.constant 0 : index
    %c0_120 = arith.constant 0 : index
    %c12_121 = arith.constant 12 : index
    %56 = vector.load %arg12[%c0_118, %c0_119, %c0_120, %c12_121] : memref<1x8x8x36xbf16, #tpu.memory_space<vmem>>, vector<1x8x8x4xbf16>
    tpu.vector_store %arg12[%c0_118, %c0_119, %c0_120, %c12_121], %55 {strides = array<i32>} : memref<1x8x8x36xbf16, #tpu.memory_space<vmem>>, vector<1x8x8x4xbf16>,
    %c0_122 = arith.constant 0 : index
    %c1_123 = arith.constant 1 : index
    %c1_124 = arith.constant 1 : index
    %c0_125 = arith.constant 0 : index
    %57 = vector.load %arg13[%c0_122, %c1_123, %c1_124, %c0_125] : memref<1x10x10x4xbf16, #tpu.memory_space<vmem>>, vector<1x8x8x4xbf16>
    %c0_126 = arith.constant 0 : index
    %c0_127 = arith.constant 0 : index
    %c0_128 = arith.constant 0 : index
    %c16 = arith.constant 16 : index
    %58 = vector.load %arg12[%c0_126, %c0_127, %c0_128, %c16] : memref<1x8x8x36xbf16, #tpu.memory_space<vmem>>, vector<1x8x8x4xbf16>
    tpu.vector_store %arg12[%c0_126, %c0_127, %c0_128, %c16], %57 {strides = array<i32>} : memref<1x8x8x36xbf16, #tpu.memory_space<vmem>>, vector<1x8x8x4xbf16>,
    %c0_129 = arith.constant 0 : index
    %c1_130 = arith.constant 1 : index
    %c2_131 = arith.constant 2 : index
    %c0_132 = arith.constant 0 : index
    %59 = vector.load %arg13[%c0_129, %c1_130, %c2_131, %c0_132] : memref<1x10x10x4xbf16, #tpu.memory_space<vmem>>, vector<1x8x8x4xbf16>
    %c0_133 = arith.constant 0 : index
    %c0_134 = arith.constant 0 : index
    %c0_135 = arith.constant 0 : index
    %c20 = arith.constant 20 : index
    %60 = vector.load %arg12[%c0_133, %c0_134, %c0_135, %c20] : memref<1x8x8x36xbf16, #tpu.memory_space<vmem>>, vector<1x8x8x4xbf16>
    tpu.vector_store %arg12[%c0_133, %c0_134, %c0_135, %c20], %59 {strides = array<i32>} : memref<1x8x8x36xbf16, #tpu.memory_space<vmem>>, vector<1x8x8x4xbf16>,
    %c0_136 = arith.constant 0 : index
    %c2_137 = arith.constant 2 : index
    %c0_138 = arith.constant 0 : index
    %c0_139 = arith.constant 0 : index
    %61 = vector.load %arg13[%c0_136, %c2_137, %c0_138, %c0_139] : memref<1x10x10x4xbf16, #tpu.memory_space<vmem>>, vector<1x8x8x4xbf16>
    %c0_140 = arith.constant 0 : index
    %c0_141 = arith.constant 0 : index
    %c0_142 = arith.constant 0 : index
    %c24_143 = arith.constant 24 : index
    %62 = vector.load %arg12[%c0_140, %c0_141, %c0_142, %c24_143] : memref<1x8x8x36xbf16, #tpu.memory_space<vmem>>, vector<1x8x8x4xbf16>
    tpu.vector_store %arg12[%c0_140, %c0_141, %c0_142, %c24_143], %61 {strides = array<i32>} : memref<1x8x8x36xbf16, #tpu.memory_space<vmem>>, vector<1x8x8x4xbf16>,
    %c0_144 = arith.constant 0 : index
    %c2_145 = arith.constant 2 : index
    %c1_146 = arith.constant 1 : index
    %c0_147 = arith.constant 0 : index
    %63 = vector.load %arg13[%c0_144, %c2_145, %c1_146, %c0_147] : memref<1x10x10x4xbf16, #tpu.memory_space<vmem>>, vector<1x8x8x4xbf16>
    %c0_148 = arith.constant 0 : index
    %c0_149 = arith.constant 0 : index
    %c0_150 = arith.constant 0 : index
    %c28 = arith.constant 28 : index
    %64 = vector.load %arg12[%c0_148, %c0_149, %c0_150, %c28] : memref<1x8x8x36xbf16, #tpu.memory_space<vmem>>, vector<1x8x8x4xbf16>
    tpu.vector_store %arg12[%c0_148, %c0_149, %c0_150, %c28], %63 {strides = array<i32>} : memref<1x8x8x36xbf16, #tpu.memory_space<vmem>>, vector<1x8x8x4xbf16>,
    %c0_151 = arith.constant 0 : index
    %c2_152 = arith.constant 2 : index
    %c2_153 = arith.constant 2 : index
    %c0_154 = arith.constant 0 : index
    %65 = vector.load %arg13[%c0_151, %c2_152, %c2_153, %c0_154] : memref<1x10x10x4xbf16, #tpu.memory_space<vmem>>, vector<1x8x8x4xbf16>
    %c0_155 = arith.constant 0 : index
    %c0_156 = arith.constant 0 : index
    %c0_157 = arith.constant 0 : index
    %c32 = arith.constant 32 : index
    %66 = vector.load %arg12[%c0_155, %c0_156, %c0_157, %c32] : memref<1x8x8x36xbf16, #tpu.memory_space<vmem>>, vector<1x8x8x4xbf16>
    tpu.vector_store %arg12[%c0_155, %c0_156, %c0_157, %c32], %65 {strides = array<i32>} : memref<1x8x8x36xbf16, #tpu.memory_space<vmem>>, vector<1x8x8x4xbf16>,
    %c0_158 = arith.constant 0 : index
    %c0_159 = arith.constant 0 : index
    %c0_160 = arith.constant 0 : index
    %c0_161 = arith.constant 0 : index
    %67 = vector.load %arg12[%c0_158, %c0_159, %c0_160, %c0_161] : memref<1x8x8x36xbf16, #tpu.memory_space<vmem>>, vector<1x8x8x36xbf16>
    %68 = vector.shape_cast %67 : vector<1x8x8x36xbf16> to vector<64x36xbf16>
    %c0_162 = arith.constant 0 : index
    %c0_163 = arith.constant 0 : index
    %69 = vector.load %arg4[%c0_162, %c0_163] : memref<36x8xbf16, #tpu.memory_space<vmem>>, vector<36x8xbf16>
    %cst_164 = arith.constant dense<0.000000e+00> : vector<64x8xf32>
    %70 = tpu.matmul %68, %69, %cst_164 {dimension_numbers = #tpu.dot_dimension_numbers<[1], [0], [0], [1], [0, 0, 1, 1], [], []>} : vector<64x36xbf16>, vector<36x8xbf16>, vector<64x8xf32> -> vector<64x8xf32>
    %71 = vector.shape_cast %70 : vector<64x8xf32> to vector<4x2x8x8xf32>
    %72 = vector.extract_strided_slice %71 {offsets = [0, 0, 0, 0], sizes = [4, 1, 8, 8], strides = [1, 1, 1, 1]} : vector<4x2x8x8xf32> to vector<4x1x8x8xf32>
    %73 = vector.shape_cast %72 : vector<4x1x8x8xf32> to vector<4x8x8xf32>
    %74 = vector.extract_strided_slice %71 {offsets = [0, 1, 0, 0], sizes = [4, 1, 8, 8], strides = [1, 1, 1, 1]} : vector<4x2x8x8xf32> to vector<4x1x8x8xf32>
    %75 = vector.shape_cast %74 : vector<4x1x8x8xf32> to vector<4x8x8xf32>
    %76 = arith.maximumf %73, %75 : vector<4x8x8xf32>
    %77 = vector.shape_cast %76 : vector<4x8x8xf32> to vector<4x4x2x8xf32>
    %78 = vector.extract_strided_slice %77 {offsets = [0, 0, 0, 0], sizes = [4, 4, 1, 8], strides = [1, 1, 1, 1]} : vector<4x4x2x8xf32> to vector<4x4x1x8xf32>
    %79 = vector.shape_cast %78 : vector<4x4x1x8xf32> to vector<4x4x8xf32>
    %80 = vector.extract_strided_slice %77 {offsets = [0, 0, 1, 0], sizes = [4, 4, 1, 8], strides = [1, 1, 1, 1]} : vector<4x4x2x8xf32> to vector<4x4x1x8xf32>
    %81 = vector.shape_cast %80 : vector<4x4x1x8xf32> to vector<4x4x8xf32>
    %82 = arith.maximumf %79, %81 : vector<4x4x8xf32>
    %c0_165 = arith.constant 0 : index
    %c0_166 = arith.constant 0 : index
    %83 = vector.load %arg5[%c0_165, %c0_166] : memref<1x8xf32, #tpu.memory_space<vmem>>, vector<1x8xf32>
    %84 = vector.shape_cast %83 : vector<1x8xf32> to vector<1x1x8xf32>
    %85 = vector.broadcast %84 : vector<1x1x8xf32> to vector<4x4x8xf32>
    %86 = arith.addf %82, %85 : vector<4x4x8xf32>
    %cst_167 = arith.constant 0.000000e+00 : f32
    %87 = vector.broadcast %cst_167 : f32 to vector<4x4x8xf32>
    %88 = arith.maximumf %86, %87 : vector<4x4x8xf32>
    %89 = vector.shape_cast %88 : vector<4x4x8xf32> to vector<1x4x4x8xf32>
    %90 = vector.extract_strided_slice %89 {offsets = [0, 0, 0, 0], sizes = [1, 1, 1, 8], strides = [1, 1, 1, 1]} : vector<1x4x4x8xf32> to vector<1x1x1x8xf32>
    %91 = vector.shape_cast %90 : vector<1x1x1x8xf32> to vector<1x8xf32>
    %c0_168 = arith.constant 0 : index
    %c0_169 = arith.constant 0 : index
    %92 = vector.load %arg14[%c0_168, %c0_169] : memref<1x128xf32, #tpu.memory_space<vmem>>, vector<1x8xf32>
    tpu.vector_store %arg14[%c0_168, %c0_169], %91 {strides = array<i32>} : memref<1x128xf32, #tpu.memory_space<vmem>>, vector<1x8xf32>,
    %93 = vector.extract_strided_slice %89 {offsets = [0, 0, 1, 0], sizes = [1, 1, 1, 8], strides = [1, 1, 1, 1]} : vector<1x4x4x8xf32> to vector<1x1x1x8xf32>
    %94 = vector.shape_cast %93 : vector<1x1x1x8xf32> to vector<1x8xf32>
    %c0_170 = arith.constant 0 : index
    %c8_171 = arith.constant 8 : index
    %95 = vector.load %arg14[%c0_170, %c8_171] : memref<1x128xf32, #tpu.memory_space<vmem>>, vector<1x8xf32>
    tpu.vector_store %arg14[%c0_170, %c8_171], %94 {strides = array<i32>} : memref<1x128xf32, #tpu.memory_space<vmem>>, vector<1x8xf32>,
    %96 = vector.extract_strided_slice %89 {offsets = [0, 0, 2, 0], sizes = [1, 1, 1, 8], strides = [1, 1, 1, 1]} : vector<1x4x4x8xf32> to vector<1x1x1x8xf32>
    %97 = vector.shape_cast %96 : vector<1x1x1x8xf32> to vector<1x8xf32>
    %c0_172 = arith.constant 0 : index
    %c16_173 = arith.constant 16 : index
    %98 = vector.load %arg14[%c0_172, %c16_173] : memref<1x128xf32, #tpu.memory_space<vmem>>, vector<1x8xf32>
    tpu.vector_store %arg14[%c0_172, %c16_173], %97 {strides = array<i32>} : memref<1x128xf32, #tpu.memory_space<vmem>>, vector<1x8xf32>,
    %99 = vector.extract_strided_slice %89 {offsets = [0, 0, 3, 0], sizes = [1, 1, 1, 8], strides = [1, 1, 1, 1]} : vector<1x4x4x8xf32> to vector<1x1x1x8xf32>
    %100 = vector.shape_cast %99 : vector<1x1x1x8xf32> to vector<1x8xf32>
    %c0_174 = arith.constant 0 : index
    %c24_175 = arith.constant 24 : index
    %101 = vector.load %arg14[%c0_174, %c24_175] : memref<1x128xf32, #tpu.memory_space<vmem>>, vector<1x8xf32>
    tpu.vector_store %arg14[%c0_174, %c24_175], %100 {strides = array<i32>} : memref<1x128xf32, #tpu.memory_space<vmem>>, vector<1x8xf32>,
    %102 = vector.extract_strided_slice %89 {offsets = [0, 1, 0, 0], sizes = [1, 1, 1, 8], strides = [1, 1, 1, 1]} : vector<1x4x4x8xf32> to vector<1x1x1x8xf32>
    %103 = vector.shape_cast %102 : vector<1x1x1x8xf32> to vector<1x8xf32>
    %c0_176 = arith.constant 0 : index
    %c32_177 = arith.constant 32 : index
    %104 = vector.load %arg14[%c0_176, %c32_177] : memref<1x128xf32, #tpu.memory_space<vmem>>, vector<1x8xf32>
    tpu.vector_store %arg14[%c0_176, %c32_177], %103 {strides = array<i32>} : memref<1x128xf32, #tpu.memory_space<vmem>>, vector<1x8xf32>,
    %105 = vector.extract_strided_slice %89 {offsets = [0, 1, 1, 0], sizes = [1, 1, 1, 8], strides = [1, 1, 1, 1]} : vector<1x4x4x8xf32> to vector<1x1x1x8xf32>
    %106 = vector.shape_cast %105 : vector<1x1x1x8xf32> to vector<1x8xf32>
    %c0_178 = arith.constant 0 : index
    %c40 = arith.constant 40 : index
    %107 = vector.load %arg14[%c0_178, %c40] : memref<1x128xf32, #tpu.memory_space<vmem>>, vector<1x8xf32>
    tpu.vector_store %arg14[%c0_178, %c40], %106 {strides = array<i32>} : memref<1x128xf32, #tpu.memory_space<vmem>>, vector<1x8xf32>,
    %108 = vector.extract_strided_slice %89 {offsets = [0, 1, 2, 0], sizes = [1, 1, 1, 8], strides = [1, 1, 1, 1]} : vector<1x4x4x8xf32> to vector<1x1x1x8xf32>
    %109 = vector.shape_cast %108 : vector<1x1x1x8xf32> to vector<1x8xf32>
    %c0_179 = arith.constant 0 : index
    %c48 = arith.constant 48 : index
    %110 = vector.load %arg14[%c0_179, %c48] : memref<1x128xf32, #tpu.memory_space<vmem>>, vector<1x8xf32>
    tpu.vector_store %arg14[%c0_179, %c48], %109 {strides = array<i32>} : memref<1x128xf32, #tpu.memory_space<vmem>>, vector<1x8xf32>,
    %111 = vector.extract_strided_slice %89 {offsets = [0, 1, 3, 0], sizes = [1, 1, 1, 8], strides = [1, 1, 1, 1]} : vector<1x4x4x8xf32> to vector<1x1x1x8xf32>
    %112 = vector.shape_cast %111 : vector<1x1x1x8xf32> to vector<1x8xf32>
    %c0_180 = arith.constant 0 : index
    %c56 = arith.constant 56 : index
    %113 = vector.load %arg14[%c0_180, %c56] : memref<1x128xf32, #tpu.memory_space<vmem>>, vector<1x8xf32>
    tpu.vector_store %arg14[%c0_180, %c56], %112 {strides = array<i32>} : memref<1x128xf32, #tpu.memory_space<vmem>>, vector<1x8xf32>,
    %114 = vector.extract_strided_slice %89 {offsets = [0, 2, 0, 0], sizes = [1, 1, 1, 8], strides = [1, 1, 1, 1]} : vector<1x4x4x8xf32> to vector<1x1x1x8xf32>
    %115 = vector.shape_cast %114 : vector<1x1x1x8xf32> to vector<1x8xf32>
    %c0_181 = arith.constant 0 : index
    %c64 = arith.constant 64 : index
    %116 = vector.load %arg14[%c0_181, %c64] : memref<1x128xf32, #tpu.memory_space<vmem>>, vector<1x8xf32>
    tpu.vector_store %arg14[%c0_181, %c64], %115 {strides = array<i32>} : memref<1x128xf32, #tpu.memory_space<vmem>>, vector<1x8xf32>,
    %117 = vector.extract_strided_slice %89 {offsets = [0, 2, 1, 0], sizes = [1, 1, 1, 8], strides = [1, 1, 1, 1]} : vector<1x4x4x8xf32> to vector<1x1x1x8xf32>
    %118 = vector.shape_cast %117 : vector<1x1x1x8xf32> to vector<1x8xf32>
    %c0_182 = arith.constant 0 : index
    %c72 = arith.constant 72 : index
    %119 = vector.load %arg14[%c0_182, %c72] : memref<1x128xf32, #tpu.memory_space<vmem>>, vector<1x8xf32>
    tpu.vector_store %arg14[%c0_182, %c72], %118 {strides = array<i32>} : memref<1x128xf32, #tpu.memory_space<vmem>>, vector<1x8xf32>,
    %120 = vector.extract_strided_slice %89 {offsets = [0, 2, 2, 0], sizes = [1, 1, 1, 8], strides = [1, 1, 1, 1]} : vector<1x4x4x8xf32> to vector<1x1x1x8xf32>
    %121 = vector.shape_cast %120 : vector<1x1x1x8xf32> to vector<1x8xf32>
    %c0_183 = arith.constant 0 : index
    %c80 = arith.constant 80 : index
    %122 = vector.load %arg14[%c0_183, %c80] : memref<1x128xf32, #tpu.memory_space<vmem>>, vector<1x8xf32>
    tpu.vector_store %arg14[%c0_183, %c80], %121 {strides = array<i32>} : memref<1x128xf32, #tpu.memory_space<vmem>>, vector<1x8xf32>,
    %123 = vector.extract_strided_slice %89 {offsets = [0, 2, 3, 0], sizes = [1, 1, 1, 8], strides = [1, 1, 1, 1]} : vector<1x4x4x8xf32> to vector<1x1x1x8xf32>
    %124 = vector.shape_cast %123 : vector<1x1x1x8xf32> to vector<1x8xf32>
    %c0_184 = arith.constant 0 : index
    %c88 = arith.constant 88 : index
    %125 = vector.load %arg14[%c0_184, %c88] : memref<1x128xf32, #tpu.memory_space<vmem>>, vector<1x8xf32>
    tpu.vector_store %arg14[%c0_184, %c88], %124 {strides = array<i32>} : memref<1x128xf32, #tpu.memory_space<vmem>>, vector<1x8xf32>,
    %126 = vector.extract_strided_slice %89 {offsets = [0, 3, 0, 0], sizes = [1, 1, 1, 8], strides = [1, 1, 1, 1]} : vector<1x4x4x8xf32> to vector<1x1x1x8xf32>
    %127 = vector.shape_cast %126 : vector<1x1x1x8xf32> to vector<1x8xf32>
    %c0_185 = arith.constant 0 : index
    %c96 = arith.constant 96 : index
    %128 = vector.load %arg14[%c0_185, %c96] : memref<1x128xf32, #tpu.memory_space<vmem>>, vector<1x8xf32>
    tpu.vector_store %arg14[%c0_185, %c96], %127 {strides = array<i32>} : memref<1x128xf32, #tpu.memory_space<vmem>>, vector<1x8xf32>,
    %129 = vector.extract_strided_slice %89 {offsets = [0, 3, 1, 0], sizes = [1, 1, 1, 8], strides = [1, 1, 1, 1]} : vector<1x4x4x8xf32> to vector<1x1x1x8xf32>
    %130 = vector.shape_cast %129 : vector<1x1x1x8xf32> to vector<1x8xf32>
    %c0_186 = arith.constant 0 : index
    %c104 = arith.constant 104 : index
    %131 = vector.load %arg14[%c0_186, %c104] : memref<1x128xf32, #tpu.memory_space<vmem>>, vector<1x8xf32>
    tpu.vector_store %arg14[%c0_186, %c104], %130 {strides = array<i32>} : memref<1x128xf32, #tpu.memory_space<vmem>>, vector<1x8xf32>,
    %132 = vector.extract_strided_slice %89 {offsets = [0, 3, 2, 0], sizes = [1, 1, 1, 8], strides = [1, 1, 1, 1]} : vector<1x4x4x8xf32> to vector<1x1x1x8xf32>
    %133 = vector.shape_cast %132 : vector<1x1x1x8xf32> to vector<1x8xf32>
    %c0_187 = arith.constant 0 : index
    %c112 = arith.constant 112 : index
    %134 = vector.load %arg14[%c0_187, %c112] : memref<1x128xf32, #tpu.memory_space<vmem>>, vector<1x8xf32>
    tpu.vector_store %arg14[%c0_187, %c112], %133 {strides = array<i32>} : memref<1x128xf32, #tpu.memory_space<vmem>>, vector<1x8xf32>,
    %135 = vector.extract_strided_slice %89 {offsets = [0, 3, 3, 0], sizes = [1, 1, 1, 8], strides = [1, 1, 1, 1]} : vector<1x4x4x8xf32> to vector<1x1x1x8xf32>
    %136 = vector.shape_cast %135 : vector<1x1x1x8xf32> to vector<1x8xf32>
    %c0_188 = arith.constant 0 : index
    %c120 = arith.constant 120 : index
    %137 = vector.load %arg14[%c0_188, %c120] : memref<1x128xf32, #tpu.memory_space<vmem>>, vector<1x8xf32>
    tpu.vector_store %arg14[%c0_188, %c120], %136 {strides = array<i32>} : memref<1x128xf32, #tpu.memory_space<vmem>>, vector<1x8xf32>,
    %c0_189 = arith.constant 0 : index
    %c0_190 = arith.constant 0 : index
    %138 = vector.load %arg14[%c0_189, %c0_190] : memref<1x128xf32, #tpu.memory_space<vmem>>, vector<1x128xf32>
    %c0_191 = arith.constant 0 : index
    %c0_192 = arith.constant 0 : index
    %139 = vector.load %arg6[%c0_191, %c0_192] : memref<128x32xf32, #tpu.memory_space<vmem>>, vector<128x32xf32>
    %cst_193 = arith.constant dense<0.000000e+00> : vector<1x32xf32>
    %140 = tpu.matmul %138, %139, %cst_193 {dimension_numbers = #tpu.dot_dimension_numbers<[1], [0], [0], [1], [0, 0, 1, 1], [], []>} : vector<1x128xf32>, vector<128x32xf32>, vector<1x32xf32> -> vector<1x32xf32>
    %c0_194 = arith.constant 0 : index
    %c0_195 = arith.constant 0 : index
    %141 = vector.load %arg7[%c0_194, %c0_195] : memref<1x32xf32, #tpu.memory_space<vmem>>, vector<1x32xf32>
    %142 = arith.addf %140, %141 : vector<1x32xf32>
    %cst_196 = arith.constant 0.000000e+00 : f32
    %143 = vector.broadcast %cst_196 : f32 to vector<1x32xf32>
    %144 = arith.maximumf %142, %143 : vector<1x32xf32>
    %c0_197 = arith.constant 0 : index
    %c0_198 = arith.constant 0 : index
    %145 = vector.load %arg8[%c0_197, %c0_198] : memref<32x10xf32, #tpu.memory_space<vmem>>, vector<32x10xf32>
    %cst_199 = arith.constant dense<0.000000e+00> : vector<1x10xf32>
    %146 = tpu.matmul %144, %145, %cst_199 {dimension_numbers = #tpu.dot_dimension_numbers<[1], [0], [0], [1], [0, 0, 1, 1], [], []>} : vector<1x32xf32>, vector<32x10xf32>, vector<1x10xf32> -> vector<1x10xf32>
    %c0_200 = arith.constant 0 : index
    %c0_201 = arith.constant 0 : index
    %147 = vector.load %arg9[%c0_200, %c0_201] : memref<1x10xf32, #tpu.memory_space<vmem>>, vector<1x10xf32>
    %148 = arith.addf %146, %147 : vector<1x10xf32>
    %c0_202 = arith.constant 0 : index
    %c0_203 = arith.constant 0 : index
    %c0_204 = arith.constant 0 : index
    %149 = vector.load %arg10[%c0_202, %c0_203, %c0_204] : memref<1x1x10xf32, #tpu.memory_space<vmem>>, vector<1x1x10xf32>
    %150 = vector.shape_cast %149 : vector<1x1x10xf32> to vector<1x10xf32>
    %151 = vector.shape_cast %148 : vector<1x10xf32> to vector<1x1x10xf32>
    tpu.vector_store %arg10[%c0_202, %c0_203, %c0_204], %151 {strides = array<i32>} : memref<1x1x10xf32, #tpu.memory_space<vmem>>, vector<1x1x10xf32>,
    return
  }
  func.func @transform_0(%arg0: i32) -> (i32, i32, i32, i32) {
    %c0_i32 = arith.constant 0 : i32
    %c0_i32_0 = arith.constant 0 : i32
    %c0_i32_1 = arith.constant 0 : i32
    %c0_i32_2 = arith.constant 0 : i32
    return %arg0, %c0_i32, %c0_i32_0, %c0_i32_1 : i32, i32, i32, i32
  }
  func.func @transform_1(%arg0: i32) -> (i32, i32) {
    %c0_i32 = arith.constant 0 : i32
    %c0_i32_0 = arith.constant 0 : i32
    %c0_i32_1 = arith.constant 0 : i32
    return %c0_i32, %c0_i32_0 : i32, i32
  }
  func.func @transform_2(%arg0: i32) -> (i32, i32) {
    %c0_i32 = arith.constant 0 : i32
    %c0_i32_0 = arith.constant 0 : i32
    %c0_i32_1 = arith.constant 0 : i32
    return %c0_i32, %c0_i32_0 : i32, i32
  }
  func.func @transform_3(%arg0: i32) -> (i32, i32) {
    %c0_i32 = arith.constant 0 : i32
    %c0_i32_0 = arith.constant 0 : i32
    %c0_i32_1 = arith.constant 0 : i32
    return %c0_i32, %c0_i32_0 : i32, i32
  }
  func.func @transform_4(%arg0: i32) -> (i32, i32) {
    %c0_i32 = arith.constant 0 : i32
    %c0_i32_0 = arith.constant 0 : i32
    %c0_i32_1 = arith.constant 0 : i32
    return %c0_i32, %c0_i32_0 : i32, i32
  }
  func.func @transform_5(%arg0: i32) -> (i32, i32) {
    %c0_i32 = arith.constant 0 : i32
    %c0_i32_0 = arith.constant 0 : i32
    %c0_i32_1 = arith.constant 0 : i32
    return %c0_i32, %c0_i32_0 : i32, i32
  }
  func.func @transform_6(%arg0: i32) -> (i32, i32) {
    %c0_i32 = arith.constant 0 : i32
    %c0_i32_0 = arith.constant 0 : i32
    %c0_i32_1 = arith.constant 0 : i32
    return %c0_i32, %c0_i32_0 : i32, i32
  }
  func.func @transform_7(%arg0: i32) -> (i32, i32) {
    %c0_i32 = arith.constant 0 : i32
    %c0_i32_0 = arith.constant 0 : i32
    %c0_i32_1 = arith.constant 0 : i32
    return %c0_i32, %c0_i32_0 : i32, i32
  }
  func.func @transform_8(%arg0: i32) -> (i32, i32) {
    %c0_i32 = arith.constant 0 : i32
    %c0_i32_0 = arith.constant 0 : i32
    %c0_i32_1 = arith.constant 0 : i32
    return %c0_i32, %c0_i32_0 : i32, i32
  }
  func.func @transform_9(%arg0: i32) -> (i32, i32, i32) {
    %c0_i32 = arith.constant 0 : i32
    %c0_i32_0 = arith.constant 0 : i32
    %c0_i32_1 = arith.constant 0 : i32
    return %arg0, %c0_i32, %c0_i32_0 : i32, i32, i32
  }
}

</mosaic_0001>

<bundles_post_ra>
// kernel: class_cnn_forward.1
= control target key start
LH: loop header
LB: loop body
LE: loop exit
PB: predicated region body
PF: predicated region fallthrough
CT: control target
= control target key end

     0   :  { %14 = vsyncpa [#allocation7], 0  ;;  %s9208_s0 = inlined_call_operand.vmem [shape: bf16[2,18,18,3], index: 0, kind: input, shape index: {}]   ;;  %s9209_s1 = inlined_call_operand.vmem [shape: bf16[27,4], index: 1, kind: input, shape index: {}]   ;;  %s9210_s2 = inlined_call_operand.vmem [shape: f32[1,4], index: 2, kind: input, shape index: {}]   ;;  %s9211_s3 = inlined_call_operand.vmem [shape: bf16[36,8], index: 3, kind: input, shape index: {}]   ;;  %s9212_s4 = inlined_call_operand.vmem [shape: f32[1,8], index: 4, kind: input, shape index: {}]   ;;  %s9213_s5 = inlined_call_operand.vmem [shape: f32[128,32], index: 5, kind: input, shape index: {}]   ;;  %s9214_s6 = inlined_call_operand.vmem [shape: f32[1,32], index: 6, kind: input, shape index: {}]   ;;  %s9215_s7 = inlined_call_operand.vmem [shape: f32[32,10], index: 7, kind: input, shape index: {}]   ;;  %s9216_s8 = inlined_call_operand.vmem [shape: f32[1,10], index: 8, kind: input, shape index: {}]   ;;  %s9217_s9 = inlined_call_operand.hbm [shape: f32[2,1,10], index: 9, kind: output, shape index: {}]  }
   0x1   :  { %16 = vsyncpa [#allocation7 + $0x1], 0  ;;  %s7667_s30 = smov 0   ;;  %s7669_s10 = smov 0  }
   0x2   :  { %s7671_s11 = smov 0   ;;  %s7673_s12 = smov 0  }
   0x3 LB: > { %s7688_s13 = sadd.s32 4294967295, %s7583_s12   ;;  %s6243_s14 = sadd.s32 4294967294, %s7583_s12   ;;  %s7583_s12 = sphi %s7673_s12, %s9279_s12   ;;  %s7579_s11 = sphi %s7671_s11, %s9278_s11   ;;  %s7575_s10 = sphi %s7669_s10, %s9277_s10   ;;  %s7571_s30 = sphi %s7667_s30, %s9276_s30  }
   0x4   : > { %s7692_s15 = sadd.s32 1, %s7583_s12   ;;  %s223_s16 = sadd.s32 1, %s7579_s11 }
   0x5   : > { %s220_s17 = ssub.s32 %s7583_s12, %s7692_s15  ;;  %p233_p0 = scmp.ne.s32.totalorder %s7579_s11, %s7575_s10 }
   0x6   : > { %p221_p1 = scmp.eq.s32.totalorder %s220_s17, 0  ;;  %p234_p2 = scmp.eq.s32.totalorder %s7688_s13, 1 }
   0x7   : > { %p239_p3 = scmp.ne.s32.totalorder %s7575_s10, %s7571_s30  ;;  %p240_p4 = scmp.eq.s32.totalorder %s6243_s14, 1 }
   0x8   : > { %s7703_s18 = scalar_select %p221_p1, %s7579_s11, %s223_s16  }
   0x9   : > { %p7705_p5 = por %p234_p2, %p233_p0  ;;  %p7709_p6 = por %p240_p4, %p239_p3 }
   0xa   : > { %p6246_p7 = scmp.ge.s32.totalorder %s7583_s12, 1  ;;  %p290_p8 = scmp.lt.s32.totalorder %s7583_s12, 3 }
   0xc   : > { %p291_p9 = pnand %p6246_p7, %p290_p8 }
   0xd   : > { %p325_p10 = scmp.lt.s32.totalorder (!%p291_p9), %s7688_s13, 1  ;;  %vm1086_vm0 = vcmask (!%p291_p9), 1046528   ;;  %s7585_s26 = smov (!%p291_p9), 9   ;;  %vm652_vm1 = vsmask.f32 (!%p291_p9), 7424  ;;  %vm459_vm2 = vcmask (!%p291_p9), 23552  }
   0xe   : > { %294 = sbr.rel (%p291_p9) target bundleno = 1611 (0x64b), region = 56  ;;  %s7586_s27 = smov (!%p291_p9), 15   ;;  %vm893_vm3 = vcmask (!%p291_p9), 48152   ;;  %vm1183_vm4 = vcmask (!%p291_p9), 72752   ;;  %vm1361_vm5 = vcmask (!%p291_p9), 97352   ;;  %vm1794_vm6 = vcmask (!%p291_p9), 121952  }
   0xf   : > { %s7587_s28 = smov (!%p291_p9), 6   ;;  %s7588_s29 = smov (!%p291_p9), 3   ;;  %vm2083_vm7 = vcmask (!%p291_p9), 146552   ;;  %vm2261_vm8 = vcmask (!%p291_p9), 171152   ;;  %vm2694_vm9 = vcmask (!%p291_p9), 195752   ;;  %vm2983_vm10 = vcmask (!%p291_p9), 220352  }
  0x10   : > { %s7589_s14 = smov (!%p291_p9), 12   ;;  %s7590_s16 = smov (!%p291_p9), 18   ;;  %vm3080_vm11 = vcmask (!%p291_p9), 1044480   ;;  %vm3081_vm12 = vcmask (!%p291_p9), 1045504   ;;  %vm9220_vm13 = vcmask (!%p291_p9), 220160   ;;  %vm9218_vm14 = vcmask (!%p291_p9), 27648  }
  0x11   : > { %s7591_s17 = smov (!%p291_p9), 21   ;;  %vm4037_vm15 = vcmask (!%p291_p9), 24576   ;;  %s7601_s23 = smov (!%p291_p9), 32  }
  0x15   : > { %s326_s21 = scalar_select %p325_p10, %s7688_s13, 1 }
  0x17   : > { %s7201_s22 = smul.u32 216, %s326_s21  ;;  %s7592_s21 = smov 24  }
  0x19   : > { %s7720_s25 = scalar_lea.vmem %s9208_s0, %s7201_s22  ;;  %s7607_s22 = smov 104  }
  0x1a   : > { %v7272_v0 = vld [vmem:[%s7720_s25 + $0x18] sm:$0xff]   ;;  %v7273_v1 = vld [vmem:[%s7720_s25 + $0xc] sm:$0xff]   ;;  %v7275_v3 = vld [vmem:[%s7720_s25 + $0x14] ss:$0 sps:$4 sm:$0x11]  }
  0x1b   : > { %1315 = vrot.lane.b32.xlu1 %v7272_v0, %s7585_s26  ;;  %1313 = vrot.lane.b32.xlu0 %v7273_v1, %s7585_s26  ;;  %v7274_v2 = vld [vmem:[%s7720_s25 + $0xc] sm:$0xfe]   ;;  %v7280_v4 = vld [vmem:[%s7720_s25] sm:$0xff]   ;;  %v1988_v6 = vrot.slane %v7275_v3, 1 }
  0x1c   : > { %v1987_v5 = vrot.slane %v7274_v2, 1  ;;  %v7276_v7 = vld [vmem:[%s7720_s25] sm:$0xfe]   ;;  %v7277_v8 = vld [vmem:[%s7720_s25 + $0x8] ss:$0 sps:$4 sm:$0x11]  }
  0x1d   : > { %v654_v9 = vshrl.u32 %v7280_v4, 16  ;;  %v1087_v11 = vrot.slane %v7276_v7, 1  ;;  %v7278_v12 = vld [vmem:[%s7720_s25 + $0xc] sm:$0xfe]   ;;  %v656_v13 = vshll.u32 %v7280_v4, 16  ;;  %v1088_v14 = vrot.slane %v7277_v8, 1 }
  0x1e   : > { %v1989_v10 = vsel %vm1086_vm0, %v1987_v5, %v1988_v6  ;;  %v7279_v15 = vld [vmem:[%s7720_s25 + $0x14] ss:$0 sps:$4 sm:$0x11]   ;;  %v1090_v16 = vrot.slane %v7278_v12, 1  ;;  %v7282_v21 = vld [vmem:[%s7720_s25 + $0x18] sm:$0xfe]  }
  0x1f   : > { %2035 = vrot.lane.b32.xlu0 %v1989_v10, %s7586_s27  ;;  %v658_v17 = vrot.slane %v656_v13, 1  ;;  %v1089_v18 = vsel %vm1086_vm0, %v1087_v11, %v1088_v14  ;;  %v1091_v19 = vrot.slane %v7279_v15, 1  ;;  %v7281_v20 = vld [vmem:[%s7720_s25 + $0x8] ss:$0 sps:$4 sm:$0x11]   ;;  %v1990_v26 = vrot.slane %v7282_v21, 1 }
  0x20   : > { %1135 = vrot.lane.b32.xlu1 %v1089_v18, %s7587_s28  ;;  %v661_v24 = vshll.u32 %v7281_v20, 16  ;;  %v7283_v25 = vld [vmem:[%s7720_s25 + $0x20] ss:$0 sps:$4 sm:$0x11]   ;;  %v7284_v27 = vld [vmem:[%s7720_s25 + $0xc] sm:$0xff]   ;;  %v7286_v31 = vld [vmem:[%s7720_s25 + $0x18] sm:$0xff]  }
  0x21   : > { %v1092_v22 = vsel %vm1086_vm0, %v1090_v16, %v1091_v19  ;;  %v659_v23 = vor.u32 %v658_v17, %v654_v9  ;;  %v1991_v29 = vrot.slane %v7283_v25, 1  ;;  %v7285_v30 = vld [vmem:[%s7720_s25 + $0x14] ss:$0 sps:$4 sm:$0x11]   ;;  %v666_v32 = vshrl.u32 %v7284_v27, 16  ;;  %v7288_v41 = vld [vmem:[%s7720_s25 + $0xc] sm:$0xff]  }
  0x22   : > { %v663_v28 = vrot.slane %v661_v24, 1  ;;  %v668_v33 = vshll.u32 %v7284_v27, 16  ;;  %v673_v36 = vshll.u32 %v7285_v30, 16  ;;  %v7287_v37 = vld [vmem:[%s7720_s25 + $0x20] ss:$0 sps:$4 sm:$0x11]  }
  0x23   : > { %v1992_v35 = vsel %vm1086_vm0, %v1990_v26, %v1991_v29  ;;  %v1567_v39 = vshrl.u32 %v7286_v31, 16  ;;  %v1569_v40 = vshll.u32 %v7286_v31, 16  ;;  %v1574_v43 = vshll.u32 %v7287_v37, 16  ;;  %v7289_v46 = vld [vmem:[%s7720_s25 + $0x14] ss:$0 sps:$4 sm:$0x11]  }
  0x24   : > { %1137 = vrot.lane.b32.xlu1 %v1092_v22, %s7587_s28  ;;  %v664_v34 = vsel %vm652_vm1, %v659_v23, %v663_v28  ;;  %v670_v38 = vrot.slane %v668_v33, 1  ;;  %v675_v42 = vrot.slane %v673_v36, 1  ;;  %v1555_v47 = vshrl.u32 %v7288_v41, 16  ;;  %v7291_v54 = vld [vmem:[%s7720_s25 + $0x24] sm:$0xff]   ;;  %v7292_v58 = vld [vmem:[%s7720_s25 + $0x18] sm:$0xff]  }
  0x25   : > { %845 = vrot.lane.b32.xlu0 %v664_v34, %s7588_s29  ;;  %v1571_v45 = vrot.slane %v1569_v40, 1  ;;  %v1557_v48 = vshll.u32 %v7288_v41, 16  ;;  %v1576_v49 = vrot.slane %v1574_v43, 1  ;;  %v1562_v53 = vshll.u32 %v7289_v46, 16  ;;  %v7290_v59 = vld [vmem:[%s7720_s25 + $0x18] sm:$0xff]   ;;  %v7294_v61 = vld [vmem:[%s7720_s25 + $0x24] sm:$0xff]  }
  0x26   : > { %v671_v44 = vor.u32 %v670_v38, %v666_v32  ;;  %v7293_v60 = vld [vmem:[%s7720_s25 + $0x20] ss:$0 sps:$4 sm:$0x11]   ;;  %v2455_v63 = vshrl.u32 %v7292_v58, 16  ;;  %v2457_v0 = vshll.u32 %v7292_v58, 16  ;;  %v2467_v3 = vshrl.u32 %v7294_v61, 16 }
  0x27   : > { %v1572_v51 = vor.u32 %v1571_v45, %v1567_v39  ;;  %v1559_v52 = vrot.slane %v1557_v48, 1  ;;  %v1564_v57 = vrot.slane %v1562_v53, 1  ;;  %v2462_v1 = vshll.u32 %v7293_v60, 16  ;;  %v7295_v2 = vld [vmem:[%s7720_s25 + $0x2c] ss:$0 sps:$4 sm:$0x11]  }
  0x28   : > { %2037 = vrot.lane.b32.xlu1 %v1992_v35, %s7586_s27  ;;  %v676_v50 = vsel %vm652_vm1, %v671_v44, %v675_v42  ;;  %v2469_v4 = vshll.u32 %v7294_v61, 16  ;;  %v2459_v5 = vrot.slane %v2457_v0, 1  ;;  %v7298_v6 = vld [vmem:[%s7720_s25 + $0x18] sm:$0xff]   ;;  %v2474_v9 = vshll.u32 %v7295_v2, 16  ;;  %v7302_v11 = vld [vmem:[%s7720_s25 + $0x24] sm:$0xff]   ;;  %v7309_v58 = vld [vmem:[%s7720_s25 + $0x30] sm:$0xff]  }
  0x29   : > { %847 = vrot.lane.b32.xlu0 %v676_v50, %s7588_s29  ;;  %v1577_v55 = vsel %vm652_vm1, %v1572_v51, %v1576_v49  ;;  %v1560_v56 = vor.u32 %v1559_v52, %v1555_v47  ;;  %v2464_v7 = vrot.slane %v2462_v1, 1  ;;  %v7296_v10 = vld [vmem:[%s7720_s25 + $0x18] sm:$0xfe]   ;;  %v7297_v13 = vld [vmem:[%s7720_s25 + $0x20] ss:$0 sps:$4 sm:$0x11]  }
  0x2a   : > { %v2471_v8 = vrot.slane %v2469_v4, 1  ;;  %v2460_v12 = vor.u32 %v2459_v5, %v2455_v63  ;;  %v678_v14 = vshrl.u32 %v7298_v6, 16  ;;  %v2476_v16 = vrot.slane %v2474_v9, 1  ;;  %v7299_v20 = vld [vmem:[%s7720_s25 + $0x20] ss:$0 sps:$4 sm:$0x11]  }
  0x2b   : > { %v1565_v62 = vsel %vm652_vm1, %v1560_v56, %v1564_v57  ;;  %v2887_v17 = vrot.slane %v7296_v10, 1  ;;  %v2888_v19 = vrot.slane %v7297_v13, 1  ;;  %v680_v21 = vshll.u32 %v7298_v6, 16  ;;  %v7300_v26 = vld [vmem:[%s7720_s25 + $0x24] sm:$0xfe]   ;;  %v7312_v50 = vld [vmem:[%s7720_s25 + $0x30] sm:$0xff]  }
  0x2c   : > { %1748 = vrot.lane.b32.xlu1 %v1577_v55, %s7589_s14  ;;  %v2472_v15 = vor.u32 %v2471_v8, %v2467_v3  ;;  %v2465_v18 = vsel %vm652_vm1, %v2460_v12, %v2464_v7  ;;  %v690_v22 = vshrl.u32 %v7302_v11, 16  ;;  %v685_v25 = vshll.u32 %v7299_v20, 16  ;;  %v7301_v27 = vld [vmem:[%s7720_s25 + $0x2c] ss:$0 sps:$4 sm:$0x11]   ;;  %v7310_v47 = vld [vmem:[%s7720_s25 + $0x24] sm:$0xff]  }
  0x2d   : > { %1746 = vrot.lane.b32.xlu0 %v1565_v62, %s7589_s14  ;;  %v682_v24 = vrot.slane %v680_v21, 1  ;;  %v692_v28 = vshll.u32 %v7302_v11, 16  ;;  %v2889_v29 = vsel %vm1086_vm0, %v2887_v17, %v2888_v19  ;;  %v2890_v32 = vrot.slane %v7300_v26, 1  ;;  %v7303_v34 = vld [vmem:[%s7720_s25 + $0x2c] ss:$0 sps:$4 sm:$0x11]  }
  0x2e   : > { %v2477_v23 = vsel %vm652_vm1, %v2472_v15, %v2476_v16  ;;  %v687_v31 = vrot.slane %v685_v25, 1  ;;  %v2891_v33 = vrot.slane %v7301_v27, 1  ;;  %v7304_v37 = vld [vmem:[%s7720_s25 + $0x18] sm:$0xfe]   ;;  %v697_v39 = vshll.u32 %v7303_v34, 16  ;;  %v7320_v16 = vld [vmem:[%s7720_s25 + $0x30] sm:$0xff]  }
  0x2f   : > { %v683_v30 = vor.u32 %v682_v24, %v678_v14  ;;  %v694_v35 = vrot.slane %v692_v28, 1  ;;  %v7305_v40 = vld [vmem:[%s7720_s25 + $0x20] ss:$0 sps:$4 sm:$0x11]   ;;  %v1093_v42 = vrot.slane %v7304_v37, 1  ;;  %v1579_v53 = vshrl.u32 %v7310_v47, 16 }
  0x30   : > { %2215 = vrot.lane.b32.xlu1 %v7291_v54, %s7590_s16  ;;  %v2892_v41 = vsel %vm1086_vm0, %v2890_v32, %v2891_v33  ;;  %v699_v43 = vrot.slane %v697_v39, 1  ;;  %v1094_v44 = vrot.slane %v7305_v40, 1  ;;  %v7306_v45 = vld [vmem:[%s7720_s25 + $0x24] sm:$0xfe]   ;;  %v1581_v56 = vshll.u32 %v7310_v47, 16  ;;  %v7322_v21 = vld [vmem:[%s7720_s25 + $0x3c] sm:$0xff]  }
  0x31   : > { %2213 = vrot.lane.b32.xlu0 %v7290_v59, %s7590_s16  ;;  %v688_v36 = vsel %vm652_vm1, %v683_v30, %v687_v31  ;;  %v695_v38 = vor.u32 %v694_v35, %v690_v22  ;;  %v7307_v46 = vld [vmem:[%s7720_s25 + $0x2c] ss:$0 sps:$4 sm:$0x11]   ;;  %v1096_v49 = vrot.slane %v7306_v45, 1  ;;  %v7308_v54 = vld [vmem:[%s7720_s25 + $0x24] sm:$0xff]   ;;  %v1591_v62 = vshrl.u32 %v7312_v50, 16 }
  0x32   : > { %v1095_v51 = vsel %vm1086_vm0, %v1093_v42, %v1094_v44  ;;  %v1097_v52 = vrot.slane %v7307_v46, 1  ;;  %v7311_v55 = vld [vmem:[%s7720_s25 + $0x2c] ss:$0 sps:$4 sm:$0x11]   ;;  %v1583_v59 = vrot.slane %v1581_v56, 1  ;;  %v1593_v63 = vshll.u32 %v7312_v50, 16 }
  0x33   : > { %v700_v48 = vsel %vm652_vm1, %v695_v38, %v699_v43  ;;  %v1586_v60 = vshll.u32 %v7311_v55, 16  ;;  %v7313_v61 = vld [vmem:[%s7720_s25 + $0x38] ss:$0 sps:$4 sm:$0x11]   ;;  %v7314_v3 = vld [vmem:[%s7720_s25 + $0x24] sm:$0xfe]  }
  0x34   : > { %2648 = vrot.lane.b32.xlu1 %v2477_v23, %s7591_s17  ;;  %v1098_v57 = vsel %vm1086_vm0, %v1096_v49, %v1097_v52  ;;  %v1584_v0 = vor.u32 %v1583_v59, %v1579_v53  ;;  %v1598_v2 = vshll.u32 %v7313_v61, 16  ;;  %v1595_v4 = vrot.slane %v1593_v63, 1  ;;  %v7315_v5 = vld [vmem:[%s7720_s25 + $0x2c] ss:$0 sps:$4 sm:$0x11]   ;;  %v7318_v23 = vld [vmem:[%s7720_s25 + $0x30] sm:$0xff]  }
  0x35   : > { %2646 = vrot.lane.b32.xlu0 %v2465_v18, %s7591_s17  ;;  %v1588_v1 = vrot.slane %v1586_v60, 1  ;;  %v1993_v7 = vrot.slane %v7314_v3, 1  ;;  %v1994_v10 = vrot.slane %v7315_v5, 1  ;;  %v7316_v11 = vld [vmem:[%s7720_s25 + $0x30] sm:$0xfe]   ;;  %v2479_v19 = vshrl.u32 %v7320_v16, 16 }
  0x36   : > { %v1600_v6 = vrot.slane %v1598_v2, 1  ;;  %v1596_v9 = vor.u32 %v1595_v4, %v1591_v62  ;;  %v7317_v12 = vld [vmem:[%s7720_s25 + $0x38] ss:$0 sps:$4 sm:$0x11]   ;;  %v1996_v14 = vrot.slane %v7316_v11, 1  ;;  %v2481_v20 = vshll.u32 %v7320_v16, 16 }
  0x37   : > { %v1589_v8 = vsel %vm652_vm1, %v1584_v0, %v1588_v1  ;;  %v1997_v15 = vrot.slane %v7317_v12, 1  ;;  %v1995_v17 = vsel %vm1086_vm0, %v1993_v7, %v1994_v10  ;;  %v7321_v18 = vld [vmem:[%s7720_s25 + $0x38] ss:$0 sps:$4 sm:$0x11]   ;;  %v7319_v24 = vld [vmem:[%s7720_s25 + $0x3c] sm:$0xff]   ;;  %v2491_v28 = vshrl.u32 %v7322_v21, 16 }
  0x38   : > { %849 = vrot.lane.b32.xlu1 %v688_v36, %s7588_s29  ;;  %v1601_v13 = vsel %vm652_vm1, %v1596_v9, %v1600_v6  ;;  %v2483_v25 = vrot.slane %v2481_v20, 1  ;;  %v2486_v26 = vshll.u32 %v7321_v18, 16  ;;  %v7323_v27 = vld [vmem:[%s7720_s25 + $0x44] ss:$0 sps:$4 sm:$0x11]   ;;  %v7326_v30 = vld [vmem:[%s7720_s25 + $0x30] sm:$0xff]  }
  0x39   : > { %2935 = vrot.lane.b32.xlu0 %v2889_v29, %s7592_s21  ;;  %v1998_v22 = vsel %vm1086_vm0, %v1996_v14, %v1997_v15  ;;  %v2493_v29 = vshll.u32 %v7322_v21, 16  ;;  %v2498_v33 = vshll.u32 %v7323_v27, 16  ;;  %v7324_v34 = vld [vmem:[%s7720_s25 + $0x30] sm:$0xfe]   ;;  %v702_v42 = vshrl.u32 %v7326_v30, 16  ;;  %v7330_v50 = vld [vmem:[%s7720_s25 + $0x3c] sm:$0xff]  }
  0x3a   : > { %v2484_v31 = vor.u32 %v2483_v25, %v2479_v19  ;;  %v2488_v32 = vrot.slane %v2486_v26, 1  ;;  %v7325_v36 = vld [vmem:[%s7720_s25 + $0x38] ss:$0 sps:$4 sm:$0x11]   ;;  %v2893_v38 = vrot.slane %v7324_v34, 1  ;;  %v704_v43 = vshll.u32 %v7326_v30, 16 }
  0x3b   : > { %v2495_v35 = vrot.slane %v2493_v29, 1  ;;  %v2500_v37 = vrot.slane %v2498_v33, 1  ;;  %v2894_v40 = vrot.slane %v7325_v36, 1  ;;  %v7329_v49 = vld [vmem:[%s7720_s25 + $0x44] ss:$0 sps:$4 sm:$0x11]  }
  0x3c   : > { %851 = vrot.lane.b32.xlu1 %v700_v48, %s7588_s29  ;;  %v2489_v44 = vsel %vm652_vm1, %v2484_v31, %v2488_v32  ;;  %v706_v46 = vrot.slane %v704_v43, 1  ;;  %v7328_v48 = vld [vmem:[%s7720_s25 + $0x3c] sm:$0xfe]   ;;  %v2897_v55 = vrot.slane %v7329_v49, 1  ;;  %v7332_v60 = vld [vmem:[%s7720_s25 + $0x30] sm:$0xfe]  }
  0x3d   : > { %2937 = vrot.lane.b32.xlu0 %v2892_v41, %s7592_s21  ;;  %v2496_v39 = vor.u32 %v2495_v35, %v2491_v28  ;;  %v7327_v41 = vld [vmem:[%s7720_s25 + $0x38] ss:$0 sps:$4 sm:$0x11]   ;;  %v2896_v53 = vrot.slane %v7328_v48, 1  ;;  %v1099_v0 = vrot.slane %v7332_v60, 1  ;;  %v7338_v7 = vld [vmem:[%s7720_s25 + $0x3c] sm:$0xff]  }
  0x3e   : > { %v709_v47 = vshll.u32 %v7327_v41, 16  ;;  %v7331_v56 = vld [vmem:[%s7720_s25 + $0x44] ss:$0 sps:$4 sm:$0x11]   ;;  %v7334_v5 = vld [vmem:[%s7720_s25 + $0x3c] sm:$0xfe]  }
  0x3f   : > { %v2501_v45 = vsel %vm652_vm1, %v2496_v39, %v2500_v37  ;;  %v721_v62 = vshll.u32 %v7331_v56, 16  ;;  %v7333_v63 = vld [vmem:[%s7720_s25 + $0x38] ss:$0 sps:$4 sm:$0x11]   ;;  %v2898_v1 = vsel %vm1086_vm0, %v2896_v53, %v2897_v55  ;;  %v1102_v9 = vrot.slane %v7334_v5, 1  ;;  %v7340_v10 = vld [vmem:[%s7720_s25 + $0x48] sm:$0xff]  }
  0x40   : > { %1141 = vrot.lane.b32.xlu1 %v1098_v57, %s7587_s28  ;;  %v711_v52 = vrot.slane %v709_v47, 1  ;;  %v714_v57 = vshrl.u32 %v7330_v50, 16  ;;  %v1100_v4 = vrot.slane %v7333_v63, 1  ;;  %v7335_v6 = vld [vmem:[%s7720_s25 + $0x44] ss:$0 sps:$4 sm:$0x11]  }
  0x41   : > { %1139 = vrot.lane.b32.xlu0 %v1095_v51, %s7587_s28  ;;  %v707_v51 = vor.u32 %v706_v46, %v702_v42  ;;  %v723_v3 = vrot.slane %v721_v62, 1  ;;  %v1103_v11 = vrot.slane %v7335_v6, 1  ;;  %v1603_v12 = vshrl.u32 %v7338_v7, 16  ;;  %v7336_v19 = vld [vmem:[%s7720_s25 + $0x3c] sm:$0xff]   ;;  %v7337_v21 = vld [vmem:[%s7720_s25 + $0x48] sm:$0xff]   ;;  %v7350_v48 = vld [vmem:[%s7720_s25 + $0x54] sm:$0xff]  }
  0x42   : > { %v1605_v14 = vshll.u32 %v7338_v7, 16  ;;  %v1615_v15 = vshrl.u32 %v7340_v10, 16  ;;  %v1617_v18 = vshll.u32 %v7340_v10, 16  ;;  %v7342_v29 = vld [vmem:[%s7720_s25 + $0x3c] sm:$0xfe]   ;;  %v7348_v31 = vld [vmem:[%s7720_s25 + $0x48] sm:$0xff]  }
  0x43   : > { %v712_v59 = vsel %vm652_vm1, %v707_v51, %v711_v52  ;;  %v1104_v16 = vsel %vm1086_vm0, %v1102_v9, %v1103_v11  ;;  %v7343_v30 = vld [vmem:[%s7720_s25 + $0x44] ss:$0 sps:$4 sm:$0x11]   ;;  %v1999_v33 = vrot.slane %v7342_v29, 1  ;;  %v7344_v34 = vld [vmem:[%s7720_s25 + $0x48] sm:$0xfe]  }
  0x44   : > { %1319 = vrot.lane.b32.xlu1 %v7309_v58, %s7585_s26  ;;  %v716_v58 = vshll.u32 %v7330_v50, 16  ;;  %v1607_v20 = vrot.slane %v1605_v14, 1  ;;  %v2000_v36 = vrot.slane %v7343_v30, 1  ;;  %v7345_v37 = vld [vmem:[%s7720_s25 + $0x50] ss:$0 sps:$4 sm:$0x11]  }
  0x45   : > { %1317 = vrot.lane.b32.xlu0 %v7308_v54, %s7585_s26  ;;  %v2895_v54 = vsel %vm1086_vm0, %v2893_v38, %v2894_v40  ;;  %v2002_v39 = vrot.slane %v7344_v34, 1  ;;  %v2503_v40 = vshrl.u32 %v7348_v31, 16  ;;  %v2003_v41 = vrot.slane %v7345_v37, 1  ;;  %v7346_v47 = vld [vmem:[%s7720_s25 + $0x48] sm:$0xff]   ;;  %v7347_v50 = vld [vmem:[%s7720_s25 + $0x54] sm:$0xff]  }
  0x46   : > { %v718_v61 = vrot.slane %v716_v58, 1  ;;  %v1608_v25 = vor.u32 %v1607_v20, %v1603_v12  ;;  %v2505_v42 = vshll.u32 %v7348_v31, 16  ;;  %v2001_v43 = vsel %vm1086_vm0, %v1999_v33, %v2000_v36  ;;  %v7351_v49 = vld [vmem:[%s7720_s25 + $0x5c] ss:$0 sps:$4 sm:$0x11]   ;;  %v7354_v55 = vld [vmem:[%s7720_s25 + $0x48] sm:$0xff]  }
  0x47   : > { %v2004_v46 = vsel %vm1086_vm0, %v2002_v39, %v2003_v41  ;;  %v2515_v52 = vshrl.u32 %v7350_v48, 16  ;;  %v2517_v53 = vshll.u32 %v7350_v48, 16  ;;  %v7352_v58 = vld [vmem:[%s7720_s25 + $0x48] sm:$0xfe]   ;;  %v7356_v6 = vld [vmem:[%s7720_s25 + $0x54] sm:$0xfe]  }
  0x48   : > { %1752 = vrot.lane.b32.xlu1 %v1601_v13, %s7589_s14  ;;  %v719_v2 = vor.u32 %v718_v61, %v714_v57  ;;  %v1101_v13 = vsel %vm1086_vm0, %v1099_v0, %v1100_v4  ;;  %v2899_v62 = vrot.slane %v7352_v58, 1  ;;  %v726_v0 = vshrl.u32 %v7354_v55, 16  ;;  %v7357_v10 = vld [vmem:[%s7720_s25 + $0x5c] ss:$0 sps:$4 sm:$0x11]   ;;  %v7366_v31 = vld [vmem:[%s7720_s25 + $0x54] sm:$0xff]  }
  0x49   : > { %1750 = vrot.lane.b32.xlu0 %v1589_v8, %s7589_s14  ;;  %v2519_v60 = vrot.slane %v2517_v53, 1  ;;  %v728_v4 = vshll.u32 %v7354_v55, 16  ;;  %v2902_v12 = vrot.slane %v7356_v6, 1  ;;  %v7363_v30 = vld [vmem:[%s7720_s25 + $0x5c] ss:$0 sps:$4 sm:$0x11]  }
  0x4a   : > { %v724_v8 = vsel %vm652_vm1, %v719_v2, %v723_v3  ;;  %v7355_v3 = vld [vmem:[%s7720_s25 + $0x50] ss:$0 sps:$4 sm:$0x11]   ;;  %v7368_v33 = vld [vmem:[%s7720_s25 + $0x60] sm:$0xff]   ;;  %v1627_v36 = vshrl.u32 %v7366_v31, 16  ;;  %v1629_v39 = vshll.u32 %v7366_v31, 16 }
  0x4b   : > { %v2520_v2 = vor.u32 %v2519_v60, %v2515_v52  ;;  %v733_v9 = vshll.u32 %v7355_v3, 16  ;;  %v1639_v41 = vshrl.u32 %v7368_v33, 16  ;;  %v7370_v52 = vld [vmem:[%s7720_s25 + $0x54] sm:$0xfe]   ;;  %v7376_v55 = vld [vmem:[%s7720_s25 + $0x60] sm:$0xff]   ;;  %v7378_v3 = vld [vmem:[%s7720_s25 + $0x6c] sm:$0xff]  }
  0x4c   : > { %2041 = vrot.lane.b32.xlu1 %v1998_v22, %s7586_s27  ;;  %v7373_v60 = vld [vmem:[%s7720_s25 + $0x68] ss:$0 sps:$4 sm:$0x11]  }
  0x4d   : > { %2039 = vrot.lane.b32.xlu0 %v1995_v17, %s7586_s27  ;;  %v7339_v17 = vld [vmem:[%s7720_s25 + $0x44] ss:$0 sps:$4 sm:$0x11]   ;;  %v7384_v31 = vld [vmem:[%s7720_s25 + $0x68] ss:$0 sps:$4 sm:$0x11]  }
  0x4e   : > { %v1610_v22 = vshll.u32 %v7339_v17, 16 }
  0x50   : > { %2219 = vrot.lane.b32.xlu1 %v7319_v24, %s7590_s16  ;;  %v1619_v24 = vrot.slane %v1617_v18, 1  ;;  %v1612_v26 = vrot.slane %v1610_v22, 1  ;;  %v7359_v18 = vld [vmem:[%s7720_s25 + $0x5c] ss:$0 sps:$4 sm:$0x11]  }
  0x51   : > { %2217 = vrot.lane.b32.xlu0 %v7318_v23, %s7590_s16  ;;  %v7341_v23 = vld [vmem:[%s7720_s25 + $0x50] ss:$0 sps:$4 sm:$0x11]  }
  0x52   : > { %v1620_v27 = vor.u32 %v1619_v24, %v1615_v15  ;;  %v1622_v28 = vshll.u32 %v7341_v23, 16  ;;  %v1613_v35 = vsel %vm652_vm1, %v1608_v25, %v1612_v26  ;;  %v735_v15 = vrot.slane %v733_v9, 1  ;;  %v7361_v24 = vld [vmem:[%s7720_s25 + $0x50] ss:$0 sps:$4 sm:$0x11]  }
  0x53   : > { %v745_v23 = vshll.u32 %v7359_v18, 16  ;;  %v7362_v26 = vld [vmem:[%s7720_s25 + $0x54] sm:$0xfe]   ;;  %v1106_v29 = vrot.slane %v7361_v24, 1 }
  0x54   : > { %2652 = vrot.lane.b32.xlu1 %v2501_v45, %s7591_s17  ;;  %v1624_v32 = vrot.slane %v1622_v28, 1  ;;  %v2507_v45 = vrot.slane %v2505_v42, 1  ;;  %v1641_v42 = vshll.u32 %v7368_v33, 16  ;;  %v7385_v33 = vld [vmem:[%s7720_s25 + $0xc] sm:$0xff]  }
  0x55   : > { %2650 = vrot.lane.b32.xlu0 %v2489_v44, %s7591_s17  ;;  %v7349_v44 = vld [vmem:[%s7720_s25 + $0x50] ss:$0 sps:$4 sm:$0x11]   ;;  %v747_v28 = vrot.slane %v745_v23, 1  ;;  %461 = vst.msk [vmem:[#allocation2 + $0x8] sm:$0xff] %vm459_vm2, %v7385_v33 }
  0x56   : > { %v1625_v38 = vsel %vm652_vm1, %v1620_v27, %v1624_v32  ;;  %v2510_v51 = vshll.u32 %v7349_v44, 16  ;;  %v2508_v56 = vor.u32 %v2507_v45, %v2503_v40  ;;  %v1108_v32 = vrot.slane %v7362_v26, 1 }
  0x57   : > { %v1631_v44 = vrot.slane %v1629_v39, 1  ;;  %v1643_v48 = vrot.slane %v1641_v42, 1  ;;  %v7386_v39 = vld [vmem:[%s7720_s25 + $0x6c] sm:$0xfe]  }
  0x58   : > { %853 = vrot.lane.b32.xlu1 %v712_v59, %s7588_s29  ;;  %v2512_v57 = vrot.slane %v2510_v51, 1  ;;  %v7353_v59 = vld [vmem:[%s7720_s25 + $0x50] ss:$0 sps:$4 sm:$0x11]  }
  0x59   : > { %2939 = vrot.lane.b32.xlu0 %v2895_v54, %s7592_s21  ;;  %v2522_v54 = vshll.u32 %v7351_v49, 16  ;;  %v2900_v63 = vrot.slane %v7353_v59, 1  ;;  %v1632_v49 = vor.u32 %v1631_v44, %v1627_v36  ;;  %v1644_v53 = vor.u32 %v1643_v48, %v1639_v41  ;;  %v7372_v59 = vld [vmem:[%s7720_s25 + $0x60] sm:$0xfe]   ;;  %v7388_v41 = vld [vmem:[%s7720_s25 + $0x6c] sm:$0xff]  }
  0x5a   : > { %v2513_v5 = vsel %vm652_vm1, %v2508_v56, %v2512_v57  ;;  %v2005_v57 = vrot.slane %v7370_v52, 1  ;;  %v762_v48 = vshrl.u32 %v7388_v41, 16 }
  0x5b   : > { %v2524_v61 = vrot.slane %v2522_v54, 1  ;;  %v2901_v17 = vsel %vm1086_vm0, %v2899_v62, %v2900_v63  ;;  %v7371_v54 = vld [vmem:[%s7720_s25 + $0x5c] ss:$0 sps:$4 sm:$0x11]   ;;  %v2008_v63 = vrot.slane %v7372_v59, 1 }
  0x5c   : > { %855 = vrot.lane.b32.xlu1 %v724_v8, %s7588_s29  ;;  %v730_v8 = vrot.slane %v728_v4, 1  ;;  %v2006_v58 = vrot.slane %v7371_v54, 1 }
  0x5d   : > { %2941 = vrot.lane.b32.xlu0 %v2898_v1, %s7592_s21  ;;  %v7358_v1 = vld [vmem:[%s7720_s25 + $0x54] sm:$0xff]   ;;  %v2525_v7 = vsel %vm652_vm1, %v2520_v2, %v2524_v61  ;;  %v7377_v2 = vld [vmem:[%s7720_s25 + $0x68] ss:$0 sps:$4 sm:$0x11]  }
  0x5e   : > { %v738_v11 = vshrl.u32 %v7358_v1, 16  ;;  %v731_v14 = vor.u32 %v730_v8, %v726_v0  ;;  %v2009_v0 = vrot.slane %v7373_v60, 1  ;;  %v2007_v4 = vsel %vm1086_vm0, %v2005_v57, %v2006_v58 }
  0x60   : > { %1145 = vrot.lane.b32.xlu1 %v1104_v16, %s7587_s28  ;;  %v2903_v16 = vrot.slane %v7357_v10, 1  ;;  %v736_v20 = vsel %vm652_vm1, %v731_v14, %v735_v15  ;;  %v2010_v9 = vsel %vm1086_vm0, %v2008_v63, %v2009_v0  ;;  %v7374_v10 = vld [vmem:[%s7720_s25 + $0x60] sm:$0xff]   ;;  %v2541_v14 = vshll.u32 %v7378_v3, 16  ;;  %v7375_v15 = vld [vmem:[%s7720_s25 + $0x6c] sm:$0xff]  }
  0x61   : > { %1143 = vrot.lane.b32.xlu0 %v1101_v13, %s7587_s28  ;;  %v740_v13 = vshll.u32 %v7358_v1, 16  ;;  %v2529_v1 = vshll.u32 %v7376_v55, 16  ;;  %v7392_v63 = vld [vmem:[%s7720_s25 + $0x6c] sm:$0xfe]  }
  0x62   : > { %v2904_v27 = vsel %vm1086_vm0, %v2902_v12, %v2903_v16  ;;  %v7379_v12 = vld [vmem:[%s7720_s25 + $0x74] ss:$0 sps:$4 sm:$0x11]   ;;  %v7380_v16 = vld [vmem:[%s7720_s25] sm:$0xff]   ;;  %v2543_v18 = vrot.slane %v2541_v14, 1 }
  0x63   : > { %v2531_v8 = vrot.slane %v2529_v1, 1  ;;  %460 = vst.msk [vmem:[#allocation2] sm:$0xff] %vm459_vm2, %v7380_v16  ;;  %v7393_v0 = vld [vmem:[%s7720_s25 + $0x74] ss:$0 sps:$4 sm:$0x11]  }
  0x64   : > { %1323 = vrot.lane.b32.xlu1 %v7337_v21, %s7585_s26  ;;  %v7360_v21 = vld [vmem:[%s7720_s25 + $0x48] sm:$0xfe]  }
  0x65   : > { %1321 = vrot.lane.b32.xlu0 %v7336_v19, %s7585_s26  ;;  %v742_v19 = vrot.slane %v740_v13, 1  ;;  %v1105_v25 = vrot.slane %v7360_v21, 1  ;;  %v2539_v13 = vshrl.u32 %v7378_v3, 16  ;;  %v1114_v3 = vrot.slane %v7392_v63, 1 }
  0x66   : > { %v7413_v63 = vld [vmem:[%s7720_s25 + $0x8c] ss:$0 sps:$4 sm:$0x11]  }
  0x67   : > { %v743_v22 = vor.u32 %v742_v19, %v738_v11  ;;  %v1107_v37 = vsel %vm1086_vm0, %v1105_v25, %v1106_v29  ;;  %v2534_v11 = vshll.u32 %v7377_v2, 16  ;;  %v2546_v19 = vshll.u32 %v7379_v12, 16  ;;  %v7382_v25 = vld [vmem:[%s7720_s25 + $0x68] ss:$0 sps:$4 sm:$0x11]  }
  0x68   : > { %1756 = vrot.lane.b32.xlu1 %v1625_v38, %s7589_s14  ;;  %v7367_v38 = vld [vmem:[%s7720_s25 + $0x5c] ss:$0 sps:$4 sm:$0x11]   ;;  %v2544_v23 = vor.u32 %v2543_v18, %v2539_v13  ;;  %v7397_v12 = vld [vmem:[%s7720_s25 + $0x74] ss:$0 sps:$4 sm:$0x11]  }
  0x69   : > { %1754 = vrot.lane.b32.xlu0 %v1613_v35, %s7589_s14  ;;  %v748_v34 = vsel %vm652_vm1, %v743_v22, %v747_v28  ;;  %v1109_v35 = vrot.slane %v7363_v30, 1  ;;  %v1634_v45 = vshll.u32 %v7367_v38, 16  ;;  %v7381_v22 = vld [vmem:[%s7720_s25 + $0x60] sm:$0xfe]   ;;  %v2548_v24 = vrot.slane %v2546_v19, 1 }
  0x6a   : > { %v2905_v28 = vrot.slane %v7381_v22, 1  ;;  %v2906_v30 = vrot.slane %v7382_v25, 1  ;;  %v1658_v16 = vshll.u32 %v7397_v12, 16  ;;  %v7400_v22 = vld [vmem:[%s7720_s25 + $0x18] sm:$0xff]  }
  0x6b   : > { %v1110_v40 = vsel %vm1086_vm0, %v1108_v32, %v1109_v35  ;;  %v2549_v35 = vsel %vm652_vm1, %v2544_v23, %v2548_v24  ;;  %462 = vst.msk [vmem:[#allocation2 + $0x10] sm:$0xff] %vm459_vm2, %v7400_v22 }
  0x6c   : > { %2045 = vrot.lane.b32.xlu1 %v2004_v46, %s7586_s27  ;;  %v7369_v46 = vld [vmem:[%s7720_s25 + $0x68] ss:$0 sps:$4 sm:$0x11]   ;;  %v2907_v42 = vsel %vm1086_vm0, %v2905_v28, %v2906_v30  ;;  %v1660_v23 = vrot.slane %v1658_v16, 1  ;;  %v7401_v28 = vld [vmem:[%s7720_s25 + $0x6c] sm:$0xfe]  }
  0x6d   : > { %2043 = vrot.lane.b32.xlu0 %v2001_v43, %s7586_s27  ;;  %v7364_v43 = vld [vmem:[%s7720_s25 + $0x54] sm:$0xff]   ;;  %v1646_v51 = vshll.u32 %v7369_v46, 16  ;;  %v2908_v46 = vrot.slane %v7386_v39, 1 }
  0x6e   : > { %v7403_v39 = vld [vmem:[%s7720_s25 + $0x78] sm:$0xfe]  }
  0x6f   : > { %v1648_v56 = vrot.slane %v1646_v51, 1  ;;  %v7389_v51 = vld [vmem:[%s7720_s25 + $0x74] ss:$0 sps:$4 sm:$0x11]  }
  0x70   : > { %2223 = vrot.lane.b32.xlu1 %v7347_v50, %s7590_s16  ;;  %v1636_v50 = vrot.slane %v1634_v45, 1  ;;  %v769_v54 = vshll.u32 %v7389_v51, 16  ;;  %v7593_v51 = vmov 65535  }
  0x71   : > { %2221 = vrot.lane.b32.xlu0 %v7346_v47, %s7590_s16  ;;  %v7365_v47 = vld [vmem:[%s7720_s25 + $0x60] sm:$0xff]   ;;  %v1649_v62 = vsel %vm652_vm1, %v1644_v53, %v1648_v56  ;;  %v7391_v56 = vld [vmem:[%s7720_s25 + $0x68] ss:$0 sps:$4 sm:$0x11]  }
  0x72   : > { %v1637_v61 = vsel %vm652_vm1, %v1632_v49, %v1636_v50  ;;  %v764_v49 = vshll.u32 %v7388_v41, 16  ;;  %v771_v60 = vrot.slane %v769_v54, 1  ;;  %v7411_v54 = vld [vmem:[%s7720_s25 + $0x80] ss:$0 sps:$4 sm:$0x11]  }
  0x74   : > { %2656 = vrot.lane.b32.xlu1 %v2525_v7, %s7591_s17  ;;  %v2527_v7 = vshrl.u32 %v7376_v55, 16  ;;  %v766_v53 = vrot.slane %v764_v49, 1  ;;  %v7390_v55 = vld [vmem:[%s7720_s25 + $0x60] sm:$0xfe]  }
  0x75   : > { %2654 = vrot.lane.b32.xlu0 %v2513_v5, %s7591_s17  ;;  %v7408_v49 = vld [vmem:[%s7720_s25 + $0x84] sm:$0xff]  }
  0x76   : > { %v2532_v21 = vor.u32 %v2531_v8, %v2527_v7  ;;  %v767_v58 = vor.u32 %v766_v53, %v762_v48  ;;  %v7394_v8 = vld [vmem:[%s7720_s25 + $0x6c] sm:$0xff]  }
  0x78   : > { %857 = vrot.lane.b32.xlu1 %v736_v20, %s7588_s29  ;;  %v7383_v20 = vld [vmem:[%s7720_s25 + $0x60] sm:$0xff]   ;;  %v772_v1 = vsel %vm652_vm1, %v767_v58, %v771_v60 }
  0x79   : > { %2943 = vrot.lane.b32.xlu0 %v2901_v17, %s7592_s21  ;;  %v2536_v17 = vrot.slane %v2534_v11, 1  ;;  %v750_v29 = vshrl.u32 %v7383_v20, 16  ;;  %v752_v32 = vshll.u32 %v7383_v20, 16  ;;  %v7395_v11 = vld [vmem:[%s7720_s25 + $0x78] sm:$0xff]  }
  0x7b   : > { %v754_v36 = vrot.slane %v752_v32, 1  ;;  %v7402_v32 = vld [vmem:[%s7720_s25 + $0x74] ss:$0 sps:$4 sm:$0x11]  }
  0x7c   : > { %859 = vrot.lane.b32.xlu1 %v748_v34, %s7588_s29  ;;  %v2537_v34 = vsel %vm652_vm1, %v2532_v21, %v2536_v17  ;;  %v7399_v17 = vld [vmem:[%s7720_s25 + $0x80] ss:$0 sps:$4 sm:$0x11]  }
  0x7d   : > { %2945 = vrot.lane.b32.xlu0 %v2904_v27, %s7592_s21  ;;  %v1670_v25 = vshll.u32 %v7399_v17, 16 }
  0x80   : > { %1149 = vrot.lane.b32.xlu1 %v1110_v40, %s7587_s28  ;;  %v7387_v40 = vld [vmem:[%s7720_s25 + $0x74] ss:$0 sps:$4 sm:$0x11]  }
  0x81   : > { %1147 = vrot.lane.b32.xlu0 %v1107_v37, %s7587_s28  ;;  %v757_v37 = vshll.u32 %v7384_v31, 16  ;;  %v1672_v31 = vrot.slane %v1670_v25, 1 }
  0x83   : > { %v759_v44 = vrot.slane %v757_v37, 1 }
  0x84   : > { %1327 = vrot.lane.b32.xlu1 %v7365_v47, %s7585_s26  ;;  %v2909_v47 = vrot.slane %v7387_v40, 1  ;;  %v7404_v40 = vld [vmem:[%s7720_s25 + $0x80] ss:$0 sps:$4 sm:$0x11]  }
  0x85   : > { %1325 = vrot.lane.b32.xlu0 %v7364_v43, %s7585_s26  ;;  %v755_v43 = vor.u32 %v754_v36, %v750_v29  ;;  %v7406_v36 = vld [vmem:[%s7720_s25 + $0x24] sm:$0xff]  }
  0x86   : > { %v2910_v57 = vsel %vm1086_vm0, %v2908_v46, %v2909_v47  ;;  %463 = vst.msk [vmem:[#allocation2 + $0x18] sm:$0xff] %vm459_vm2, %v7406_v36  ;;  %v7407_v46 = vld [vmem:[%s7720_s25 + $0x78] sm:$0xff]   ;;  %v7409_v47 = vld [vmem:[%s9209_s1 + $0x8] sm:$0x3f]  }
  0x87   : > { %v760_v50 = vsel %vm652_vm1, %v755_v43, %v759_v44  ;;  %v2015_v43 = vrot.slane %v7404_v40, 1 }
  0x88   : > { %1760 = vrot.lane.b32.xlu1 %v1649_v62, %s7589_s14  ;;  %v1112_v62 = vrot.slane %v7391_v56, 1 }
  0x89   : > { %1758 = vrot.lane.b32.xlu0 %v1637_v61, %s7589_s14  ;;  %v1111_v61 = vrot.slane %v7390_v55, 1 }
  0x8c   : > { %2049 = vrot.lane.b32.xlu1 %v2010_v9, %s7586_s27  ;;  %v7396_v9 = vld [vmem:[%s7720_s25 + $0x6c] sm:$0xff]  }
  0x8d   : > { %v7926_v5 = vpop.permute.xlu1 %1315  ;;  %v7928_v6 = vpop.permute.xlu0 %1313  ;;  %2047 = vrot.lane.b32.xlu0 %v2007_v4, %s7586_s27  ;;  %v1113_v4 = vsel %vm1086_vm0, %v1111_v61, %v1112_v62  ;;  %v1651_v14 = vshrl.u32 %v7396_v9, 16  ;;  %v2558_v61 = vshll.u32 %v7411_v54, 16  ;;  %v7412_v62 = vld [vmem:[%s7720_s25 + $0x84] sm:$0xff]  }
  0x8e   : > { %v7428_v54 = vld [vmem:[%s7720_s25 + $0x84] sm:$0xff]  }
  0x90   : > { %2227 = vrot.lane.b32.xlu1 %v7375_v15, %s7590_s16  ;;  %v1653_v15 = vshll.u32 %v7396_v9, 16  ;;  %v2570_v9 = vshll.u32 %v7413_v63, 16  ;;  %v1677_v63 = vshll.u32 %v7428_v54, 16 }
  0x91   : > { %v7941_v26 = vpop.permute.xlu0 %2035  ;;  %2225 = vrot.lane.b32.xlu0 %v7374_v10, %s7590_s16 }
  0x92   : > { %v1136_v27 = vpop.permute.xlu1 %1135  ;;  %v1655_v21 = vrot.slane %v1653_v15, 1  ;;  %v2572_v15 = vrot.slane %v2570_v9, 1 }
  0x94   : > { %2660 = vrot.lane.b32.xlu1 %v2549_v35, %s7591_s17  ;;  %v2011_v35 = vrot.slane %v7401_v28, 1  ;;  %v7418_v28 = vld [vmem:[%s7720_s25 + $0x84] sm:$0xfe]  }
  0x95   : > { %2658 = vrot.lane.b32.xlu0 %v2537_v34, %s7591_s17 }
  0x96   : > { %v1138_v38 = vpop.permute.xlu1 %1137 }
  0x97   : > { %v846_v45 = vpop.permute.xlu0 %845 }
  0x98   : > { %894 = vst.msk [vmem:[#allocation2] sm:$0xff] %vm893_vm3, %v846_v45  ;;  %861 = vrot.lane.b32.xlu1 %v760_v50, %s7588_s29  ;;  %v7410_v50 = vld [vmem:[%s7720_s25 + $0x78] sm:$0xff]  }
  0x99   : > { %1184 = vst.msk [vmem:[#allocation2] sm:$0xff] %vm1183_vm4, %v1136_v27  ;;  %2947 = vrot.lane.b32.xlu0 %v2907_v42, %s7592_s21  ;;  %v1656_v27 = vor.u32 %v1655_v21, %v1651_v14  ;;  %v2014_v42 = vrot.slane %v7403_v39, 1  ;;  %v2551_v55 = vshrl.u32 %v7410_v50, 16  ;;  %v2553_v56 = vshll.u32 %v7410_v50, 16  ;;  %v7424_v50 = vld [vmem:[%s7720_s25 + $0x84] sm:$0xfe]  }
  0x9a   : > { %v2038_v52 = vpop.permute.xlu1 %2037  ;;  %1362 = vst.msk [vmem:[#allocation2] sm:$0xff] %vm1361_vm5, %v7928_v6  ;;  %v1115_v6 = vrot.slane %v7393_v0, 1 }
  0x9b   : > { %v848_v59 = vpop.permute.xlu0 %847  ;;  %v1661_v34 = vsel %vm652_vm1, %v1656_v27, %v1660_v23  ;;  %v2016_v48 = vsel %vm1086_vm0, %v2014_v42, %v2015_v43  ;;  %v2555_v60 = vrot.slane %v2553_v56, 1  ;;  %v7422_v42 = vld [vmem:[%s7720_s25 + $0x78] sm:$0xfe]  }
  0x9c   : > { %895 = vst.msk [vmem:[#allocation2 + $0x8] sm:$0xff] %vm893_vm3, %v848_v59  ;;  %863 = vrot.lane.b32.xlu1 %v772_v1, %s7588_s29  ;;  %v1116_v10 = vsel %vm1086_vm0, %v1114_v3, %v1115_v6  ;;  %v2560_v1 = vrot.slane %v2558_v61, 1  ;;  %v2565_v3 = vshll.u32 %v7412_v62, 16  ;;  %v7416_v6 = vld [vmem:[%s7720_s25 + $0x78] sm:$0xff]  }
  0x9d   : > { %1185 = vst.msk [vmem:[#allocation2 + $0x8] sm:$0xff] %vm1183_vm4, %v1138_v38  ;;  %2949 = vrot.lane.b32.xlu0 %v2910_v57, %s7592_s21  ;;  %v2012_v38 = vrot.slane %v7402_v32, 1  ;;  %v2556_v0 = vor.u32 %v2555_v60, %v2551_v55  ;;  %v774_v17 = vshrl.u32 %v7416_v6, 16  ;;  %v1675_v60 = vshrl.u32 %v7428_v54, 16 }
  0x9e   : > { %v1749_v2 = vpop.permute.xlu1 %1748  ;;  %1363 = vst.msk [vmem:[#allocation2 + $0x8] sm:$0xff] %vm1361_vm5, %v7926_v5  ;;  %v7398_v5 = vld [vmem:[%s7720_s25 + $0x78] sm:$0xff]  }
  0x9f   : > { %1796 = vst.msk [vmem:[#allocation2 + $0x8] sm:$0xff] %vm1794_vm6, %v1749_v2  ;;  %v1747_v7 = vpop.permute.xlu0 %1746  ;;  %v1663_v18 = vshrl.u32 %v7398_v5, 16  ;;  %v1665_v19 = vshll.u32 %v7398_v5, 16  ;;  %v2013_v41 = vsel %vm1086_vm0, %v2011_v35, %v2012_v38  ;;  %v2563_v2 = vshrl.u32 %v7412_v62, 16 }
  0xa0   : > { %1795 = vst.msk [vmem:[#allocation2] sm:$0xff] %vm1794_vm6, %v1747_v7  ;;  %1153 = vrot.lane.b32.xlu1 %v1116_v10, %s7587_s28  ;;  %v7415_v10 = vld [vmem:[%s7720_s25 + $0x80] ss:$0 sps:$4 sm:$0x11]   ;;  %v2561_v5 = vsel %vm652_vm1, %v2556_v0, %v2560_v1 }
  0xa1   : > { %2085 = vst.msk [vmem:[#allocation2 + $0x8] sm:$0xff] %vm2083_vm7, %v2038_v52  ;;  %1151 = vrot.lane.b32.xlu0 %v1113_v4, %s7587_s28  ;;  %2084 = vst.msk [vmem:[#allocation2] sm:$0xff] %vm2083_vm7, %v7941_v26  ;;  %v1667_v24 = vrot.slane %v1665_v19, 1  ;;  %v7405_v26 = vld [vmem:[%s9209_s1] sm:$0xff]   ;;  %v3082_v52 = vsel %vm3080_vm11, 4294967295, %v7593_v51  ;;  %v2912_v16 = vrot.slane %v7415_v10, 1 }
  0xa2   : > { %v2216_v13 = vpop.permute.xlu1 %2215  ;;  %7074 = vmatprep.subr.bf16.mxu0 %v7405_v26  ;;  %v3083_v53 = vsel %vm3081_vm12, %v3082_v52, 0  ;;  %v7414_v4 = vld [vmem:[%s7720_s25 + $0x78] sm:$0xfe]   ;;  %v7425_v52 = vld [vmem:[%s7720_s25 + $0x8c] ss:$0 sps:$4 sm:$0x11]  }
  0xa3   : > { %2263 = vst.msk [vmem:[#allocation2 + $0x8] sm:$0xff] %vm2261_vm8, %v2216_v13  ;;  %v2214_v20 = vpop.permute.xlu0 %2213  ;;  %v1668_v30 = vor.u32 %v1667_v24, %v1663_v18  ;;  %7075 = vmatpush3.bf16.msra.mxu0 %v7405_v26  ;;  %v3085_v58 = vand.u32 %v7409_v47, %v3083_v53  ;;  %v2567_v13 = vrot.slane %v2565_v3, 1  ;;  %v2911_v14 = vrot.slane %v7414_v4, 1  ;;  %v7426_v53 = vld [vmem:[%s7720_s25 + $0x84] sm:$0xff]  }
  0xa4   : > { %2262 = vst.msk [vmem:[#allocation2] sm:$0xff] %vm2261_vm8, %v2214_v20  ;;  %1331 = vrot.lane.b32.xlu1 %v7395_v11, %s7585_s26  ;;  %v7420_v11 = vld [vmem:[%s7720_s25 + $0x84] sm:$0xff]   ;;  %v776_v18 = vshll.u32 %v7416_v6, 16  ;;  %v7417_v20 = vld [vmem:[%s7720_s25 + $0x80] ss:$0 sps:$4 sm:$0x11]  }
  0xa5   : > { %1329 = vrot.lane.b32.xlu0 %v7394_v8, %s7585_s26  ;;  %v1673_v37 = vsel %vm652_vm1, %v1668_v30, %v1672_v31  ;;  %7076 = vmatprep.subr.bf16.mxu0 %v3085_v58  ;;  %v2568_v19 = vor.u32 %v2567_v13, %v2563_v2  ;;  %v2913_v23 = vsel %vm1086_vm0, %v2911_v14, %v2912_v16  ;;  %v781_v27 = vshll.u32 %v7417_v20, 16  ;;  %v7429_v62 = vld [vmem:[%s7720_s25 + $0x8c] ss:$0 sps:$4 sm:$0x11]   ;;  %v7427_v2 = vld [vmem:[%s7720_s25 + $0x90] sm:$0xff]   ;;  %v7437_v13 = vld [vmem:[%s7720_s25 + $0x3c] sm:$0xff]  }
  0xa6   : > { %v2649_v29 = vpop.permute.xlu1 %2648  ;;  %v778_v24 = vrot.slane %v776_v18, 1  ;;  %v786_v31 = vshrl.u32 %v7420_v11, 16  ;;  %v788_v32 = vshll.u32 %v7420_v11, 16  ;;  %v1679_v3 = vrot.slane %v1677_v63, 1  ;;  %v7433_v18 = vld [vmem:[%s7720_s25 + $0x84] sm:$0xfe]  }
  0xa7   : > { %v2647_v33 = vpop.permute.xlu0 %2646  ;;  %2696 = vst.msk [vmem:[#allocation2 + $0x8] sm:$0xff] %vm2694_vm9, %v2649_v29  ;;  %7077 = vmatpush3.bf16.msra.mxu0 %v3085_v58  ;;  %v2573_v25 = vsel %vm652_vm1, %v2568_v19, %v2572_v15  ;;  %v7419_v29 = vld [vmem:[%s7720_s25 + $0x8c] ss:$0 sps:$4 sm:$0x11]   ;;  %v7430_v58 = vld [vmem:[%s7720_s25 + $0x90] sm:$0xff]   ;;  %v1682_v4 = vshll.u32 %v7429_v62, 16 }
  0xa8   : > { %2695 = vst.msk [vmem:[#allocation2] sm:$0xff] %vm2694_vm9, %v2647_v33  ;;  %1764 = vrot.lane.b32.xlu1 %v1673_v37, %s7589_s14  ;;  %v779_v30 = vor.u32 %v778_v24, %v774_v17  ;;  %v783_v33 = vrot.slane %v781_v27, 1  ;;  %v2915_v35 = vrot.slane %v7419_v29, 1  ;;  %v7421_v37 = vld [vmem:[%s7720_s25 + $0x8c] ss:$0 sps:$4 sm:$0x11]   ;;  %v1680_v10 = vor.u32 %v1679_v3, %v1675_v60 }
  0xa9   : > { %1762 = vrot.lane.b32.xlu0 %v1661_v34, %s7589_s14  ;;  %v2914_v34 = vrot.slane %v7418_v28, 1  ;;  %v790_v38 = vrot.slane %v788_v32, 1  ;;  %v7431_v6 = vld [vmem:[%s7720_s25 + $0x98] ss:$0 sps:$4 sm:$0x11]   ;;  %v1684_v11 = vrot.slane %v1682_v4, 1 }
  0xaa   : > { %v850_v45 = vpop.permute.xlu1 %849  ;;  %v784_v39 = vsel %vm652_vm1, %v779_v30, %v783_v33  ;;  %v7434_v19 = vld [vmem:[%s7720_s25 + $0x8c] ss:$0 sps:$4 sm:$0x11]   ;;  %465 = vst.msk [vmem:[#allocation2 + $0x28] sm:$0xff] %vm459_vm2, %v7437_v13  ;;  %v7435_v24 = vld [vmem:[%s7720_s25 + $0x90] sm:$0xfe]  }
  0xab   : > { %v2936_v44 = vpop.permute.xlu0 %2935  ;;  %896 = vst.msk [vmem:[#allocation2 + $0x10] sm:$0xff] %vm893_vm3, %v850_v45  ;;  %v791_v43 = vor.u32 %v790_v38, %v786_v31  ;;  %v7423_v45 = vld [vmem:[%s7720_s25 + $0x80] ss:$0 sps:$4 sm:$0x11]   ;;  %v1685_v16 = vsel %vm652_vm1, %v1680_v10, %v1684_v11  ;;  %v7438_v28 = vld [vmem:[%s7720_s25 + $0x90] sm:$0xff]   ;;  %v2020_v30 = vrot.slane %v7435_v24, 1 }
  0xac   : > { %2984 = vst.msk [vmem:[#allocation2] sm:$0xff] %vm2983_vm10, %v2936_v44  ;;  %2053 = vrot.lane.b32.xlu1 %v2016_v48, %s7586_s27  ;;  %v793_v44 = vshll.u32 %v7421_v37, 16  ;;  %v7436_v27 = vld [vmem:[%s7720_s25 + $0x98] ss:$0 sps:$4 sm:$0x11]   ;;  %v7440_v31 = vld [vmem:[%s7720_s25 + $0x90] sm:$0xff]  }
  0xad   : > { %2051 = vrot.lane.b32.xlu0 %v2013_v41, %s7586_s27  ;;  %v2916_v41 = vsel %vm1086_vm0, %v2914_v34, %v2915_v35  ;;  %v2021_v32 = vrot.slane %v7436_v27, 1  ;;  %v7441_v37 = vld [vmem:[%s7720_s25 + $0x98] ss:$0 sps:$4 sm:$0x11]   ;;  %v2575_v38 = vshrl.u32 %v7440_v31, 16  ;;  %v7450_v3 = vld [vmem:[%s7720_s25 + $0x9c] sm:$0xff]  }
  0xae   : > { %v852_v59 = vpop.permute.xlu1 %851  ;;  %v795_v47 = vrot.slane %v793_v44, 1  ;;  %v7445_v54 = vld [vmem:[%s7720_s25 + $0x98] ss:$0 sps:$4 sm:$0x11]  }
  0xaf   : > { %v2938_v57 = vpop.permute.xlu0 %2937  ;;  %897 = vst.msk [vmem:[#allocation2 + $0x18] sm:$0xff] %vm893_vm3, %v852_v59  ;;  %v1121_v59 = vrot.slane %v7425_v52, 1  ;;  %v2022_v34 = vsel %vm1086_vm0, %v2020_v30, %v2021_v32  ;;  %v2918_v62 = vrot.slane %v7445_v54, 1  ;;  %v7449_v11 = vld [vmem:[%s7720_s25 + $0xa4] ss:$0 sps:$4 sm:$0x11]  }
  0xb0   : > { %2985 = vst.msk [vmem:[#allocation2 + $0x8] sm:$0xff] %vm2983_vm10, %v2938_v57  ;;  %2231 = vrot.lane.b32.xlu1 %v7408_v49, %s7590_s16  ;;  %v1118_v49 = vrot.slane %v7423_v45, 1  ;;  %v796_v55 = vsel %vm652_vm1, %v791_v43, %v795_v47  ;;  %v1120_v57 = vrot.slane %v7424_v50, 1  ;;  %v7454_v32 = vld [vmem:[%s7720_s25 + $0x9c] sm:$0xfe]  }
  0xb1   : > { %2229 = vrot.lane.b32.xlu0 %v7407_v46, %s7590_s16  ;;  %v1117_v46 = vrot.slane %v7422_v42, 1  ;;  %v7443_v42 = vld [vmem:[%s7720_s25 + $0xa4] ss:$0 sps:$4 sm:$0x11]  }
  0xb2   : > { %v1142_v12 = vpop.permute.xlu1 %1141  ;;  %v1122_v0 = vsel %vm1086_vm0, %v1120_v57, %v1121_v59  ;;  %v2594_v50 = vshll.u32 %v7443_v42, 16 }
  0xb3   : > { %v1140_v7 = vpop.permute.xlu0 %1139  ;;  %v3000_v8 = vld [vmem:[#allocation2] sm:$0xff]  ;;  %1187 = vst.msk [vmem:[#allocation2 + $0x18] sm:$0xff] %vm1183_vm4, %v1142_v12  ;;  %v1119_v56 = vsel %vm1086_vm0, %v1117_v46, %v1118_v49  ;;  %v1694_v12 = vshll.u32 %v7431_v6, 16 }
  0xb4   : > { %1186 = vst.msk [vmem:[#allocation2 + $0x10] sm:$0xff] %vm1183_vm4, %v1140_v7  ;;  %7078 = vmatprep.mubr.msk.bf16.mxu0 %vm9220_vm13, %v3000_v8  ;;  %2664 = vrot.lane.b32.xlu1 %v2573_v25, %s7591_s17  ;;  %v1687_v7 = vshrl.u32 %v7430_v58, 16  ;;  %v1689_v8 = vshll.u32 %v7430_v58, 16 }
  0xb5   : > { %2662 = vrot.lane.b32.xlu0 %v2561_v5, %s7591_s17  ;;  %v7432_v5 = vld [vmem:[%s7720_s25 + $0x30] sm:$0xff]   ;;  %v1696_v17 = vrot.slane %v1694_v12, 1  ;;  %v810_v12 = vshrl.u32 %v7450_v3, 16 }
  0xb6   : > { %v1320_v26 = vpop.permute.xlu1 %1319  ;;  %v1691_v15 = vrot.slane %v1689_v8, 1  ;;  %464 = vst.msk [vmem:[#allocation2 + $0x20] sm:$0xff] %vm459_vm2, %v7432_v5 }
  0xb7   : > { %v1318_v21 = vpop.permute.xlu0 %1317  ;;  %v3001_v22 = vld [vmem:[#allocation2 + $0x8] sm:$0xff]  ;;  %1365 = vst.msk [vmem:[#allocation2 + $0x18] sm:$0xff] %vm1361_vm5, %v1320_v26 }
  0xb8   : > { %1364 = vst.msk [vmem:[#allocation2 + $0x10] sm:$0xff] %vm1361_vm5, %v1318_v21  ;;  %7079 = vmatmul.mubr.msk.bf16.vlgmr.msra.gmra.mrb[0].mxu0 %vm9220_vm13, %v3001_v22  ;;  %865 = vrot.lane.b32.xlu1 %v784_v39, %s7588_s29  ;;  %v1692_v20 = vor.u32 %v1691_v15, %v1687_v7  ;;  %v2017_v22 = vrot.slane %v7433_v18, 1  ;;  %v2577_v39 = vshll.u32 %v7440_v31, 16  ;;  %v7451_v18 = vld [vmem:[%s7720_s25 + $0xa4] ss:$0 sps:$4 sm:$0x11]  }
  0xb9   : > { %2951 = vrot.lane.b32.xlu0 %v2913_v23, %s7592_s21  ;;  %v2018_v23 = vrot.slane %v7434_v19, 1 }
  0xba   : > { %v1753_v40 = vpop.permute.xlu1 %1752  ;;  %v1697_v25 = vsel %vm652_vm1, %v1692_v20, %v1696_v17  ;;  %v2579_v45 = vrot.slane %v2577_v39, 1  ;;  %v2921_v17 = vrot.slane %v7449_v11, 1  ;;  %v1126_v39 = vrot.slane %v7454_v32, 1  ;;  %v7474_v32 = vld [vmem:[%s7720_s25 + $0xa8] sm:$0xfe]  }
  0xbb   : > { %v1751_v36 = vpop.permute.xlu0 %1750  ;;  %1798 = vst.msk [vmem:[#allocation2 + $0x18] sm:$0xff] %vm1794_vm6, %v1753_v40  ;;  %v2019_v29 = vsel %vm1086_vm0, %v2017_v22, %v2018_v23  ;;  %v7442_v40 = vld [vmem:[%s7720_s25 + $0x9c] sm:$0xff]   ;;  %v817_v23 = vshll.u32 %v7451_v18, 16  ;;  %v7471_v18 = vld [vmem:[%s7720_s25 + $0xb0] ss:$0 sps:$4 sm:$0x11]  }
  0xbc   : > { %1797 = vst.msk [vmem:[#allocation2 + $0x10] sm:$0xff] %vm1794_vm6, %v1751_v36  ;;  %867 = vrot.lane.b32.xlu1 %v796_v55, %s7588_s29  ;;  %v7439_v36 = vld [vmem:[%s7720_s25 + $0x9c] sm:$0xff]   ;;  %v2587_v46 = vshrl.u32 %v7442_v40, 16  ;;  %v2589_v47 = vshll.u32 %v7442_v40, 16  ;;  %v2596_v55 = vrot.slane %v2594_v50, 1 }
  0xbd   : > { %2953 = vrot.lane.b32.xlu0 %v2916_v41, %s7592_s21  ;;  %v2582_v41 = vshll.u32 %v7441_v37, 16  ;;  %v7461_v50 = vld [vmem:[%s7720_s25 + $0xb0] ss:$0 sps:$4 sm:$0x11]  }
  0xbe   : > { %v2042_v51 = vpop.permute.xlu1 %2041  ;;  %v2591_v52 = vrot.slane %v2589_v47, 1  ;;  %v7459_v47 = vld [vmem:[%s7720_s25 + $0xa4] ss:$0 sps:$4 sm:$0x11]  }
  0xbf   : > { %v2040_v48 = vpop.permute.xlu0 %2039  ;;  %2087 = vst.msk [vmem:[#allocation2 + $0x18] sm:$0xff] %vm2083_vm7, %v2042_v51  ;;  %v2584_v49 = vrot.slane %v2582_v41, 1  ;;  %v2580_v51 = vor.u32 %v2579_v45, %v2575_v38  ;;  %v7460_v41 = vld [vmem:[%s7720_s25 + $0xa8] sm:$0xff]   ;;  %v1706_v54 = vshll.u32 %v7459_v47, 16 }
  0xc0   : > { %2086 = vst.msk [vmem:[#allocation2 + $0x10] sm:$0xff] %vm2083_vm7, %v2040_v48  ;;  %1157 = vrot.lane.b32.xlu1 %v1122_v0, %s7587_s28  ;;  %v2592_v58 = vor.u32 %v2591_v52, %v2587_v46  ;;  %v7447_v0 = vld [vmem:[%s7720_s25 + $0x98] ss:$0 sps:$4 sm:$0x11]   ;;  %v7457_v46 = vld [vmem:[%s7720_s25 + $0xa8] sm:$0xff]  }
  0xc1   : > { %1155 = vrot.lane.b32.xlu0 %v1119_v56, %s7587_s28  ;;  %v7446_v56 = vld [vmem:[%s7720_s25 + $0x90] sm:$0xff]   ;;  %v2585_v57 = vsel %vm652_vm1, %v2580_v51, %v2584_v49  ;;  %v805_v8 = vshll.u32 %v7447_v0, 16  ;;  %v1713_v51 = vshll.u32 %v7460_v41, 16  ;;  %v7464_v0 = vld [vmem:[%s7720_s25 + $0xa4] ss:$0 sps:$4 sm:$0x11]  }
  0xc2   : > { %v2220_v1 = vpop.permute.xlu1 %2219  ;;  %v2597_v4 = vsel %vm652_vm1, %v2592_v58, %v2596_v55  ;;  %v7467_v58 = vld [vmem:[%s7720_s25 + $0x54] sm:$0xff]   ;;  %v7477_v47 = vld [vmem:[%s7720_s25 + $0xb0] ss:$0 sps:$4 sm:$0x11]  }
  0xc3   : > { %v2218_v61 = vpop.permute.xlu0 %2217  ;;  %2265 = vst.msk [vmem:[#allocation2 + $0x18] sm:$0xff] %vm2261_vm8, %v2220_v1  ;;  %v798_v1 = vshrl.u32 %v7446_v56, 16  ;;  %v807_v13 = vrot.slane %v805_v8, 1  ;;  %v1715_v55 = vrot.slane %v1713_v51, 1 }
  0xc4   : > { %2264 = vst.msk [vmem:[#allocation2 + $0x10] sm:$0xff] %vm2261_vm8, %v2218_v61  ;;  %1335 = vrot.lane.b32.xlu1 %v7427_v2, %s7585_s26  ;;  %v800_v2 = vshll.u32 %v7446_v56, 16  ;;  %v1718_v56 = vshll.u32 %v7461_v50, 16  ;;  %v7466_v8 = vld [vmem:[%s7720_s25 + $0xb0] ss:$0 sps:$4 sm:$0x11]  }
  0xc5   : > { %1333 = vrot.lane.b32.xlu0 %v7426_v53, %s7585_s26  ;;  %v7444_v53 = vld [vmem:[%s7720_s25 + $0x90] sm:$0xfe]   ;;  %467 = vst.msk [vmem:[#allocation2 + $0x38] sm:$0xff] %vm459_vm2, %v7467_v58 }
  0xc6   : > { %v2653_v14 = vpop.permute.xlu1 %2652  ;;  %v2917_v61 = vrot.slane %v7444_v53, 1  ;;  %v802_v7 = vrot.slane %v800_v2, 1 }
  0xc7   : > { %v2651_v9 = vpop.permute.xlu0 %2650  ;;  %2698 = vst.msk [vmem:[#allocation2 + $0x18] sm:$0xff] %vm2694_vm9, %v2653_v14 }
  0xc8   : > { %2697 = vst.msk [vmem:[#allocation2 + $0x10] sm:$0xff] %vm2694_vm9, %v2651_v9  ;;  %1768 = vrot.lane.b32.xlu1 %v1697_v25, %s7589_s14  ;;  %v2919_v6 = vsel %vm1086_vm0, %v2917_v61, %v2918_v62  ;;  %v7448_v9 = vld [vmem:[%s7720_s25 + $0x9c] sm:$0xfe]   ;;  %v803_v5 = vor.u32 %v802_v7, %v798_v1  ;;  %v7452_v25 = vld [vmem:[%s7720_s25 + $0x90] sm:$0xfe]   ;;  %v1720_v61 = vrot.slane %v1718_v56, 1 }
  0xc9   : > { %1766 = vrot.lane.b32.xlu0 %v1685_v16, %s7589_s14  ;;  %v2920_v15 = vrot.slane %v7448_v9, 1  ;;  %v812_v16 = vshll.u32 %v7450_v3, 16  ;;  %v1123_v30 = vrot.slane %v7452_v25, 1  ;;  %v7465_v7 = vld [vmem:[%s7720_s25 + $0xa8] sm:$0xfe]  }
  0xca   : > { %v854_v26 = vpop.permute.xlu1 %853  ;;  %v808_v19 = vsel %vm652_vm1, %v803_v5, %v807_v13  ;;  %v7470_v5 = vld [vmem:[%s7720_s25 + $0xa8] sm:$0xff]   ;;  %v2027_v13 = vrot.slane %v7466_v8, 1  ;;  %v7478_v56 = vld [vmem:[%s7720_s25 + $0xb4] sm:$0xfe]  }
  0xcb   : > { %v2940_v21 = vpop.permute.xlu0 %2939  ;;  %898 = vst.msk [vmem:[#allocation2 + $0x20] sm:$0xff] %vm893_vm3, %v854_v26  ;;  %v814_v20 = vrot.slane %v812_v16, 1  ;;  %v2922_v22 = vsel %vm1086_vm0, %v2920_v15, %v2921_v17  ;;  %v7453_v26 = vld [vmem:[%s7720_s25 + $0x98] ss:$0 sps:$4 sm:$0x11]  }
  0xcc   : > { %2986 = vst.msk [vmem:[#allocation2 + $0x10] sm:$0xff] %vm2983_vm10, %v2940_v21  ;;  %2057 = vrot.lane.b32.xlu1 %v2022_v34, %s7586_s27  ;;  %v7458_v21 = vld [vmem:[%s7720_s25 + $0x9c] sm:$0xff]   ;;  %v1124_v31 = vrot.slane %v7453_v26, 1  ;;  %v7455_v34 = vld [vmem:[%s7720_s25 + $0xa4] ss:$0 sps:$4 sm:$0x11]  }
  0xcd   : > { %2055 = vrot.lane.b32.xlu0 %v2019_v29, %s7586_s27  ;;  %v815_v27 = vor.u32 %v814_v20, %v810_v12  ;;  %v819_v29 = vrot.slane %v817_v23, 1  ;;  %v1127_v42 = vrot.slane %v7455_v34, 1  ;;  %v7468_v12 = vld [vmem:[%s7720_s25 + $0xa8] sm:$0xff]   ;;  %v7472_v15 = vld [vmem:[%s7720_s25 + $0xb4] sm:$0xff]   ;;  %v2601_v20 = vshll.u32 %v7470_v5, 16 }
  0xce   : > { %v856_v35 = vpop.permute.xlu1 %855  ;;  %v1125_v38 = vsel %vm1086_vm0, %v1123_v30, %v1124_v31  ;;  %v7469_v17 = vld [vmem:[%s7720_s25 + $0xb4] sm:$0xff]  }
  0xcf   : > { %v2942_v33 = vpop.permute.xlu0 %2941  ;;  %899 = vst.msk [vmem:[#allocation2 + $0x28] sm:$0xff] %vm893_vm3, %v856_v35  ;;  %v7456_v35 = vld [vmem:[%s7720_s25 + $0x9c] sm:$0xff]   ;;  %v820_v37 = vsel %vm652_vm1, %v815_v27, %v819_v29  ;;  %v1128_v45 = vsel %vm1086_vm0, %v1126_v39, %v1127_v42  ;;  %v2603_v26 = vrot.slane %v2601_v20, 1  ;;  %v2606_v27 = vshll.u32 %v7471_v18, 16  ;;  %v7480_v39 = vld [vmem:[%s7720_s25 + $0xb4] sm:$0xff]  }
  0xd0   : > { %2987 = vst.msk [vmem:[#allocation2 + $0x18] sm:$0xff] %vm2983_vm10, %v2942_v33  ;;  %2235 = vrot.lane.b32.xlu1 %v7439_v36, %s7590_s16  ;;  %v1699_v33 = vshrl.u32 %v7458_v21, 16  ;;  %v1701_v36 = vshll.u32 %v7458_v21, 16  ;;  %v2611_v21 = vshrl.u32 %v7472_v15, 16  ;;  %v2923_v42 = vrot.slane %v7474_v32, 1 }
  0xd1   : > { %2233 = vrot.lane.b32.xlu0 %v7438_v28, %s7590_s16  ;;  %v2608_v31 = vrot.slane %v2606_v27, 1  ;;  %v7490_v27 = vld [vmem:[%s7720_s25 + $0xc0] sm:$0xff]   ;;  %v7491_v32 = vld [vmem:[%s7720_s25 + $0xc8] ss:$0 sps:$4 sm:$0x11]  }
  0xd2   : > { %v1146_v48 = vpop.permute.xlu1 %1145 }
  0xd3   : > { %v1144_v43 = vpop.permute.xlu0 %1143  ;;  %v3002_v44 = vld [vmem:[#allocation2 + $0x10] sm:$0xff]  ;;  %1189 = vst.msk [vmem:[#allocation2 + $0x28] sm:$0xff] %vm1183_vm4, %v1146_v48  ;;  %v1711_v48 = vshrl.u32 %v7460_v41, 16 }
  0xd4   : > { %1188 = vst.msk [vmem:[#allocation2 + $0x20] sm:$0xff] %vm1183_vm4, %v1144_v43  ;;  %7082 = vmatprep.mubr.msk.bf16.mxu0 %vm9220_vm13, %v3002_v44  ;;  %2668 = vrot.lane.b32.xlu1 %v2597_v4, %s7591_s17  ;;  %v1703_v44 = vrot.slane %v1701_v36, 1 }
  0xd5   : > { %2666 = vrot.lane.b32.xlu0 %v2585_v57, %s7591_s17  ;;  %v7462_v57 = vld [vmem:[%s7720_s25 + $0x48] sm:$0xff]  }
  0xd6   : > { %v1324_v63 = vpop.permute.xlu1 %1323  ;;  %v1704_v53 = vor.u32 %v1703_v44, %v1699_v33  ;;  %466 = vst.msk [vmem:[#allocation2 + $0x30] sm:$0xff] %vm459_vm2, %v7462_v57  ;;  %v7476_v33 = vld [vmem:[%s7720_s25 + $0xa8] sm:$0xff]   ;;  %v7479_v57 = vld [vmem:[%s7720_s25 + $0xbc] ss:$0 sps:$4 sm:$0x11]  }
  0xd7   : > { %v1322_v59 = vpop.permute.xlu0 %1321  ;;  %v3003_v60 = vld [vmem:[#allocation2 + $0x18] sm:$0xff]  ;;  %1367 = vst.msk [vmem:[#allocation2 + $0x28] sm:$0xff] %vm1361_vm5, %v1324_v63 }
  0xd8   : > { %1366 = vst.msk [vmem:[#allocation2 + $0x20] sm:$0xff] %vm1361_vm5, %v1322_v59  ;;  %7083 = vmatmul.mubr.msk.bf16.gmra.mrb[4].mxu0 %vm9220_vm13, %v3003_v60  ;;  %869 = vrot.lane.b32.xlu1 %v808_v19, %s7588_s29  ;;  %v1708_v59 = vrot.slane %v1706_v54, 1  ;;  %v1716_v60 = vor.u32 %v1715_v55, %v1711_v48  ;;  %v7463_v63 = vld [vmem:[%s7720_s25 + $0x9c] sm:$0xfe]   ;;  %v2599_v19 = vshrl.u32 %v7470_v5, 16  ;;  %v834_v48 = vshrl.u32 %v7480_v39, 16 }
  0xd9   : > { %2955 = vrot.lane.b32.xlu0 %v2919_v6, %s7592_s21  ;;  %v2023_v4 = vrot.slane %v7463_v63, 1  ;;  %v2024_v6 = vrot.slane %v7464_v0, 1  ;;  %v829_v54 = vshll.u32 %v7477_v47, 16  ;;  %v7484_v5 = vld [vmem:[%s7720_s25 + $0xb4] sm:$0xfe]  }
  0xda   : > { %v1757_v14 = vpop.permute.xlu1 %1756  ;;  %v1709_v1 = vsel %vm652_vm1, %v1704_v53, %v1708_v59  ;;  %v1721_v3 = vsel %vm652_vm1, %v1716_v60, %v1720_v61  ;;  %v2604_v30 = vor.u32 %v2603_v26, %v2599_v19  ;;  %v836_v53 = vshll.u32 %v7480_v39, 16  ;;  %v7489_v26 = vld [vmem:[%s7720_s25 + $0xbc] ss:$0 sps:$4 sm:$0x11]  }
  0xdb   : > { %v1755_v10 = vpop.permute.xlu0 %1754  ;;  %1800 = vst.msk [vmem:[#allocation2 + $0x28] sm:$0xff] %vm1794_vm6, %v1757_v14  ;;  %v2025_v9 = vsel %vm1086_vm0, %v2023_v4, %v2024_v6  ;;  %v831_v59 = vrot.slane %v829_v54, 1  ;;  %v2926_v60 = vrot.slane %v7478_v56, 1  ;;  %v2927_v61 = vrot.slane %v7479_v57, 1  ;;  %v7482_v6 = vld [vmem:[%s7720_s25 + $0xa8] sm:$0xfe]  }
  0xdc   : > { %1799 = vst.msk [vmem:[#allocation2 + $0x20] sm:$0xff] %vm1794_vm6, %v1755_v10  ;;  %871 = vrot.lane.b32.xlu1 %v820_v37, %s7588_s29  ;;  %v2026_v10 = vrot.slane %v7465_v7, 1  ;;  %v838_v63 = vrot.slane %v836_v53, 1  ;;  %v7488_v7 = vld [vmem:[%s7720_s25 + $0xb4] sm:$0xff]   ;;  %v1132_v19 = vrot.slane %v7484_v5, 1 }
  0xdd   : > { %2957 = vrot.lane.b32.xlu0 %v2922_v22, %s7592_s21 }
  0xde   : > { %v2046_v28 = vpop.permute.xlu1 %2045  ;;  %v2028_v16 = vsel %vm1086_vm0, %v2026_v10, %v2027_v13  ;;  %v839_v8 = vor.u32 %v838_v63, %v834_v48  ;;  %v7485_v13 = vld [vmem:[%s7720_s25 + $0xbc] ss:$0 sps:$4 sm:$0x11]   ;;  %v7495_v48 = vld [vmem:[%s7720_s25 + $0xc0] sm:$0xfe]  }
  0xdf   : > { %v2044_v24 = vpop.permute.xlu0 %2043  ;;  %2089 = vst.msk [vmem:[#allocation2 + $0x28] sm:$0xff] %vm2083_vm7, %v2046_v28  ;;  %v7473_v28 = vld [vmem:[%s7720_s25 + $0xbc] ss:$0 sps:$4 sm:$0x11]   ;;  %v1133_v20 = vrot.slane %v7485_v13, 1  ;;  %v2032_v53 = vrot.slane %v7495_v48, 1 }
  0xe0   : > { %2088 = vst.msk [vmem:[#allocation2 + $0x20] sm:$0xff] %vm2083_vm7, %v2044_v24  ;;  %1161 = vrot.lane.b32.xlu1 %v1128_v45, %s7587_s28  ;;  %v2613_v24 = vshll.u32 %v7472_v15, 16  ;;  %v822_v45 = vshrl.u32 %v7476_v33, 16  ;;  %v7501_v63 = vld [vmem:[%s7720_s25 + $0xc8] ss:$0 sps:$4 sm:$0x11]  }
  0xe1   : > { %1159 = vrot.lane.b32.xlu0 %v1125_v38, %s7587_s28  ;;  %v7475_v38 = vld [vmem:[%s7720_s25 + $0xb0] ss:$0 sps:$4 sm:$0x11]  }
  0xe2   : > { %v2224_v43 = vpop.permute.xlu1 %2223  ;;  %v2615_v29 = vrot.slane %v2613_v24, 1  ;;  %v2924_v44 = vrot.slane %v7475_v38, 1  ;;  %v7487_v24 = vld [vmem:[%s7720_s25 + $0xc0] sm:$0xff]   ;;  %v1742_v38 = vshll.u32 %v7491_v32, 16 }
  0xe3   : > { %v2222_v40 = vpop.permute.xlu0 %2221  ;;  %2267 = vst.msk [vmem:[#allocation2 + $0x28] sm:$0xff] %vm2261_vm8, %v2224_v43 }
  0xe4   : > { %2266 = vst.msk [vmem:[#allocation2 + $0x20] sm:$0xff] %vm2261_vm8, %v2222_v40  ;;  %1339 = vrot.lane.b32.xlu1 %v7457_v46, %s7585_s26  ;;  %v2616_v34 = vor.u32 %v2615_v29, %v2611_v21  ;;  %v2609_v40 = vsel %vm652_vm1, %v2604_v30, %v2608_v31  ;;  %v824_v46 = vshll.u32 %v7476_v33, 16  ;;  %v2925_v50 = vsel %vm1086_vm0, %v2923_v42, %v2924_v44  ;;  %v7492_v30 = vld [vmem:[%s7720_s25 + $0x60] sm:$0xff]   ;;  %v7493_v42 = vld [vmem:[%s7720_s25 + $0xb4] sm:$0xfe]  }
  0xe5   : > { %1337 = vrot.lane.b32.xlu0 %v7456_v35, %s7585_s26  ;;  %v2618_v35 = vshll.u32 %v7473_v28, 16  ;;  %v1723_v21 = vshrl.u32 %v7488_v7, 16  ;;  %v1730_v31 = vshll.u32 %v7489_v26, 16  ;;  %v1735_v33 = vshrl.u32 %v7490_v27, 16  ;;  %468 = vst.msk [vmem:[#allocation2 + $0x40] sm:$0xff] %vm459_vm2, %v7492_v30 }
  0xe6   : > { %v2657_v52 = vpop.permute.xlu1 %2656  ;;  %v826_v51 = vrot.slane %v824_v46, 1  ;;  %v7494_v46 = vld [vmem:[%s7720_s25 + $0xbc] ss:$0 sps:$4 sm:$0x11]   ;;  %v2029_v47 = vrot.slane %v7493_v42, 1 }
  0xe7   : > { %v2655_v49 = vpop.permute.xlu0 %2654  ;;  %2700 = vst.msk [vmem:[#allocation2 + $0x28] sm:$0xff] %vm2694_vm9, %v2657_v52  ;;  %v2620_v43 = vrot.slane %v2618_v35, 1  ;;  %v7507_v26 = vld [vmem:[%s7720_s25 + $0xd4] ss:$0 sps:$4 sm:$0x11]  }
  0xe8   : > { %2699 = vst.msk [vmem:[#allocation2 + $0x20] sm:$0xff] %vm2694_vm9, %v2655_v49  ;;  %1772 = vrot.lane.b32.xlu1 %v1721_v3, %s7589_s14  ;;  %v827_v58 = vor.u32 %v826_v51, %v822_v45  ;;  %v1744_v45 = vrot.slane %v1742_v38, 1  ;;  %v7496_v51 = vld [vmem:[%s7720_s25 + $0xc8] ss:$0 sps:$4 sm:$0x11]  }
  0xe9   : > { %1770 = vrot.lane.b32.xlu0 %v1709_v1, %s7589_s14  ;;  %v2621_v49 = vsel %vm652_vm1, %v2616_v34, %v2620_v43  ;;  %v1737_v34 = vshll.u32 %v7490_v27, 16  ;;  %v2033_v57 = vrot.slane %v7496_v51, 1  ;;  %v7512_v38 = vld [vmem:[%s7720_s25 + $0xa8] sm:$0xff]  }
  0xea   : > { %v858_v2 = vpop.permute.xlu1 %857  ;;  %v832_v1 = vsel %vm652_vm1, %v827_v58, %v831_v59  ;;  %v7500_v58 = vld [vmem:[%s7720_s25 + $0xc0] sm:$0xff]   ;;  %474 = vst.msk [vmem:[#allocation2 + $0x70] sm:$0xff] %vm459_vm2, %v7512_v38  ;;  %v4080_v42 = vld [vmem:[#allocation4 + $0xc] sm:$0x1] }
  0xeb   : > { %v2944_v62 = vpop.permute.xlu0 %2943  ;;  %900 = vst.msk [vmem:[#allocation2 + $0x30] sm:$0xff] %vm893_vm3, %v858_v2  ;;  %v2928_v2 = vsel %vm1086_vm0, %v2926_v60, %v2927_v61  ;;  %v2034_v59 = vsel %vm1086_vm0, %v2032_v53, %v2033_v57  ;;  %v7499_v60 = vld [vmem:[%s7720_s25 + $0xcc] sm:$0xff]  }
  0xec   : > { %2988 = vst.msk [vmem:[#allocation2 + $0x20] sm:$0xff] %vm2983_vm10, %v2944_v62  ;;  %2061 = vrot.lane.b32.xlu1 %v2028_v16, %s7586_s27  ;;  %v7481_v62 = vld [vmem:[%s7720_s25 + $0xbc] ss:$0 sps:$4 sm:$0x11]  }
  0xed   : > { %2059 = vrot.lane.b32.xlu0 %v2025_v9, %s7586_s27  ;;  %v841_v3 = vshll.u32 %v7481_v62, 16  ;;  %v7483_v9 = vld [vmem:[%s7720_s25 + $0xb0] ss:$0 sps:$4 sm:$0x11]  }
  0xee   : > { %v860_v14 = vpop.permute.xlu1 %859 }
  0xef   : > { %v2946_v11 = vpop.permute.xlu0 %2945  ;;  %901 = vst.msk [vmem:[#allocation2 + $0x38] sm:$0xff] %vm893_vm3, %v860_v14  ;;  %v843_v10 = vrot.slane %v841_v3, 1  ;;  %v2630_v3 = vshll.u32 %v7501_v63, 16 }
  0xf0   : > { %2989 = vst.msk [vmem:[#allocation2 + $0x28] sm:$0xff] %vm2983_vm10, %v2946_v11  ;;  %2239 = vrot.lane.b32.xlu1 %v7469_v17, %s7590_s16  ;;  %v1129_v11 = vrot.slane %v7482_v6, 1  ;;  %v7486_v17 = vld [vmem:[%s7720_s25 + $0xb4] sm:$0xff]  }
  0xf1   : > { %2237 = vrot.lane.b32.xlu0 %v7468_v12, %s7590_s16  ;;  %v1130_v12 = vrot.slane %v7483_v9, 1  ;;  %v844_v15 = vsel %vm652_vm1, %v839_v8, %v843_v10  ;;  %v2632_v8 = vrot.slane %v2630_v3, 1 }
  0xf2   : > { %v1150_v25 = vpop.permute.xlu1 %1149 }
  0xf3   : > { %v1148_v22 = vpop.permute.xlu0 %1147  ;;  %v3004_v23 = vld [vmem:[#allocation2 + $0x20] sm:$0xff]  ;;  %1191 = vst.msk [vmem:[#allocation2 + $0x38] sm:$0xff] %vm1183_vm4, %v1150_v25  ;;  %v1131_v18 = vsel %vm1086_vm0, %v1129_v11, %v1130_v12 }
  0xf4   : > { %1190 = vst.msk [vmem:[#allocation2 + $0x30] sm:$0xff] %vm1183_vm4, %v1148_v22  ;;  %7086 = vmatprep.mubr.msk.bf16.mxu0 %vm9220_vm13, %v3004_v23  ;;  %2672 = vrot.lane.b32.xlu1 %v2621_v49, %s7591_s17  ;;  %v1725_v22 = vshll.u32 %v7488_v7, 16  ;;  %v1134_v23 = vsel %vm1086_vm0, %v1132_v19, %v1133_v20  ;;  %v7503_v7 = vld [vmem:[%s7720_s25 + $0xd4] ss:$0 sps:$4 sm:$0x11]  }
  0xf5   : > { %2670 = vrot.lane.b32.xlu0 %v2609_v40, %s7591_s17  ;;  %v7497_v40 = vld [vmem:[%s7720_s25 + $0x6c] sm:$0xff]   ;;  %v2642_v13 = vshll.u32 %v7503_v7, 16 }
  0xf6   : > { %v1328_v41 = vpop.permute.xlu1 %1327  ;;  %v1727_v29 = vrot.slane %v1725_v22, 1  ;;  %469 = vst.msk [vmem:[#allocation2 + $0x48] sm:$0xff] %vm459_vm2, %v7497_v40  ;;  %v4048_v40 = vld [vmem:[#allocation4 + $0x8] sm:$0x1] }
  0xf7   : > { %v1326_v36 = vpop.permute.xlu0 %1325  ;;  %v3005_v37 = vld [vmem:[#allocation2 + $0x28] sm:$0xff]  ;;  %1369 = vst.msk [vmem:[#allocation2 + $0x38] sm:$0xff] %vm1361_vm5, %v1328_v41  ;;  %v2644_v20 = vrot.slane %v2642_v13, 1 }
  0xf8   : > { %1368 = vst.msk [vmem:[#allocation2 + $0x30] sm:$0xff] %vm1361_vm5, %v1326_v36  ;;  %7087 = vmatmul.mubr.msk.bf16.gmra.mrb[8].mxu0 %vm9220_vm13, %v3005_v37  ;;  %873 = vrot.lane.b32.xlu1 %v832_v1, %s7588_s29  ;;  %v1728_v35 = vor.u32 %v1727_v29, %v1723_v21  ;;  %v1732_v36 = vrot.slane %v1730_v31, 1  ;;  %v1739_v37 = vrot.slane %v1737_v34, 1  ;;  %v2623_v1 = vshrl.u32 %v7500_v58, 16 }
  0xf9   : > { %2959 = vrot.lane.b32.xlu0 %v2925_v50, %s7592_s21  ;;  %v2030_v50 = vrot.slane %v7494_v46, 1 }
  0xfa   : > { %v1761_v55 = vpop.permute.xlu1 %1760  ;;  %v1733_v43 = vsel %vm652_vm1, %v1728_v35, %v1732_v36  ;;  %v1740_v44 = vor.u32 %v1739_v37, %v1735_v33  ;;  %v2933_v33 = vrot.slane %v7507_v26, 1  ;;  %v7511_v36 = vld [vmem:[%s7720_s25 + $0x9c] sm:$0xff]  }
  0xfb   : > { %v1759_v52 = vpop.permute.xlu0 %1758  ;;  %1802 = vst.msk [vmem:[#allocation2 + $0x38] sm:$0xff] %vm1794_vm6, %v1761_v55  ;;  %v7498_v55 = vld [vmem:[%s7720_s25 + $0xc0] sm:$0xff]   ;;  %v2031_v56 = vsel %vm1086_vm0, %v2029_v47, %v2030_v50  ;;  %v7594_v47 = vmov 0  }
  0xfc   : > { %1801 = vst.msk [vmem:[#allocation2 + $0x30] sm:$0xff] %vm1794_vm6, %v1759_v52  ;;  %875 = vrot.lane.b32.xlu1 %v844_v15, %s7588_s29  ;;  %v1745_v49 = vsel %vm652_vm1, %v1740_v44, %v1744_v45  ;;  %v7504_v15 = vld [vmem:[%s7720_s25 + $0xc0] sm:$0xfe]  }
  0xfd   : > { %2961 = vrot.lane.b32.xlu0 %v2928_v2, %s7592_s21  ;;  %v2625_v2 = vshll.u32 %v7500_v58, 16  ;;  %v2929_v21 = vrot.slane %v7504_v15, 1  ;;  %473 = vst.msk [vmem:[#allocation2 + $0x68] sm:$0xff] %vm459_vm2, %v7511_v36 }
  0xfe   : > { %v2050_v4 = vpop.permute.xlu1 %2049  ;;  %4036 = vst.msk [vmem:[#allocation4] sm:$0xf] %vm9218_vm14, %v7594_v47  ;;  %4040 = vst.msk [vmem:[#allocation4 + $0x48] sm:$0xf] %vm9218_vm14, %v7594_v47  ;;  %vm4833_vm14 = vcmask 1046532  }
  0xff   : > { %v2048_v0 = vpop.permute.xlu0 %2047  ;;  %2091 = vst.msk [vmem:[#allocation2 + $0x38] sm:$0xff] %vm2083_vm7, %v2050_v4  ;;  %v7502_v4 = vld [vmem:[%s7720_s25 + $0xcc] sm:$0xff]   ;;  %v2627_v6 = vrot.slane %v2625_v2, 1 }
 0x100   : > { %2090 = vst.msk [vmem:[#allocation2 + $0x30] sm:$0xff] %vm2083_vm7, %v2048_v0  ;;  %1165 = vrot.lane.b32.xlu1 %v1134_v23, %s7587_s28  ;;  %v2635_v9 = vshrl.u32 %v7502_v4, 16  ;;  %v2637_v10 = vshll.u32 %v7502_v4, 16  ;;  %v7509_v23 = vld [vmem:[%s7720_s25 + $0x84] sm:$0xff]  }
 0x101   : > { %1163 = vrot.lane.b32.xlu0 %v1131_v18, %s7587_s28  ;;  %v2628_v5 = vor.u32 %v2627_v6, %v2623_v1  ;;  %v7508_v18 = vld [vmem:[%s7720_s25 + $0x78] sm:$0xff]   ;;  %471 = vst.msk [vmem:[#allocation2 + $0x58] sm:$0xff] %vm459_vm2, %v7509_v23 }
 0x102   : > { %v2228_v16 = vpop.permute.xlu1 %2227  ;;  %470 = vst.msk [vmem:[#allocation2 + $0x50] sm:$0xff] %vm459_vm2, %v7508_v18 }
 0x103   : > { %v2226_v14 = vpop.permute.xlu0 %2225  ;;  %2269 = vst.msk [vmem:[#allocation2 + $0x38] sm:$0xff] %vm2261_vm8, %v2228_v16  ;;  %v7505_v16 = vld [vmem:[%s7720_s25 + $0xc8] ss:$0 sps:$4 sm:$0x11]   ;;  %v2633_v19 = vsel %vm652_vm1, %v2628_v5, %v2632_v8 }
 0x104   : > { %2268 = vst.msk [vmem:[#allocation2 + $0x30] sm:$0xff] %vm2261_vm8, %v2226_v14  ;;  %1343 = vrot.lane.b32.xlu1 %v7487_v24, %s7585_s26  ;;  %v2930_v22 = vrot.slane %v7505_v16, 1 }
 0x105   : > { %1341 = vrot.lane.b32.xlu0 %v7486_v17, %s7585_s26  ;;  %v2639_v17 = vrot.slane %v2637_v10, 1  ;;  %4038 = vst.msk [vmem:[#allocation4 + $0x4] sm:$0x1] %vm4037_vm15, %v7594_v47  ;;  %4041 = vst.msk [vmem:[#allocation4 + $0x4c] sm:$0x1] %vm4037_vm15, %v7594_v47  ;;  %s7596_s26 = smov 28  }
 0x106   : > { %v2661_v28 = vpop.permute.xlu1 %2660  ;;  %v2931_v29 = vsel %vm1086_vm0, %v2929_v21, %v2930_v22 }
 0x107   : > { %v2659_v25 = vpop.permute.xlu0 %2658  ;;  %2702 = vst.msk [vmem:[#allocation2 + $0x38] sm:$0xff] %vm2694_vm9, %v2661_v28  ;;  %v2640_v24 = vor.u32 %v2639_v17, %v2635_v9  ;;  %v7510_v28 = vld [vmem:[%s7720_s25 + $0x90] sm:$0xff]  }
 0x108   : > { %2701 = vst.msk [vmem:[#allocation2 + $0x30] sm:$0xff] %vm2694_vm9, %v2659_v25  ;;  %1776 = vrot.lane.b32.xlu1 %v1745_v49, %s7589_s14  ;;  %v7506_v25 = vld [vmem:[%s7720_s25 + $0xcc] sm:$0xfe]  }
 0x109   : > { %1774 = vrot.lane.b32.xlu0 %v1733_v43, %s7589_s14  ;;  %v2645_v31 = vsel %vm652_vm1, %v2640_v24, %v2644_v20  ;;  %v2932_v32 = vrot.slane %v7506_v25, 1  ;;  %472 = vst.msk [vmem:[#allocation2 + $0x60] sm:$0xff] %vm459_vm2, %v7510_v28  ;;  %vm9219_vm1 = vsmask.f32 7938 }
 0x10a   : > { %v862_v41 = vpop.permute.xlu1 %861  ;;  %vm8310_vm12 = vmand %vm4037_vm15, %vm9219_vm1 }
 0x10b   : > { %v2948_v39 = vpop.permute.xlu0 %2947  ;;  %902 = vst.msk [vmem:[#allocation2 + $0x40] sm:$0xff] %vm893_vm3, %v862_v41  ;;  %v2934_v34 = vsel %vm1086_vm0, %v2932_v32, %v2933_v33  ;;  %vm4043_vm0 = vsmask.f32 256  ;;  %v4081_v48 = vsel %vm8310_vm12, 0, %v4080_v42  ;;  %v4083_v33 = vld [vmem:[#allocation4 + $0x14] sm:$0x1] }
 0x10c   : > { %2990 = vst.msk [vmem:[#allocation2 + $0x30] sm:$0xff] %vm2983_vm10, %v2948_v39  ;;  %2065 = vrot.lane.b32.xlu1 %v2034_v59, %s7586_s27  ;;  %v7513_v39 = vld [vmem:[%s7720_s25 + $0xb4] sm:$0xff]   ;;  %vm8301_vm11 = vmand %vm4037_vm15, %vm4043_vm0  ;;  %v4077_v53 = vld [vmem:[#allocation4 + $0x4] sm:$0x1]  ;;  %vm4653_vm15 = vsmask.f32 7440 }
 0x10d   : > { %2063 = vrot.lane.b32.xlu0 %v2031_v56, %s7586_s27  ;;  %475 = vst.msk [vmem:[#allocation2 + $0x78] sm:$0xff] %vm459_vm2, %v7513_v39  ;;  %v4049_v45 = vsel %vm8301_vm11, 0, %v4048_v40  ;;  %4082 = vst [vmem:[#allocation4 + $0xc] sm:$0x1] %v4081_v48  ;;  %v4072_v56 = vld [vmem:[#allocation4 + $0x48] sm:$0x1] }
 0x10e   : > { %v864_v54 = vpop.permute.xlu1 %863  ;;  %4050 = vst [vmem:[#allocation4 + $0x8] sm:$0x1] %v4049_v45  ;;  %v4073_v57 = vsel %vm8301_vm11, 0, %v4072_v56  ;;  %v4104_v58 = vld [vmem:[#allocation4 + $0x4c] sm:$0x1]  ;;  %vm4832_vm0 = vcmask 1042432  }
 0x10f   : > { %v2950_v52 = vpop.permute.xlu0 %2949  ;;  %903 = vst.msk [vmem:[#allocation2 + $0x48] sm:$0xff] %vm893_vm3, %v864_v54  ;;  %4074 = vst [vmem:[#allocation4 + $0x48] sm:$0x1] %v4073_v57  ;;  %vm4652_vm2 = vsmask.f32 3328  ;;  %s7595_s25 = smov 4  }
 0x110   : > { %2991 = vst.msk [vmem:[#allocation2 + $0x38] sm:$0xff] %vm2983_vm10, %v2950_v52  ;;  %2243 = vrot.lane.b32.xlu1 %v7499_v60, %s7590_s16  ;;  %v4045_v52 = vld [vmem:[#allocation4] sm:$0x1]  ;;  %vm8341_vm1 = vmor %vm4652_vm2, %vm4653_vm15  ;;  %v4084_v38 = vsel %vm8310_vm12, 0, %v4083_v33  ;;  %v4051_v40 = vld [vmem:[#allocation4 + $0x10] sm:$0x1] }
 0x111   : > { %2241 = vrot.lane.b32.xlu0 %v7498_v55, %s7590_s16  ;;  %v4046_v54 = vsel %vm8301_vm11, 0, %v4045_v52  ;;  %v4078_v55 = vsel %vm8310_vm12, 0, %v4077_v53  ;;  %4085 = vst [vmem:[#allocation4 + $0x14] sm:$0x1] %v4084_v38  ;;  %s7597_s27 = smov 8   ;;  %s7599_s16 = smov 20  }
 0x112   : > { %v1154_v0 = vpop.permute.xlu1 %1153  ;;  %4047 = vst [vmem:[#allocation4] sm:$0x1] %v4046_v54  ;;  %4079 = vst [vmem:[#allocation4 + $0x4] sm:$0x1] %v4078_v55 }
 0x113   : > { %v1152_v61 = vpop.permute.xlu0 %1151  ;;  %v3006_v62 = vld [vmem:[#allocation2 + $0x30] sm:$0xff]  ;;  %1193 = vst.msk [vmem:[#allocation2 + $0x48] sm:$0xff] %vm1183_vm4, %v1154_v0 }
 0x114   : > { %1192 = vst.msk [vmem:[#allocation2 + $0x40] sm:$0xff] %vm1183_vm4, %v1152_v61  ;;  %7090 = vmatprep.mubr.msk.bf16.mxu0 %vm9220_vm13, %v3006_v62  ;;  %2676 = vrot.lane.b32.xlu1 %v2645_v31, %s7591_s17  ;;  %v4105_v61 = vsel %vm8310_vm12, 0, %v4104_v58 }
 0x115   : > { %2674 = vrot.lane.b32.xlu0 %v2633_v19, %s7591_s17  ;;  %4106 = vst [vmem:[#allocation4 + $0x4c] sm:$0x1] %v4105_v61  ;;  %v4054_v61 = vld [vmem:[#allocation4 + $0x18] sm:$0x1]  ;;  %s7600_s17 = smov 16  }
 0x116   : > { %v1332_v14 = vpop.permute.xlu1 %1331  ;;  %v5215_v7 = vld [vmem:[#allocation4 + $0x48] sm:$0xf] }
 0x117   : > { %v1330_v11 = vpop.permute.xlu0 %1329  ;;  %v3007_v12 = vld [vmem:[#allocation2 + $0x38] sm:$0xff]  ;;  %1371 = vst.msk [vmem:[#allocation2 + $0x48] sm:$0xff] %vm1361_vm5, %v1332_v14  ;;  %v5271_v9 = vld [vmem:[#allocation4 + $0x48] sm:$0xf]  ;;  %v4800_v14 = vld [vmem:[#allocation4] sm:$0xe] }
 0x118   : > { %1370 = vst.msk [vmem:[#allocation2 + $0x40] sm:$0xff] %vm1361_vm5, %v1330_v11  ;;  %7091 = vmatmul.mubr.msk.bf16.gmra.mrb[12].mxu0 %vm9220_vm13, %v3007_v12  ;;  %2965 = vrot.lane.b32.xlu1 %v2934_v34, %s7592_s21  ;;  %v5372_v16 = vshrl.u32 %v5271_v9, 16  ;;  %v5375_v17 = vshll.u32 %v5271_v9, 16 }
 0x119   : > { %2963 = vrot.lane.b32.xlu0 %v2931_v29, %s7592_s21  ;;  %v4636_v1 = vld [vmem:[#allocation4] sm:$0xf]  ;;  %v4637_v2 = vld [vmem:[#allocation4 + $0x4] sm:$0x1] }
 0x11a   : > { %v1765_v30 = vpop.permute.xlu1 %1764  ;;  %v4656_v3 = vshrl.u32 %v4636_v1, 16  ;;  %v4659_v4 = vshll.u32 %v4636_v1, 16  ;;  %v4665_v6 = vshll.u32 %v4637_v2, 16  ;;  %v4801_v15 = vld [vmem:[#allocation4 + $0x4] sm:$0x1]  ;;  %v5374_v22 = vrot.slane %v5372_v16, 4 }
 0x11b   : > { %v1763_v27 = vpop.permute.xlu0 %1762  ;;  %1804 = vst.msk [vmem:[#allocation2 + $0x48] sm:$0xff] %vm1794_vm6, %v1765_v30  ;;  %v5377_v23 = vrot.slane %v5375_v17, 5  ;;  %v4837_v28 = vrot.slane %v4801_v15, 5 }
 0x11c   : > { %1803 = vst.msk [vmem:[#allocation2 + $0x40] sm:$0xff] %vm1794_vm6, %v1763_v27  ;;  %5238 = vrot.lane.b32.xlu1 %v5215_v7, %s7592_s21  ;;  %v5272_v10 = vld [vmem:[#allocation4 + $0x4c] sm:$0x1]  ;;  %v4658_v5 = vrot.slane %v4656_v3, 4  ;;  %v4661_v13 = vrot.slane %v4659_v4, 5  ;;  %v4667_v20 = vrot.slane %v4665_v6, 5 }
 0x11d   : > { %v5381_v18 = vshll.u32 %v5272_v10, 16  ;;  %v6899_v27 = vrot.slane %v4800_v14, 9  ;;  %v5378_v30 = vor.u32 %v5377_v23, %v5374_v22  ;;  %v4057_v22 = vld [vmem:[#allocation4 + $0x20] sm:$0x1]  ;;  %v4089_v23 = vld [vmem:[#allocation4 + $0x24] sm:$0x1] }
 0x11e   : > { %v2054_v37 = vpop.permute.xlu1 %2053  ;;  %v4662_v19 = vor.u32 %v4661_v13, %v4658_v5 }
 0x11f   : > { %v2052_v35 = vpop.permute.xlu0 %2051  ;;  %2093 = vst.msk [vmem:[#allocation2 + $0x48] sm:$0xff] %vm2083_vm7, %v2054_v37  ;;  %v5383_v31 = vrot.slane %v5381_v18, 5  ;;  %v5379_v34 = vrot.slane %v5378_v30, 4  ;;  %v7598_v18 = vmov 1983009808  }
 0x120   : > { %2092 = vst.msk [vmem:[#allocation2 + $0x40] sm:$0xff] %vm2083_vm7, %v2052_v35  ;;  %v4663_v26 = vrot.slane %v4662_v19, 4  ;;  %v3282_v19 = vunpack.c.l.s4 %v7598_v18 }
 0x121   : > { %v5384_v39 = vsel %vm8341_vm1, %v5379_v34, %v5383_v31  ;;  %v6826_v31 = vld [vmem:[%s9210_s2] ss:$0 sm:$0xff] }
 0x122   : > { %v2232_v43 = vpop.permute.xlu1 %2231  ;;  %v4668_v32 = vsel %vm8341_vm1, %v4663_v26, %v4667_v20  ;;  %5399 = vrot.lane.b32.xlu1 %v5384_v39, %s7596_s26  ;;  %v3284_v20 = vlaneseq  ;;  %v4090_v26 = vsel %vm8310_vm12, 0, %v4089_v23 }
 0x123   : > { %v2230_v41 = vpop.permute.xlu0 %2229  ;;  %2271 = vst.msk [vmem:[#allocation2 + $0x48] sm:$0xff] %vm2261_vm8, %v2232_v43  ;;  %4767 = vrot.lane.b32.xlu0 %v4668_v32, %s7595_s25  ;;  %4091 = vst [vmem:[#allocation4 + $0x24] sm:$0x1] %v4090_v26 }
 0x124   : > { %2270 = vst.msk [vmem:[#allocation2 + $0x40] sm:$0xff] %vm2261_vm8, %v2230_v41  ;;  %v4052_v41 = vsel %vm8301_vm11, 0, %v4051_v40  ;;  %v8409_v30 = vshrl.u32 %v3284_v20, 7 }
 0x125   : > { %4053 = vst [vmem:[#allocation4 + $0x10] sm:$0x1] %v4052_v41 }
 0x126   : > { %v2665_v50 = vpop.permute.xlu1 %2664 }
 0x127   : > { %v2663_v49 = vpop.permute.xlu0 %2662  ;;  %2704 = vst.msk [vmem:[#allocation2 + $0x48] sm:$0xff] %vm2694_vm9, %v2665_v50 }
 0x128   : > { %2703 = vst.msk [vmem:[#allocation2 + $0x40] sm:$0xff] %vm2694_vm9, %v2663_v49 }
 0x12a   : > { %v866_v59 = vpop.permute.xlu1 %865 }
 0x12b   : > { %v2952_v51 = vpop.permute.xlu0 %2951  ;;  %904 = vst.msk [vmem:[#allocation2 + $0x50] sm:$0xff] %vm893_vm3, %v866_v59 }
 0x12c   : > { %2992 = vst.msk [vmem:[#allocation2 + $0x40] sm:$0xff] %vm2983_vm10, %v2952_v51 }
 0x12e   : > { %v868_v63 = vpop.permute.xlu1 %867 }
 0x12f   : > { %v2954_v60 = vpop.permute.xlu0 %2953  ;;  %905 = vst.msk [vmem:[#allocation2 + $0x58] sm:$0xff] %vm893_vm3, %v868_v63 }
 0x130   : > { %2993 = vst.msk [vmem:[#allocation2 + $0x48] sm:$0xff] %vm2983_vm10, %v2954_v60 }
 0x132   : > { %v1158_v11 = vpop.permute.xlu1 %1157 }
 0x133   : > { %v3008_v62 = vld [vmem:[#allocation2 + $0x40] sm:$0xff]  ;;  %v1156_v0 = vpop.permute.xlu0 %1155  ;;  %1195 = vst.msk [vmem:[#allocation2 + $0x58] sm:$0xff] %vm1183_vm4, %v1158_v11 }
 0x134   : > { %7094 = vmatprep.mubr.msk.bf16.mxu0 %vm9220_vm13, %v3008_v62  ;;  %1194 = vst.msk [vmem:[#allocation2 + $0x50] sm:$0xff] %vm1183_vm4, %v1156_v0  ;;  %v4086_v62 = vld [vmem:[#allocation4 + $0x1c] sm:$0x1]  ;;  %v4055_v0 = vsel %vm8301_vm11, 0, %v4054_v61 }
 0x135   : > { %v4087_v1 = vsel %vm8310_vm12, 0, %v4086_v62  ;;  %4056 = vst [vmem:[#allocation4 + $0x18] sm:$0x1] %v4055_v0 }
 0x136   : > { %v1336_v24 = vpop.permute.xlu1 %1335  ;;  %4088 = vst [vmem:[#allocation4 + $0x1c] sm:$0x1] %v4087_v1 }
 0x137   : > { %v3009_v8 = vld [vmem:[#allocation2 + $0x48] sm:$0xff]  ;;  %v1334_v12 = vpop.permute.xlu0 %1333  ;;  %1373 = vst.msk [vmem:[#allocation2 + $0x58] sm:$0xff] %vm1361_vm5, %v1336_v24 }
 0x138   : > { %7095 = vmatmul.mubr.msk.bf16.gmra.mrb[16].mxu0 %vm9220_vm13, %v3009_v8  ;;  %1372 = vst.msk [vmem:[#allocation2 + $0x50] sm:$0xff] %vm1361_vm5, %v1334_v12  ;;  %vm8347_vm13 = vmor %vm4832_vm0, %vm4833_vm14  ;;  %vm9236_vm14 = vcmask 220160  }
 0x139   : > { %v4838_v37 = vsel %vm8347_vm13, %v6899_v27, %v4837_v28  ;;  %vm9237_vm2 = vmmov %vm9236_vm14  ;;  %v3283_v28 = vunpack.c.0.s8 %v3282_v19 }
 0x13a   : > { %v1769_v35 = vpop.permute.xlu1 %1768  ;;  %4867 = vrot.lane.b32.xlu0 %v4838_v37, %s7597_s27  ;;  %vm9238_vm15 = vmmov %vm9237_vm2 }
 0x13b   : > { %v1767_v25 = vpop.permute.xlu0 %1766  ;;  %1806 = vst.msk [vmem:[#allocation2 + $0x58] sm:$0xff] %vm1794_vm6, %v1769_v35  ;;  %vm9239_vm0 = vmmov %vm9237_vm2  ;;  %v8417_v34 = vsub.s32 %v3283_v28, %v8409_v30  ;;  %v3878_v35 = vcombine.high %v6826_v31, %v6826_v31 }
 0x13c   : > { %1805 = vst.msk [vmem:[#allocation2 + $0x50] sm:$0xff] %vm1794_vm6, %v1767_v25  ;;  %v4058_v25 = vsel %vm8301_vm11, 0, %v4057_v22 }
 0x13d   : > { %4059 = vst [vmem:[#allocation4 + $0x20] sm:$0x1] %v4058_v25  ;;  %v8425_v40 = vrot.slane %v3878_v35, %v8417_v34 }
 0x13e   : > { %v2058_v42 = vpop.permute.xlu1 %2057 }
 0x13f   : > { %v2056_v36 = vpop.permute.xlu0 %2055  ;;  %2095 = vst.msk [vmem:[#allocation2 + $0x58] sm:$0xff] %vm2083_vm7, %v2058_v42  ;;  %v8448_v61 = vrot.slane %v8425_v40, 1 }
 0x140   : > { %2094 = vst.msk [vmem:[#allocation2 + $0x50] sm:$0xff] %vm2083_vm7, %v2056_v36  ;;  %v8421_v36 = vrot.slane %v6826_v31, %v8417_v34 }
 0x142   : > { %v2236_v45 = vpop.permute.xlu1 %2235 }
 0x143   : > { %v2234_v43 = vpop.permute.xlu0 %2233  ;;  %2273 = vst.msk [vmem:[#allocation2 + $0x58] sm:$0xff] %vm2261_vm8, %v2236_v45  ;;  %v8430_v45 = vcombine.high %v8421_v36, %v8421_v36 }
 0x144   : > { %2272 = vst.msk [vmem:[#allocation2 + $0x50] sm:$0xff] %vm2261_vm8, %v2234_v43 }
 0x146   : > { %v2669_v48 = vpop.permute.xlu1 %2668 }
 0x147   : > { %v2667_v47 = vpop.permute.xlu0 %2666  ;;  %2706 = vst.msk [vmem:[#allocation2 + $0x58] sm:$0xff] %vm2694_vm9, %v2669_v48 }
 0x148   : > { %2705 = vst.msk [vmem:[#allocation2 + $0x50] sm:$0xff] %vm2694_vm9, %v2667_v47 }
 0x14a   : > { %v870_v50 = vpop.permute.xlu1 %869 }
 0x14b   : > { %v2956_v49 = vpop.permute.xlu0 %2955  ;;  %906 = vst.msk [vmem:[#allocation2 + $0x60] sm:$0xff] %vm893_vm3, %v870_v50 }
 0x14c   : > { %2994 = vst.msk [vmem:[#allocation2 + $0x50] sm:$0xff] %vm2983_vm10, %v2956_v49 }
 0x14e   : > { %v872_v52 = vpop.permute.xlu1 %871 }
 0x14f   : > { %v2958_v51 = vpop.permute.xlu0 %2957  ;;  %907 = vst.msk [vmem:[#allocation2 + $0x68] sm:$0xff] %vm893_vm3, %v872_v52  ;;  %v8435_v52 = vcombine.high %v8425_v40, %v8425_v40 }
 0x150   : > { %2995 = vst.msk [vmem:[#allocation2 + $0x58] sm:$0xff] %vm2983_vm10, %v2958_v51 }
 0x152   : > { %v1162_v55 = vpop.permute.xlu1 %1161 }
 0x153   : > { %v1160_v53 = vpop.permute.xlu0 %1159  ;;  %v3010_v54 = vld [vmem:[#allocation2 + $0x50] sm:$0xff]  ;;  %1197 = vst.msk [vmem:[#allocation2 + $0x68] sm:$0xff] %vm1183_vm4, %v1162_v55 }
 0x154   : > { %1196 = vst.msk [vmem:[#allocation2 + $0x60] sm:$0xff] %vm1183_vm4, %v1160_v53  ;;  %7098 = vmatprep.mubr.msk.bf16.mxu0 %vm9236_vm14, %v3010_v54  ;;  %vm9242_vm14 = vsmask.f32 7938 }
 0x156   : > { %v1340_v58 = vpop.permute.xlu1 %1339 }
 0x157   : > { %v1338_v56 = vpop.permute.xlu0 %1337  ;;  %v3011_v57 = vld [vmem:[#allocation2 + $0x58] sm:$0xff]  ;;  %1375 = vst.msk [vmem:[#allocation2 + $0x68] sm:$0xff] %vm1361_vm5, %v1340_v58  ;;  %v8441_v58 = vrot.slane %v8421_v36, 1 }
 0x158   : > { %1374 = vst.msk [vmem:[#allocation2 + $0x60] sm:$0xff] %vm1361_vm5, %v1338_v56  ;;  %7099 = vmatmul.mubr.msk.bf16.gmra.mrb[20].mxu0 %vm9237_vm2, %v3011_v57  ;;  %vm9243_vm2 = vcmask 27648  }
 0x15a   : > { %v1773_v60 = vpop.permute.xlu1 %1772 }
 0x15b   : > { %v1771_v59 = vpop.permute.xlu0 %1770  ;;  %1808 = vst.msk [vmem:[#allocation2 + $0x68] sm:$0xff] %vm1794_vm6, %v1773_v60 }
 0x15c   : > { %1807 = vst.msk [vmem:[#allocation2 + $0x60] sm:$0xff] %vm1794_vm6, %v1771_v59  ;;  %v8444_v59 = vrot.slane %v8430_v45, 1 }
 0x15e   : > { %v2062_v2 = vpop.permute.xlu1 %2061 }
 0x15f   : > { %v2060_v63 = vpop.permute.xlu0 %2059  ;;  %2097 = vst.msk [vmem:[#allocation2 + $0x68] sm:$0xff] %vm2083_vm7, %v2062_v2 }
 0x160   : > { %2096 = vst.msk [vmem:[#allocation2 + $0x60] sm:$0xff] %vm2083_vm7, %v2060_v63 }
 0x162   : > { %v2240_v4 = vpop.permute.xlu1 %2239 }
 0x163   : > { %v2238_v3 = vpop.permute.xlu0 %2237  ;;  %2275 = vst.msk [vmem:[#allocation2 + $0x68] sm:$0xff] %vm2261_vm8, %v2240_v4 }
 0x164   : > { %2274 = vst.msk [vmem:[#allocation2 + $0x60] sm:$0xff] %vm2261_vm8, %v2238_v3 }
 0x166   : > { %v2673_v7 = vpop.permute.xlu1 %2672 }
 0x167   : > { %v2671_v6 = vpop.permute.xlu0 %2670  ;;  %2708 = vst.msk [vmem:[#allocation2 + $0x68] sm:$0xff] %vm2694_vm9, %v2673_v7  ;;  %v8452_v7 = vrot.slane %v8435_v52, 1 }
 0x168   : > { %2707 = vst.msk [vmem:[#allocation2 + $0x60] sm:$0xff] %vm2694_vm9, %v2671_v6 }
 0x16a   : > { %v874_v9 = vpop.permute.xlu1 %873 }
 0x16b   : > { %v2960_v8 = vpop.permute.xlu0 %2959  ;;  %908 = vst.msk [vmem:[#allocation2 + $0x70] sm:$0xff] %vm893_vm3, %v874_v9 }
 0x16c   : > { %2996 = vst.msk [vmem:[#allocation2 + $0x60] sm:$0xff] %vm2983_vm10, %v2960_v8 }
 0x16e   : > { %v876_v11 = vpop.permute.xlu1 %875 }
 0x16f   : > { %v2962_v10 = vpop.permute.xlu0 %2961  ;;  %909 = vst.msk [vmem:[#allocation2 + $0x78] sm:$0xff] %vm893_vm3, %v876_v11  ;;  %vm4429_vm3 = vcmask 1042434  }
 0x170   : > { %2997 = vst.msk [vmem:[#allocation2 + $0x68] sm:$0xff] %vm2983_vm10, %v2962_v10 }
 0x172   : > { %v1166_v13 = vpop.permute.xlu1 %1165 }
 0x173   : > { %v3012_v12 = vld [vmem:[#allocation2 + $0x60] sm:$0xff]  ;;  %v1164_v5 = vpop.permute.xlu0 %1163  ;;  %1199 = vst.msk [vmem:[#allocation2 + $0x78] sm:$0xff] %vm1183_vm4, %v1166_v13 }
 0x174   : > { %7102 = vmatprep.mubr.msk.bf16.mxu0 %vm9238_vm15, %v3012_v12  ;;  %1198 = vst.msk [vmem:[#allocation2 + $0x70] sm:$0xff] %vm1183_vm4, %v1164_v5  ;;  %vm9240_vm4 = vmmov %vm9239_vm0 }
 0x175   : > { %vm8479_vm15 = vmand %vm9243_vm2, %vm9242_vm14 }
 0x176   : > { %v1344_v16 = vpop.permute.xlu1 %1343 }
 0x177   : > { %v3013_v14 = vld [vmem:[#allocation2 + $0x68] sm:$0xff]  ;;  %v1342_v15 = vpop.permute.xlu0 %1341  ;;  %1377 = vst.msk [vmem:[#allocation2 + $0x78] sm:$0xff] %vm1361_vm5, %v1344_v16 }
 0x178   : > { %7103 = vmatmul.mubr.msk.bf16.gmra.mrb[24].mxu0 %vm9239_vm0, %v3013_v14  ;;  %1376 = vst.msk [vmem:[#allocation2 + $0x70] sm:$0xff] %vm1361_vm5, %v1342_v15  ;;  %vm4432_vm5 = vcmask 1043459  }
 0x17a   : > { %v1777_v24 = vpop.permute.xlu1 %1776 }
 0x17b   : > { %v1775_v17 = vpop.permute.xlu0 %1774  ;;  %1810 = vst.msk [vmem:[#allocation2 + $0x78] sm:$0xff] %vm1794_vm6, %v1777_v24 }
 0x17c   : > { %1809 = vst.msk [vmem:[#allocation2 + $0x70] sm:$0xff] %vm1794_vm6, %v1775_v17  ;;  %vm9241_vm6 = vmmov %vm9239_vm0 }
 0x17d   : > { %vm9246_vm0 = vmmov %vm9243_vm2 }
 0x17e   : > { %v2066_v32 = vpop.permute.xlu1 %2065  ;;  %vm9247_vm14 = vmmov %vm9246_vm0 }
 0x17f   : > { %v2064_v27 = vpop.permute.xlu0 %2063  ;;  %2099 = vst.msk [vmem:[#allocation2 + $0x78] sm:$0xff] %vm2083_vm7, %v2066_v32  ;;  %vm9248_vm2 = vmmov %vm9246_vm0 }
 0x180   : > { %2098 = vst.msk [vmem:[#allocation2 + $0x70] sm:$0xff] %vm2083_vm7, %v2064_v27  ;;  %vm4435_vm7 = vcmask 1044484  }
 0x182   : > { %v2244_v37 = vpop.permute.xlu1 %2243 }
 0x183   : > { %v2242_v33 = vpop.permute.xlu0 %2241  ;;  %2277 = vst.msk [vmem:[#allocation2 + $0x78] sm:$0xff] %vm2261_vm8, %v2244_v37 }
 0x184   : > { %2276 = vst.msk [vmem:[#allocation2 + $0x70] sm:$0xff] %vm2261_vm8, %v2242_v33  ;;  %vm4438_vm8 = vcmask 1045509  }
 0x186   : > { %v2677_v51 = vpop.permute.xlu1 %2676 }
 0x187   : > { %v2675_v41 = vpop.permute.xlu0 %2674  ;;  %2710 = vst.msk [vmem:[#allocation2 + $0x78] sm:$0xff] %vm2694_vm9, %v2677_v51 }
 0x188   : > { %2709 = vst.msk [vmem:[#allocation2 + $0x70] sm:$0xff] %vm2694_vm9, %v2675_v41  ;;  %vm9223_vm9 = vcmask 1046534  }
 0x18a   : > { %v2966_v2 = vpop.permute.xlu1 %2965 }
 0x18b   : > { %v7080_v38 = vpop.f32.mrb[0].mxu0  ;;  %v2964_v53 = vpop.permute.xlu0 %2963  ;;  %2999 = vst.msk [vmem:[#allocation2 + $0x78] sm:$0xff] %vm2983_vm10, %v2966_v2 }
 0x18c   : > { %v3121_v39 = vpop.f32.mrb[1].mxu0  ;;  %2998 = vst.msk [vmem:[#allocation2 + $0x70] sm:$0xff] %vm2983_vm10, %v2964_v53  ;;  %vm4444_vm10 = vcmask 1047559  }
 0x18d   : > { %v3248_v42 = vmax.f32 %v3121_v39, %v7080_v38  ;;  %v7081_v43 = vpop.f32.mrb[2].mxu0 }
 0x18e   : > { %v3124_v47 = vpop.f32.mrb[3].mxu0 }
 0x18f   : > { %v3280_v48 = vcombine.high %v3248_v42, %v3248_v42  ;;  %v3287_v49 = vrot.slane %v3248_v42, %v8417_v34  ;;  %v3249_v50 = vmax.f32 %v3124_v47, %v7081_v43 }
 0x191   : > { %v3294_v54 = vrot.slane %v3280_v48, %v8417_v34  ;;  %v3295_v55 = vcombine.high %v3287_v49, %v3287_v49  ;;  %v6762_v56 = vrot.slane %v3287_v49, 9  ;;  %v3297_v57 = vcombine.high %v3249_v50, %v3249_v50 }
 0x192   : > { %v3304_v60 = vrot.slane %v3249_v50, %v8417_v34 }
 0x193   : > { %v3296_v62 = vcombine.high %v3294_v54, %v3294_v54  ;;  %v6763_v63 = vrot.slane %v3295_v55, 9  ;;  %v6764_v0 = vrot.slane %v3294_v54, 9  ;;  %v3808_v1 = vmax.f32 %v3287_v49, %v6762_v56  ;;  %v3014_v28 = vld [vmem:[#allocation2 + $0x70] sm:$0xff]  ;;  %v3015_v49 = vld [vmem:[#allocation2 + $0x78] sm:$0xff] }
 0x194   : > { %v3311_v3 = vrot.slane %v3297_v57, %v8417_v34  ;;  %v3312_v4 = vcombine.high %v3304_v60, %v3304_v60  ;;  %v6766_v6 = vrot.slane %v3304_v60, 9  ;;  %7106 = vmatprep.mubr.msk.bf16.mxu0 %vm9240_vm4, %v3014_v28  ;;  %vm9224_vm4 = vcmask 60448  }
 0x195   : > { %v6765_v8 = vrot.slane %v3296_v62, 9  ;;  %v3809_v9 = vmax.f32 %v3295_v55, %v6763_v63  ;;  %v3810_v10 = vmax.f32 %v3294_v54, %v6764_v0  ;;  %v3907_v11 = vadd.f32 %v8421_v36, %v3808_v1  ;;  %7107 = vmatmul.mubr.msk.bf16.gmra.mrb[28].mxu0 %vm9241_vm6, %v3015_v49  ;;  %v4575_v1 = vld [vmem:[#allocation4 + $0xc] sm:$0x1] }
 0x196   : > { %v3313_v12 = vcombine.high %v3311_v3, %v3311_v3  ;;  %v6767_v5 = vrot.slane %v3312_v4, 9  ;;  %v6768_v13 = vrot.slane %v3311_v3, 9  ;;  %v3812_v14 = vmax.f32 %v3304_v60, %v6766_v6 }
 0x197   : > { %v3811_v15 = vmax.f32 %v3296_v62, %v6765_v8  ;;  %v3908_v16 = vadd.f32 %v8441_v58, %v3809_v9  ;;  %v3909_v17 = vadd.f32 %v8430_v45, %v3810_v10  ;;  %v3971_v18 = vmax.f32 %v3907_v11, 0.0 }
 0x198   : > { %v6769_v19 = vrot.slane %v3313_v12, 9  ;;  %v3813_v20 = vmax.f32 %v3312_v4, %v6767_v5  ;;  %v3814_v22 = vmax.f32 %v3311_v3, %v6768_v13  ;;  %v3911_v23 = vadd.f32 %v8425_v40, %v3812_v14  ;;  %v4092_v5 = vld [vmem:[#allocation4 + $0x2c] sm:$0x1] }
 0x199   : > { %v3910_v24 = vadd.f32 %v8444_v59, %v3811_v15  ;;  %v3972_v25 = vmax.f32 %v3908_v16, 0.0  ;;  %v3973_v26 = vmax.f32 %v3909_v17, 0.0  ;;  %v6955_v27 = vpack.c.bf16 %v3971_v18, %v3971_v18 }
 0x19a   : > { %v3815_v31 = vmax.f32 %v3313_v12, %v6769_v19  ;;  %v3912_v32 = vadd.f32 %v8448_v61, %v3813_v20  ;;  %v3913_v33 = vadd.f32 %v8435_v52, %v3814_v22  ;;  %v3975_v35 = vmax.f32 %v3911_v23, 0.0  ;;  %v4060_v12 = vld [vmem:[#allocation4 + $0x28] sm:$0x1] }
 0x19b   : > { %v3974_v37 = vmax.f32 %v3910_v24, 0.0  ;;  %v6956_v38 = vpack.c.bf16 %v3972_v25, %v3972_v25  ;;  %v6957_v39 = vpack.c.bf16 %v3973_v26, %v3973_v26  ;;  %v4363_v41 = vunpack.c.l.b16 %v6955_v27  ;;  %v4572_v23 = vld [vmem:[#allocation4 + $0x8] sm:$0xf] }
 0x19c   : > { %v3914_v42 = vadd.f32 %v8452_v7, %v3815_v31  ;;  %v3976_v43 = vmax.f32 %v3912_v32, 0.0  ;;  %v3977_v47 = vmax.f32 %v3913_v33, 0.0  ;;  %v6959_v48 = vpack.c.bf16 %v3975_v35, %v3975_v35  ;;  %v4620_v33 = vld [vmem:[#allocation4] sm:$0xf] }
 0x19d   : > { %v6958_v50 = vpack.c.bf16 %v3974_v37, %v3974_v37  ;;  %v4364_v51 = vunpack.c.l.b16 %v6956_v38  ;;  %v4365_v53 = vunpack.c.l.b16 %v6957_v39  ;;  %v4427_v62 = vrot.slane %v4363_v41, 7  ;;  %4628 = vst.msk [vmem:[#allocation3] sm:$0xf] %vm9246_vm0, %v4620_v33 }
 0x19e   : > { %v3978_v54 = vmax.f32 %v3914_v42, 0.0  ;;  %v6960_v55 = vpack.c.bf16 %v3976_v43, %v3976_v43  ;;  %v6961_v56 = vpack.c.bf16 %v3977_v47, %v3977_v47  ;;  %v4367_v57 = vunpack.c.l.b16 %v6959_v48 }
 0x19f   : > { %v4366_v60 = vunpack.c.l.b16 %v6958_v50  ;;  %v4428_v63 = vrot.slane %v4364_v51, 6  ;;  %v4431_v0 = vrot.slane %v4365_v53, 5  ;;  %v4061_v15 = vsel %vm8301_vm11, 0, %v4060_v12  ;;  %v4768_v53 = vpop.permute.xlu0 %4767 }
 0x1a0   : > { %v4368_v2 = vunpack.c.l.b16 %v6960_v55  ;;  %v4369_v3 = vunpack.c.l.b16 %v6961_v56  ;;  %v7019_v4 = vpack.c.bf16 %v3978_v54, %v3978_v54  ;;  %v4437_v10 = vrot.slane %v4367_v57, 3  ;;  %4062 = vst [vmem:[#allocation4 + $0x28] sm:$0x1] %v4061_v15  ;;  %4792 = vst.msk [vmem:[#allocation3] sm:$0xf] %vm9224_vm4, %v4768_v53 }
 0x1a1   : > { %v4430_v6 = vsel %vm4429_vm3, %v4428_v63, %v4427_v62  ;;  %v4434_v8 = vrot.slane %v4366_v60, 4  ;;  %v4093_v16 = vsel %vm8310_vm12, 0, %v4092_v5  ;;  %vm4891_vm6 = vcmask 93248  }
 0x1a2   : > { %v4433_v9 = vsel %vm4432_vm5, %v4431_v0, %v4430_v6  ;;  %v4576_v11 = vsel %vm8301_vm11, %v7019_v4, %v4575_v1  ;;  %v4440_v14 = vrot.slane %v4368_v2, 2  ;;  %v4443_v18 = vrot.slane %v4369_v3, 1  ;;  %4094 = vst [vmem:[#allocation4 + $0x2c] sm:$0x1] %v4093_v16 }
 0x1a3   : > { %v4436_v13 = vsel %vm4435_vm7, %v4434_v8, %v4433_v9  ;;  %4577 = vst [vmem:[#allocation4 + $0xc] sm:$0x1] %v4576_v11 }
 0x1a4   : > { %v4439_v17 = vsel %vm4438_vm8, %v4437_v10, %v4436_v13 }
 0x1a5   : > { %v4442_v19 = vsel %vm9223_vm9, %v4440_v14, %v4439_v17 }
 0x1a6   : > { %v4445_v20 = vsel %vm4444_vm10, %v4443_v18, %v4442_v19 }
 0x1a7   : > { %v4537_v24 = vpack.c.b16 %v4445_v20, %v4445_v20 }
 0x1a9   : > { %v4573_v25 = vsel %vm8479_vm15, %v4537_v24, %v4572_v23 }
 0x1aa   : > { %4574 = vst [vmem:[#allocation4 + $0x8] sm:$0xf] %v4573_v25  ;;  %v4803_v32 = vld [vmem:[#allocation4 + $0xc] sm:$0x1] }
 0x1ab   : > { %v7084_v26 = vpop.f32.mrb[4].mxu0  ;;  %v8487_v41 = vld [vmem:[#allocation4 + $0xc] sm:$0x1]  ;;  %v4841_v42 = vrot.slane %v4803_v32, 5 }
 0x1ac   : > { %v3137_v27 = vpop.f32.mrb[5].mxu0  ;;  %v5144_v56 = vrot.slane %v8487_v41, 5  ;;  %v4868_v11 = vpop.permute.xlu0 %4867 }
 0x1ad   : > { %v3250_v28 = vmax.f32 %v3137_v27, %v7084_v26  ;;  %v7085_v31 = vpop.f32.mrb[6].mxu0  ;;  %4892 = vst.msk [vmem:[#allocation3] sm:$0xf] %vm4891_vm6, %v4868_v11 }
 0x1ae   : > { %v3140_v35 = vpop.f32.mrb[7].mxu0 }
 0x1af   : > { %v3314_v37 = vcombine.high %v3250_v28, %v3250_v28  ;;  %v3321_v38 = vrot.slane %v3250_v28, %v8417_v34  ;;  %v3251_v39 = vmax.f32 %v3140_v35, %v7085_v31 }
 0x1b1   : > { %v3328_v43 = vrot.slane %v3314_v37, %v8417_v34  ;;  %v3329_v47 = vcombine.high %v3321_v38, %v3321_v38  ;;  %v6770_v48 = vrot.slane %v3321_v38, 9  ;;  %v3331_v49 = vcombine.high %v3251_v39, %v3251_v39  ;;  %v4900_v50 = vld [vmem:[#allocation4 + $0x8] sm:$0xf] }
 0x1b2   : > { %v4802_v51 = vld [vmem:[#allocation4 + $0x8] sm:$0xe]  ;;  %v3338_v54 = vrot.slane %v3251_v39, %v8417_v34  ;;  %4916 = vrot.lane.b32.xlu0 %v4900_v50, %s7589_s14 }
 0x1b3   : > { %v6900_v55 = vrot.slane %v4802_v51, 9  ;;  %v3330_v57 = vcombine.high %v3328_v43, %v3328_v43  ;;  %v6771_v60 = vrot.slane %v3329_v47, 9  ;;  %v6772_v62 = vrot.slane %v3328_v43, 9  ;;  %v4621_v0 = vld [vmem:[#allocation4 + $0x8] sm:$0xf] }
 0x1b4   : > { %v3816_v63 = vmax.f32 %v3321_v38, %v6770_v48  ;;  %v3345_v1 = vrot.slane %v3331_v49, %v8417_v34  ;;  %v3346_v2 = vcombine.high %v3338_v54, %v3338_v54  ;;  %v6774_v3 = vrot.slane %v3338_v54, 9  ;;  %4629 = vst.msk [vmem:[#allocation3 + $0x4] sm:$0xf] %vm9247_vm14, %v4621_v0  ;;  %v5110_v50 = vld [vmem:[#allocation4 + $0x8] sm:$0xe] }
 0x1b5   : > { %v4842_v4 = vsel %vm8347_vm13, %v6900_v55, %v4841_v42  ;;  %v6773_v6 = vrot.slane %v3330_v57, 9  ;;  %v3817_v8 = vmax.f32 %v3329_v47, %v6771_v60  ;;  %v3818_v9 = vmax.f32 %v3328_v43, %v6772_v62  ;;  %v4949_v0 = vld [vmem:[#allocation4 + $0x8] sm:$0xf] }
 0x1b6   : > { %v3915_v10 = vadd.f32 %v8421_v36, %v3816_v63  ;;  %4869 = vrot.lane.b32.xlu1 %v4842_v4, %s7597_s27  ;;  %v3347_v12 = vcombine.high %v3345_v1, %v3345_v1  ;;  %v6775_v5 = vrot.slane %v3346_v2, 9  ;;  %v6776_v13 = vrot.slane %v3345_v1, 9  ;;  %v4581_v4 = vld [vmem:[#allocation4 + $0x14] sm:$0x1]  ;;  %v4638_v11 = vld [vmem:[#allocation4 + $0x8] sm:$0xf] }
 0x1b7   : > { %v3820_v14 = vmax.f32 %v3338_v54, %v6774_v3  ;;  %v3819_v15 = vmax.f32 %v3330_v57, %v6773_v6  ;;  %v3916_v16 = vadd.f32 %v8441_v58, %v3817_v8  ;;  %v3917_v17 = vadd.f32 %v8430_v45, %v3818_v9 }
 0x1b8   : > { %v3979_v18 = vmax.f32 %v3915_v10, 0.0  ;;  %v6777_v19 = vrot.slane %v3347_v12, 9  ;;  %v3821_v20 = vmax.f32 %v3346_v2, %v6775_v5  ;;  %v3822_v23 = vmax.f32 %v3345_v1, %v6776_v13 }
 0x1b9   : > { %v3919_v24 = vadd.f32 %v8425_v40, %v3820_v14  ;;  %v3918_v25 = vadd.f32 %v8444_v59, %v3819_v15  ;;  %v3980_v26 = vmax.f32 %v3916_v16, 0.0  ;;  %v3981_v27 = vmax.f32 %v3917_v17, 0.0 }
 0x1ba   : > { %v6963_v28 = vpack.c.bf16 %v3979_v18, %v3979_v18  ;;  %v3823_v31 = vmax.f32 %v3347_v12, %v6777_v19  ;;  %v3920_v32 = vadd.f32 %v8448_v61, %v3821_v20  ;;  %v3921_v33 = vadd.f32 %v8435_v52, %v3822_v23 }
 0x1bb   : > { %v3983_v35 = vmax.f32 %v3919_v24, 0.0  ;;  %v3982_v37 = vmax.f32 %v3918_v25, 0.0  ;;  %v6964_v38 = vpack.c.bf16 %v3980_v26, %v3980_v26  ;;  %v6965_v39 = vpack.c.bf16 %v3981_v27, %v3981_v27 }
 0x1bc   : > { %v4371_v42 = vunpack.c.l.b16 %v6963_v28  ;;  %v3922_v43 = vadd.f32 %v8452_v7, %v3823_v31  ;;  %v3984_v47 = vmax.f32 %v3920_v32, 0.0  ;;  %v3985_v48 = vmax.f32 %v3921_v33, 0.0  ;;  %v4063_v31 = vld [vmem:[#allocation4 + $0x30] sm:$0x1]  ;;  %v4095_v32 = vld [vmem:[#allocation4 + $0x34] sm:$0x1] }
 0x1bd   : > { %v6967_v49 = vpack.c.bf16 %v3983_v35, %v3983_v35  ;;  %v6966_v51 = vpack.c.bf16 %v3982_v37, %v3982_v37  ;;  %v4372_v53 = vunpack.c.l.b16 %v6964_v38  ;;  %v4373_v54 = vunpack.c.l.b16 %v6965_v39  ;;  %v4578_v35 = vld [vmem:[#allocation4 + $0x10] sm:$0xf] }
 0x1be   : > { %v4446_v55 = vrot.slane %v4371_v42, 7  ;;  %v3986_v57 = vmax.f32 %v3922_v43, 0.0  ;;  %v6968_v60 = vpack.c.bf16 %v3984_v47, %v3984_v47  ;;  %v6969_v62 = vpack.c.bf16 %v3985_v48, %v3985_v48  ;;  %v4950_v43 = vld [vmem:[#allocation4 + $0xc] sm:$0x1] }
 0x1bf   : > { %v4375_v63 = vunpack.c.l.b16 %v6967_v49  ;;  %v4374_v1 = vunpack.c.l.b16 %v6966_v51  ;;  %v4447_v2 = vrot.slane %v4372_v53, 6  ;;  %v4449_v3 = vrot.slane %v4373_v54, 5  ;;  %v4639_v49 = vld [vmem:[#allocation4 + $0xc] sm:$0x1] }
 0x1c0   : > { %v6907_v6 = vrot.slane %v5110_v50, 9  ;;  %v4376_v8 = vunpack.c.l.b16 %v6968_v60  ;;  %v4377_v9 = vunpack.c.l.b16 %v6969_v62  ;;  %v7020_v10 = vpack.c.bf16 %v3986_v57, %v3986_v57 }
 0x1c1   : > { %v4448_v12 = vsel %vm4429_vm3, %v4447_v2, %v4446_v55  ;;  %v4451_v5 = vrot.slane %v4374_v1, 4  ;;  %v4966_v14 = vshrl.u32 %v4949_v0, 16  ;;  %v4453_v16 = vrot.slane %v4375_v63, 3 }
 0x1c2   : > { %v5145_v13 = vsel %vm8347_vm13, %v6907_v6, %v5144_v56  ;;  %v4450_v15 = vsel %vm4432_vm5, %v4449_v3, %v4448_v12  ;;  %v4582_v17 = vsel %vm8301_vm11, %v7020_v10, %v4581_v4  ;;  %v4455_v19 = vrot.slane %v4376_v8, 2 }
 0x1c3   : > { %5174 = vrot.lane.b32.xlu0 %v5145_v13, %s7599_s16  ;;  %v4452_v18 = vsel %vm4435_vm7, %v4451_v5, %v4450_v15  ;;  %4583 = vst [vmem:[#allocation4 + $0x14] sm:$0x1] %v4582_v17  ;;  %v4969_v20 = vshll.u32 %v4949_v0, 16  ;;  %v4670_v23 = vshrl.u32 %v4638_v11, 16  ;;  %v4457_v24 = vrot.slane %v4377_v9, 1 }
 0x1c4   : > { %v4454_v41 = vsel %vm4438_vm8, %v4453_v16, %v4452_v18  ;;  %v4968_v56 = vrot.slane %v4966_v14, 4  ;;  %v4673_v25 = vshll.u32 %v4638_v11, 16  ;;  %v4064_v38 = vsel %vm8301_vm11, 0, %v4063_v31 }
 0x1c5   : > { %v4456_v26 = vsel %vm9223_vm9, %v4455_v19, %v4454_v41  ;;  %v4971_v27 = vrot.slane %v4969_v20, 5  ;;  %v4672_v28 = vrot.slane %v4670_v23, 4  ;;  %v4096_v39 = vsel %vm8310_vm12, 0, %v4095_v32  ;;  %4065 = vst [vmem:[#allocation4 + $0x30] sm:$0x1] %v4064_v38 }
 0x1c6   : > { %v4458_v33 = vsel %vm4444_vm10, %v4457_v24, %v4456_v26  ;;  %v4675_v37 = vrot.slane %v4673_v25, 5  ;;  %4097 = vst [vmem:[#allocation4 + $0x34] sm:$0x1] %v4096_v39  ;;  %v4975_v50 = vshll.u32 %v4950_v43, 16  ;;  %v4679_v57 = vshll.u32 %v4639_v49, 16 }
 0x1c7   : > { %v4539_v42 = vpack.c.b16 %v4458_v33, %v4458_v33  ;;  %v4972_v47 = vor.u32 %v4971_v27, %v4968_v56  ;;  %vm9222_vm14 = vcmask 126048  }
 0x1c8   : > { %v4676_v51 = vor.u32 %v4675_v37, %v4672_v28  ;;  %v4977_v1 = vrot.slane %v4975_v50, 5  ;;  %v4681_v11 = vrot.slane %v4679_v57, 5 }
 0x1c9   : > { %v4579_v48 = vsel %vm8479_vm15, %v4539_v42, %v4578_v35  ;;  %v4973_v55 = vrot.slane %v4972_v47, 4 }
 0x1ca   : > { %4580 = vst [vmem:[#allocation4 + $0x10] sm:$0xf] %v4579_v48  ;;  %v8527_v63 = vld [vmem:[#allocation4 + $0x14] sm:$0x1]  ;;  %v4677_v2 = vrot.slane %v4676_v51, 4 }
 0x1cb   : > { %v7088_v53 = vpop.f32.mrb[8].mxu0  ;;  %v8530_v8 = vld [vmem:[#allocation4 + $0x14] sm:$0x1]  ;;  %v4978_v10 = vsel %vm8341_vm1, %v4973_v55, %v4977_v1  ;;  %v5148_v12 = vrot.slane %v8527_v63, 5 }
 0x1cc   : > { %v3153_v54 = vpop.f32.mrb[9].mxu0  ;;  %v8532_v9 = vld [vmem:[#allocation4 + $0x14] sm:$0x1]  ;;  %v4682_v19 = vsel %vm8341_vm1, %v4677_v2, %v4681_v11  ;;  %v4845_v23 = vrot.slane %v8530_v8, 5 }
 0x1cd   : > { %v3252_v60 = vmax.f32 %v3153_v54, %v7088_v53  ;;  %v7089_v62 = vpop.f32.mrb[10].mxu0  ;;  %v5452_v41 = vrot.slane %v8532_v9, 5  ;;  %v4952_v8 = vld [vmem:[#allocation4 + $0x14] sm:$0x1] }
 0x1ce   : > { %v3156_v0 = vpop.f32.mrb[11].mxu0 }
 0x1cf   : > { %v3348_v3 = vcombine.high %v3252_v60, %v3252_v60  ;;  %v3355_v4 = vrot.slane %v3252_v60, %v8417_v34  ;;  %v3253_v6 = vmax.f32 %v3156_v0, %v7089_v62 }
 0x1d1   : > { %v3362_v5 = vrot.slane %v3348_v3, %v8417_v34  ;;  %v3363_v13 = vcombine.high %v3355_v4, %v3355_v4  ;;  %v6778_v14 = vrot.slane %v3355_v4, 9  ;;  %v3365_v15 = vcombine.high %v3253_v6, %v3253_v6  ;;  %v5208_v16 = vld [vmem:[#allocation4 + $0x10] sm:$0xf] }
 0x1d2   : > { %v4901_v17 = vld [vmem:[#allocation4 + $0x10] sm:$0xf]  ;;  %v3372_v18 = vrot.slane %v3253_v6, %v8417_v34  ;;  %5224 = vrot.lane.b32.xlu0 %v5208_v16, %s7592_s21 }
 0x1d3   : > { %4918 = vrot.lane.b32.xlu1 %v4901_v17, %s7589_s14  ;;  %v8543_v20 = vld [vmem:[#allocation4 + $0x10] sm:$0xe]  ;;  %v3364_v24 = vcombine.high %v3362_v5, %v3362_v5  ;;  %v6779_v56 = vrot.slane %v3363_v13, 9  ;;  %v6780_v25 = vrot.slane %v3362_v5, 9  ;;  %v3824_v26 = vmax.f32 %v3355_v4, %v6778_v14 }
 0x1d4   : > { %v3379_v27 = vrot.slane %v3365_v15, %v8417_v34  ;;  %v3380_v28 = vcombine.high %v3372_v18, %v3372_v18  ;;  %v6782_v31 = vrot.slane %v3372_v18, 9  ;;  %v6908_v32 = vrot.slane %v8543_v20, 9  ;;  %v4622_v33 = vld [vmem:[#allocation4 + $0x10] sm:$0xf] }
 0x1d5   : > { %v6781_v35 = vrot.slane %v3364_v24, 9  ;;  %v3825_v37 = vmax.f32 %v3363_v13, %v6779_v56  ;;  %v3826_v38 = vmax.f32 %v3362_v5, %v6780_v25  ;;  %v3923_v39 = vadd.f32 %v8421_v36, %v3824_v26  ;;  %4630 = vst.msk [vmem:[#allocation3 + $0x8] sm:$0xf] %vm9248_vm2, %v4622_v33  ;;  %v5418_v33 = vld [vmem:[#allocation4 + $0x10] sm:$0xe]  ;;  %vm9250_vm2 = vmmov %vm9246_vm0 }
 0x1d6   : > { %v3381_v42 = vcombine.high %v3379_v27, %v3379_v27  ;;  %v6783_v43 = vrot.slane %v3380_v28, 9  ;;  %v6784_v47 = vrot.slane %v3379_v27, 9  ;;  %v3828_v48 = vmax.f32 %v3372_v18, %v6782_v31  ;;  %5077 = vrot.lane.b32.xlu0 %v4978_v10, %s7600_s17  ;;  %v4804_v31 = vld [vmem:[#allocation4 + $0x10] sm:$0xe] }
 0x1d7   : > { %4769 = vrot.lane.b32.xlu1 %v4682_v19, %s7595_s25  ;;  %v3827_v49 = vmax.f32 %v3364_v24, %v6781_v35  ;;  %v3924_v50 = vadd.f32 %v8441_v58, %v3825_v37  ;;  %v3925_v51 = vadd.f32 %v8430_v45, %v3826_v38  ;;  %v3987_v53 = vmax.f32 %v3923_v39, 0.0  ;;  %v4587_v39 = vld [vmem:[#allocation4 + $0x1c] sm:$0x1] }
 0x1d8   : > { %v6785_v54 = vrot.slane %v3381_v42, 9  ;;  %v3829_v55 = vmax.f32 %v3380_v28, %v6783_v43  ;;  %v3830_v57 = vmax.f32 %v3379_v27, %v6784_v47  ;;  %v3927_v60 = vadd.f32 %v8425_v40, %v3828_v48 }
 0x1d9   : > { %v3926_v62 = vadd.f32 %v8444_v59, %v3827_v49  ;;  %v3988_v0 = vmax.f32 %v3924_v50, 0.0  ;;  %v3989_v1 = vmax.f32 %v3925_v51, 0.0  ;;  %v6971_v2 = vpack.c.bf16 %v3987_v53, %v3987_v53  ;;  %v4951_v50 = vld [vmem:[#allocation4 + $0x10] sm:$0xf] }
 0x1da   : > { %v3831_v3 = vmax.f32 %v3381_v42, %v6785_v54  ;;  %v3928_v4 = vadd.f32 %v8448_v61, %v3829_v55  ;;  %v3929_v6 = vadd.f32 %v8435_v52, %v3830_v57  ;;  %v3991_v10 = vmax.f32 %v3927_v60, 0.0  ;;  %v4640_v57 = vld [vmem:[#allocation4 + $0x10] sm:$0xf] }
 0x1db   : > { %v3990_v11 = vmax.f32 %v3926_v62, 0.0  ;;  %v6972_v5 = vpack.c.bf16 %v3988_v0, %v3988_v0  ;;  %v6973_v13 = vpack.c.bf16 %v3989_v1, %v3989_v1  ;;  %v4379_v14 = vunpack.c.l.b16 %v6971_v2 }
 0x1dc   : > { %v3930_v15 = vadd.f32 %v8452_v7, %v3831_v3  ;;  %v3992_v16 = vmax.f32 %v3928_v4, 0.0  ;;  %v3993_v17 = vmax.f32 %v3929_v6, 0.0  ;;  %v6975_v18 = vpack.c.bf16 %v3991_v10, %v3991_v10  ;;  %v4584_v6 = vld [vmem:[#allocation4 + $0x18] sm:$0xf] }
 0x1dd   : > { %v6974_v19 = vpack.c.bf16 %v3990_v11, %v3990_v11  ;;  %v4380_v20 = vunpack.c.l.b16 %v6972_v5  ;;  %v4381_v24 = vunpack.c.l.b16 %v6973_v13  ;;  %v4459_v56 = vrot.slane %v4379_v14, 7 }
 0x1de   : > { %v3994_v25 = vmax.f32 %v3930_v15, 0.0  ;;  %v6976_v26 = vpack.c.bf16 %v3992_v16, %v3992_v16  ;;  %v6977_v27 = vpack.c.bf16 %v3993_v17, %v3993_v17  ;;  %v4383_v28 = vunpack.c.l.b16 %v6975_v18  ;;  %v4066_v18 = vld [vmem:[#allocation4 + $0x38] sm:$0x1] }
 0x1df   : > { %v4382_v35 = vunpack.c.l.b16 %v6974_v19  ;;  %v4460_v37 = vrot.slane %v4380_v20, 6  ;;  %v4462_v38 = vrot.slane %v4381_v24, 5  ;;  %v5149_v42 = vsel %vm8347_vm13, %v6908_v32, %v5148_v12  ;;  %v5257_v32 = vld [vmem:[#allocation4 + $0x10] sm:$0xf] }
 0x1e0   : > { %v4384_v43 = vunpack.c.l.b16 %v6976_v26  ;;  %v4385_v47 = vunpack.c.l.b16 %v6977_v27  ;;  %v4466_v48 = vrot.slane %v4383_v28, 3  ;;  %v7021_v49 = vpack.c.bf16 %v3994_v25, %v3994_v25  ;;  %5176 = vrot.lane.b32.xlu1 %v5149_v42, %s7599_s16  ;;  %v4098_v25 = vld [vmem:[#allocation4 + $0x3c] sm:$0x1]  ;;  %v4641_v27 = vld [vmem:[#allocation4 + $0x14] sm:$0x1] }
 0x1e1   : > { %v4461_v51 = vsel %vm4429_vm3, %v4460_v37, %v4459_v56  ;;  %v4464_v53 = vrot.slane %v4382_v35, 4  ;;  %v6901_v54 = vrot.slane %v4804_v31, 9  ;;  %v6915_v55 = vrot.slane %v5418_v33, 9  ;;  %v5258_v33 = vld [vmem:[#allocation4 + $0x14] sm:$0x1] }
 0x1e2   : > { %v4463_v60 = vsel %vm4432_vm5, %v4462_v38, %v4461_v51  ;;  %v4468_v62 = vrot.slane %v4384_v43, 2  ;;  %v4470_v63 = vrot.slane %v4385_v47, 1  ;;  %v4588_v12 = vsel %vm8301_vm11, %v7021_v49, %v4587_v39 }
 0x1e3   : > { %v4465_v0 = vsel %vm4435_vm7, %v4464_v53, %v4463_v60  ;;  %4589 = vst [vmem:[#allocation4 + $0x1c] sm:$0x1] %v4588_v12  ;;  %v4846_v1 = vsel %vm8347_vm13, %v6901_v54, %v4845_v23  ;;  %v5453_v2 = vsel %vm8347_vm13, %v6915_v55, %v5452_v41  ;;  %v4980_v3 = vshrl.u32 %v4951_v50, 16 }
 0x1e4   : > { %v4467_v4 = vsel %vm4438_vm8, %v4466_v48, %v4465_v0  ;;  %4871 = vrot.lane.b32.xlu0 %v4846_v1, %s7597_s27  ;;  %v4983_v10 = vshll.u32 %v4951_v50, 16  ;;  %v4684_v11 = vshrl.u32 %v4640_v57, 16  ;;  %v4687_v5 = vshll.u32 %v4640_v57, 16 }
 0x1e5   : > { %v4469_v13 = vsel %vm9223_vm9, %v4468_v62, %v4467_v4  ;;  %v4982_v14 = vrot.slane %v4980_v3, 4  ;;  %v5274_v15 = vshrl.u32 %v5257_v32, 16  ;;  %v5277_v23 = vshll.u32 %v5257_v32, 16 }
 0x1e6   : > { %v4471_v9 = vsel %vm4444_vm10, %v4470_v63, %v4469_v13  ;;  %v4985_v16 = vrot.slane %v4983_v10, 5  ;;  %v4686_v17 = vrot.slane %v4684_v11, 4  ;;  %v4689_v41 = vrot.slane %v4687_v5, 5 }
 0x1e7   : > { %v4541_v19 = vpack.c.b16 %v4471_v9, %v4471_v9  ;;  %v5276_v20 = vrot.slane %v5274_v15, 4  ;;  %v5279_v24 = vrot.slane %v5277_v23, 5  ;;  %v4067_v56 = vsel %vm8301_vm11, 0, %v4066_v18 }
 0x1e8   : > { %5482 = vrot.lane.b32.xlu0 %v5453_v2, %s7601_s23  ;;  %v4986_v26 = vor.u32 %v4985_v16, %v4982_v14  ;;  %4068 = vst [vmem:[#allocation4 + $0x38] sm:$0x1] %v4067_v56  ;;  %v4099_v28 = vsel %vm8310_vm12, 0, %v4098_v25  ;;  %v4989_v35 = vshll.u32 %v4952_v8, 16  ;;  %v4690_v37 = vor.u32 %v4689_v41, %v4686_v17 }
 0x1e9   : > { %v4585_v31 = vsel %vm8479_vm15, %v4541_v19, %v4584_v6  ;;  %4100 = vst [vmem:[#allocation4 + $0x3c] sm:$0x1] %v4099_v28  ;;  %v5280_v38 = vor.u32 %v5279_v24, %v5276_v20  ;;  %v4693_v42 = vshll.u32 %v4641_v27, 16  ;;  %v5283_v48 = vshll.u32 %v5258_v33, 16 }
 0x1ea   : > { %4586 = vst [vmem:[#allocation4 + $0x18] sm:$0xf] %v4585_v31  ;;  %v4987_v47 = vrot.slane %v4986_v26, 4  ;;  %v8589_v51 = vld [vmem:[#allocation4 + $0x1c] sm:$0x1]  ;;  %v4991_v55 = vrot.slane %v4989_v35, 5 }
 0x1eb   : > { %v7092_v39 = vpop.f32.mrb[12].mxu0  ;;  %v8591_v53 = vld [vmem:[#allocation4 + $0x1c] sm:$0x1]  ;;  %v4691_v57 = vrot.slane %v4690_v37, 4  ;;  %v5281_v60 = vrot.slane %v5280_v38, 4  ;;  %v4695_v32 = vrot.slane %v4693_v42, 5 }
 0x1ec   : > { %v3169_v43 = vpop.f32.mrb[13].mxu0  ;;  %v8594_v0 = vld [vmem:[#allocation4 + $0x1c] sm:$0x1]  ;;  %v4992_v1 = vsel %vm8341_vm1, %v4987_v47, %v4991_v55  ;;  %v5285_v2 = vrot.slane %v5283_v48, 5  ;;  %v4849_v3 = vrot.slane %v8589_v51, 5  ;;  %v5152_v4 = vrot.slane %v8591_v53, 5 }
 0x1ed   : > { %v3254_v49 = vmax.f32 %v3169_v43, %v7092_v39  ;;  %v7093_v50 = vpop.f32.mrb[14].mxu0  ;;  %v4696_v15 = vsel %vm8341_vm1, %v4691_v57, %v4695_v32  ;;  %v5456_v16 = vrot.slane %v8594_v0, 5 }
 0x1ee   : > { %v3172_v54 = vpop.f32.mrb[15].mxu0  ;;  %v5286_v23 = vsel %vm8341_vm1, %v5281_v60, %v5285_v2 }
 0x1ef   : > { %v3382_v62 = vcombine.high %v3254_v49, %v3254_v49  ;;  %v3389_v63 = vrot.slane %v3254_v49, %v8417_v34  ;;  %v3255_v12 = vmax.f32 %v3172_v54, %v7093_v50 }
 0x1f1   : > { %v3396_v6 = vrot.slane %v3382_v62, %v8417_v34  ;;  %v3397_v10 = vcombine.high %v3389_v63, %v3389_v63  ;;  %v6786_v11 = vrot.slane %v3389_v63, 9  ;;  %v3399_v5 = vcombine.high %v3255_v12, %v3255_v12  ;;  %v5209_v13 = vld [vmem:[#allocation4 + $0x18] sm:$0xf] }
 0x1f2   : > { %v4902_v8 = vld [vmem:[#allocation4 + $0x18] sm:$0xf]  ;;  %v3406_v14 = vrot.slane %v3255_v12, %v8417_v34  ;;  %5226 = vrot.lane.b32.xlu1 %v5209_v13, %s7592_s21 }
 0x1f3   : > { %4920 = vrot.lane.b32.xlu0 %v4902_v8, %s7589_s14  ;;  %v8608_v9 = vld [vmem:[#allocation4 + $0x18] sm:$0xe]  ;;  %v3398_v17 = vcombine.high %v3396_v6, %v3396_v6  ;;  %v6787_v41 = vrot.slane %v3397_v10, 9  ;;  %v6788_v18 = vrot.slane %v3396_v6, 9  ;;  %v3832_v19 = vmax.f32 %v3389_v63, %v6786_v11 }
 0x1f4   : > { %v3413_v20 = vrot.slane %v3399_v5, %v8417_v34  ;;  %v3414_v24 = vcombine.high %v3406_v14, %v3406_v14  ;;  %v6790_v56 = vrot.slane %v3406_v14, 9  ;;  %v6902_v25 = vrot.slane %v8608_v9, 9  ;;  %v4623_v26 = vld [vmem:[#allocation4 + $0x18] sm:$0xf] }
 0x1f5   : > { %v6789_v27 = vrot.slane %v3398_v17, 9  ;;  %v3833_v28 = vmax.f32 %v3397_v10, %v6787_v41  ;;  %v3834_v31 = vmax.f32 %v3396_v6, %v6788_v18  ;;  %v3931_v33 = vadd.f32 %v8421_v36, %v3832_v19  ;;  %4631 = vst.msk [vmem:[#allocation3 + $0xc] sm:$0xf] %vm9246_vm0, %v4623_v26  ;;  %v5114_v26 = vld [vmem:[#allocation4 + $0x18] sm:$0xe] }
 0x1f6   : > { %v3415_v35 = vcombine.high %v3413_v20, %v3413_v20  ;;  %v6791_v37 = vrot.slane %v3414_v24, 9  ;;  %v6792_v38 = vrot.slane %v3413_v20, 9  ;;  %v3836_v39 = vmax.f32 %v3406_v14, %v6790_v56  ;;  %5079 = vrot.lane.b32.xlu1 %v4992_v1, %s7600_s17 }
 0x1f7   : > { %4771 = vrot.lane.b32.xlu0 %v4696_v15, %s7595_s25  ;;  %v3835_v42 = vmax.f32 %v3398_v17, %v6789_v27  ;;  %v3932_v43 = vadd.f32 %v8441_v58, %v3833_v28  ;;  %v3933_v47 = vadd.f32 %v8430_v45, %v3834_v31  ;;  %v3995_v48 = vmax.f32 %v3931_v33, 0.0  ;;  %v5420_v27 = vld [vmem:[#allocation4 + $0x18] sm:$0xe]  ;;  %v4593_v33 = vld [vmem:[#allocation4 + $0x24] sm:$0x1] }
 0x1f8   : > { %v6793_v49 = vrot.slane %v3415_v35, 9  ;;  %v3837_v50 = vmax.f32 %v3414_v24, %v6791_v37  ;;  %v3838_v54 = vmax.f32 %v3413_v20, %v6792_v38  ;;  %v3935_v55 = vadd.f32 %v8425_v40, %v3836_v39 }
 0x1f9   : > { %v3934_v57 = vadd.f32 %v8444_v59, %v3835_v42  ;;  %v3996_v60 = vmax.f32 %v3932_v43, 0.0  ;;  %v3997_v62 = vmax.f32 %v3933_v47, 0.0  ;;  %v6979_v63 = vpack.c.bf16 %v3995_v48, %v3995_v48  ;;  %v4953_v43 = vld [vmem:[#allocation4 + $0x18] sm:$0xf] }
 0x1fa   : > { %v3839_v12 = vmax.f32 %v3415_v35, %v6793_v49  ;;  %v3936_v32 = vadd.f32 %v8448_v61, %v3837_v50  ;;  %v3937_v1 = vadd.f32 %v8435_v52, %v3838_v54  ;;  %v3999_v2 = vmax.f32 %v3935_v55, 0.0  ;;  %v4642_v54 = vld [vmem:[#allocation4 + $0x18] sm:$0xf] }
 0x1fb   : > { %5385 = vrot.lane.b32.xlu0 %v5286_v23, %s7596_s26  ;;  %v3998_v6 = vmax.f32 %v3934_v57, 0.0  ;;  %v6980_v10 = vpack.c.bf16 %v3996_v60, %v3996_v60  ;;  %v6981_v11 = vpack.c.bf16 %v3997_v62, %v3997_v62  ;;  %v4387_v5 = vunpack.c.l.b16 %v6979_v63 }
 0x1fc   : > { %v3938_v13 = vadd.f32 %v8452_v7, %v3839_v12  ;;  %v4000_v8 = vmax.f32 %v3936_v32, 0.0  ;;  %v4001_v14 = vmax.f32 %v3937_v1, 0.0  ;;  %v6983_v15 = vpack.c.bf16 %v3999_v2, %v3999_v2 }
 0x1fd   : > { %v6982_v9 = vpack.c.bf16 %v3998_v6, %v3998_v6  ;;  %v4388_v17 = vunpack.c.l.b16 %v6980_v10  ;;  %v4389_v41 = vunpack.c.l.b16 %v6981_v11  ;;  %v4472_v18 = vrot.slane %v4387_v5, 7  ;;  %v4590_v10 = vld [vmem:[#allocation4 + $0x20] sm:$0xf] }
 0x1fe   : > { %v4002_v19 = vmax.f32 %v3938_v13, 0.0  ;;  %v6984_v20 = vpack.c.bf16 %v4000_v8, %v4000_v8  ;;  %v6985_v24 = vpack.c.bf16 %v4001_v14, %v4001_v14  ;;  %v4391_v56 = vunpack.c.l.b16 %v6983_v15  ;;  %v4954_v13 = vld [vmem:[#allocation4 + $0x1c] sm:$0x1] }
 0x1ff   : > { %v4390_v23 = vunpack.c.l.b16 %v6982_v9  ;;  %v4473_v28 = vrot.slane %v4388_v17, 6  ;;  %v4475_v31 = vrot.slane %v4389_v41, 5  ;;  %v4850_v35 = vsel %vm8347_vm13, %v6902_v25, %v4849_v3  ;;  %v5259_v25 = vld [vmem:[#allocation4 + $0x18] sm:$0xf]  ;;  %v4069_v41 = vld [vmem:[#allocation4 + $0x40] sm:$0x1] }
 0x200   : > { %v4392_v37 = vunpack.c.l.b16 %v6984_v20  ;;  %v4393_v38 = vunpack.c.l.b16 %v6985_v24  ;;  %v4479_v39 = vrot.slane %v4391_v56, 3  ;;  %v7022_v42 = vpack.c.bf16 %v4002_v19, %v4002_v19  ;;  %4873 = vrot.lane.b32.xlu1 %v4850_v35, %s7597_s27  ;;  %v4643_v20 = vld [vmem:[#allocation4 + $0x1c] sm:$0x1] }
 0x201   : > { %v4474_v47 = vsel %vm4429_vm3, %v4473_v28, %v4472_v18  ;;  %v4477_v48 = vrot.slane %v4390_v23, 4  ;;  %v6909_v49 = vrot.slane %v5114_v26, 9  ;;  %v6916_v50 = vrot.slane %v5420_v27, 9  ;;  %v4101_v18 = vld [vmem:[#allocation4 + $0x44] sm:$0x1] }
 0x202   : > { %v4476_v55 = vsel %vm4432_vm5, %v4475_v31, %v4474_v47  ;;  %v4481_v57 = vrot.slane %v4392_v37, 2  ;;  %v4483_v51 = vrot.slane %v4393_v38, 1  ;;  %v4594_v3 = vsel %vm8301_vm11, %v7022_v42, %v4593_v33  ;;  %v5260_v27 = vld [vmem:[#allocation4 + $0x1c] sm:$0x1] }
 0x203   : > { %v4478_v60 = vsel %vm4435_vm7, %v4477_v48, %v4476_v55  ;;  %4595 = vst [vmem:[#allocation4 + $0x24] sm:$0x1] %v4594_v3  ;;  %v5153_v62 = vsel %vm8347_vm13, %v6909_v49, %v5152_v4  ;;  %v5457_v63 = vsel %vm8347_vm13, %v6916_v50, %v5456_v16  ;;  %v4994_v12 = vshrl.u32 %v4953_v43, 16 }
 0x204   : > { %v4480_v32 = vsel %vm4438_vm8, %v4479_v39, %v4478_v60  ;;  %5178 = vrot.lane.b32.xlu0 %v5153_v62, %s7599_s16  ;;  %5484 = vrot.lane.b32.xlu1 %v5457_v63, %s7601_s23  ;;  %v4997_v1 = vshll.u32 %v4953_v43, 16  ;;  %v4698_v2 = vshrl.u32 %v4642_v54, 16  ;;  %v4701_v6 = vshll.u32 %v4642_v54, 16 }
 0x205   : > { %v4482_v53 = vsel %vm9223_vm9, %v4481_v57, %v4480_v32  ;;  %v4996_v11 = vrot.slane %v4994_v12, 4  ;;  %v5288_v4 = vshrl.u32 %v5259_v25, 16  ;;  %v5291_v5 = vshll.u32 %v5259_v25, 16 }
 0x206   : > { %v4484_v0 = vsel %vm4444_vm10, %v4483_v51, %v4482_v53  ;;  %v4999_v16 = vrot.slane %v4997_v1, 5  ;;  %v4700_v8 = vrot.slane %v4698_v2, 4  ;;  %v4703_v14 = vrot.slane %v4701_v6, 5 }
 0x207   : > { %v4543_v15 = vpack.c.b16 %v4484_v0, %v4484_v0  ;;  %v5290_v9 = vrot.slane %v5288_v4, 4  ;;  %v5293_v17 = vrot.slane %v5291_v5, 5  ;;  %v4070_v24 = vsel %vm8301_vm11, 0, %v4069_v41 }
 0x208   : > { %v5000_v19 = vor.u32 %v4999_v16, %v4996_v11  ;;  %v4102_v56 = vsel %vm8310_vm12, 0, %v4101_v18  ;;  %4071 = vst [vmem:[#allocation4 + $0x40] sm:$0x1] %v4070_v24  ;;  %v5003_v23 = vshll.u32 %v4954_v13, 16  ;;  %v4704_v28 = vor.u32 %v4703_v14, %v4700_v8  ;;  %vm9249_vm12 = vmmov %vm9246_vm0 }
 0x209   : > { %v4591_v26 = vsel %vm8479_vm15, %v4543_v15, %v4590_v10  ;;  %4103 = vst [vmem:[#allocation4 + $0x44] sm:$0x1] %v4102_v56  ;;  %v5294_v31 = vor.u32 %v5293_v17, %v5290_v9  ;;  %v4707_v35 = vshll.u32 %v4643_v20, 16  ;;  %v5297_v39 = vshll.u32 %v5260_v27, 16 }
 0x20a   : > { %4592 = vst [vmem:[#allocation4 + $0x20] sm:$0xf] %v4591_v26  ;;  %v5001_v38 = vrot.slane %v5000_v19, 4  ;;  %v8654_v47 = vld [vmem:[#allocation4 + $0x24] sm:$0x1]  ;;  %v5005_v49 = vrot.slane %v5003_v23, 5 }
 0x20b   : > { %v7096_v33 = vpop.f32.mrb[16].mxu0  ;;  %v8656_v46 = vld [vmem:[#allocation4 + $0x24] sm:$0x1]  ;;  %v4705_v50 = vrot.slane %v4704_v28, 4  ;;  %v5295_v54 = vrot.slane %v5294_v31, 4  ;;  %v4709_v3 = vrot.slane %v4707_v35, 5 }
 0x20c   : > { %v3185_v37 = vpop.f32.mrb[17].mxu0  ;;  %v8659_v25 = vld [vmem:[#allocation4 + $0x24] sm:$0x1]  ;;  %v5006_v60 = vsel %vm8341_vm1, %v5001_v38, %v5005_v49  ;;  %v5299_v62 = vrot.slane %v5297_v39, 5  ;;  %v5460_v63 = vrot.slane %v8654_v47, 5  ;;  %v5156_v12 = vrot.slane %v8656_v46, 5 }
 0x20d   : > { %v3256_v42 = vmax.f32 %v3185_v37, %v7096_v33  ;;  %v7097_v43 = vpop.f32.mrb[18].mxu0  ;;  %v4710_v4 = vsel %vm8341_vm1, %v4705_v50, %v4709_v3  ;;  %v4853_v13 = vrot.slane %v8659_v25, 5  ;;  %vm9225_vm0 = vcmask 158848  }
 0x20e   : > { %v3188_v48 = vpop.f32.mrb[19].mxu0  ;;  %v5300_v5 = vsel %vm8341_vm1, %v5295_v54, %v5299_v62 }
 0x20f   : > { %v3416_v55 = vcombine.high %v3256_v42, %v3256_v42  ;;  %v3423_v57 = vrot.slane %v3256_v42, %v8417_v34  ;;  %v3257_v51 = vmax.f32 %v3188_v48, %v7097_v43 }
 0x211   : > { %v3430_v32 = vrot.slane %v3416_v55, %v8417_v34  ;;  %v3431_v1 = vcombine.high %v3423_v57, %v3423_v57  ;;  %v6794_v2 = vrot.slane %v3423_v57, 9  ;;  %v3433_v6 = vcombine.high %v3257_v51, %v3257_v51  ;;  %v5210_v53 = vld [vmem:[#allocation4 + $0x20] sm:$0xf] }
 0x212   : > { %v4903_v10 = vld [vmem:[#allocation4 + $0x20] sm:$0xf]  ;;  %v3440_v11 = vrot.slane %v3257_v51, %v8417_v34  ;;  %5228 = vrot.lane.b32.xlu0 %v5210_v53, %s7592_s21 }
 0x213   : > { %4922 = vrot.lane.b32.xlu1 %v4903_v10, %s7589_s14  ;;  %v8673_v0 = vld [vmem:[#allocation4 + $0x20] sm:$0xe]  ;;  %v3432_v16 = vcombine.high %v3430_v32, %v3430_v32  ;;  %v6795_v8 = vrot.slane %v3431_v1, 9  ;;  %v6796_v14 = vrot.slane %v3430_v32, 9  ;;  %v3840_v15 = vmax.f32 %v3423_v57, %v6794_v2 }
 0x214   : > { %v3447_v9 = vrot.slane %v3433_v6, %v8417_v34  ;;  %v3448_v17 = vcombine.high %v3440_v11, %v3440_v11  ;;  %v6798_v41 = vrot.slane %v3440_v11, 9  ;;  %v6917_v18 = vrot.slane %v8673_v0, 9  ;;  %v4624_v19 = vld [vmem:[#allocation4 + $0x20] sm:$0xf] }
 0x215   : > { %v6797_v20 = vrot.slane %v3432_v16, 9  ;;  %v3841_v24 = vmax.f32 %v3431_v1, %v6795_v8  ;;  %v3842_v56 = vmax.f32 %v3430_v32, %v6796_v14  ;;  %v3939_v26 = vadd.f32 %v8421_v36, %v3840_v15  ;;  %4632 = vst.msk [vmem:[#allocation3 + $0x10] sm:$0xf] %vm9249_vm12, %v4624_v19 }
 0x216   : > { %v3449_v27 = vcombine.high %v3447_v9, %v3447_v9  ;;  %v6799_v23 = vrot.slane %v3448_v17, 9  ;;  %v6800_v28 = vrot.slane %v3447_v9, 9  ;;  %v3844_v31 = vmax.f32 %v3440_v11, %v6798_v41  ;;  %5081 = vrot.lane.b32.xlu0 %v5006_v60, %s7600_s17  ;;  %v5116_v41 = vld [vmem:[#allocation4 + $0x20] sm:$0xe] }
 0x217   : > { %4773 = vrot.lane.b32.xlu1 %v4710_v4, %s7595_s25  ;;  %v3843_v33 = vmax.f32 %v3432_v16, %v6797_v20  ;;  %v3940_v35 = vadd.f32 %v8441_v58, %v3841_v24  ;;  %v3941_v37 = vadd.f32 %v8430_v45, %v3842_v56  ;;  %v4003_v38 = vmax.f32 %v3939_v26, 0.0  ;;  %v4599_v56 = vld [vmem:[#allocation4 + $0x2c] sm:$0x1] }
 0x218   : > { %v6801_v39 = vrot.slane %v3449_v27, 9  ;;  %v3845_v42 = vmax.f32 %v3448_v17, %v6799_v23  ;;  %v3846_v43 = vmax.f32 %v3447_v9, %v6800_v28  ;;  %v3943_v48 = vadd.f32 %v8425_v40, %v3844_v31 }
 0x219   : > { %v3942_v49 = vadd.f32 %v8444_v59, %v3843_v33  ;;  %v4004_v50 = vmax.f32 %v3940_v35, 0.0  ;;  %v4005_v54 = vmax.f32 %v3941_v37, 0.0  ;;  %v6987_v55 = vpack.c.bf16 %v4003_v38, %v4003_v38  ;;  %v4955_v33 = vld [vmem:[#allocation4 + $0x20] sm:$0xf] }
 0x21a   : > { %v3847_v57 = vmax.f32 %v3449_v27, %v6801_v39  ;;  %v3944_v51 = vadd.f32 %v8448_v61, %v3845_v42  ;;  %v3945_v3 = vadd.f32 %v8435_v52, %v3846_v43  ;;  %v4007_v60 = vmax.f32 %v3943_v48, 0.0  ;;  %v5261_v42 = vld [vmem:[#allocation4 + $0x20] sm:$0xf] }
 0x21b   : > { %5387 = vrot.lane.b32.xlu1 %v5300_v5, %s7596_s26  ;;  %v4006_v62 = vmax.f32 %v3942_v49, 0.0  ;;  %v6988_v32 = vpack.c.bf16 %v4004_v50, %v4004_v50  ;;  %v6989_v1 = vpack.c.bf16 %v4005_v54, %v4005_v54  ;;  %v4395_v2 = vunpack.c.l.b16 %v6987_v55  ;;  %v4808_v5 = vld [vmem:[#allocation4 + $0x20] sm:$0xe] }
 0x21c   : > { %v3946_v6 = vadd.f32 %v8452_v7, %v3847_v57  ;;  %v4008_v53 = vmax.f32 %v3944_v51, 0.0  ;;  %v4009_v10 = vmax.f32 %v3945_v3, 0.0  ;;  %v6991_v11 = vpack.c.bf16 %v4007_v60, %v4007_v60 }
 0x21d   : > { %v6990_v4 = vpack.c.bf16 %v4006_v62, %v4006_v62  ;;  %v4396_v0 = vunpack.c.l.b16 %v6988_v32  ;;  %v4397_v16 = vunpack.c.l.b16 %v6989_v1  ;;  %v4485_v8 = vrot.slane %v4395_v2, 7  ;;  %v4596_v1 = vld [vmem:[#allocation4 + $0x28] sm:$0xf] }
 0x21e   : > { %v4010_v14 = vmax.f32 %v3946_v6, 0.0  ;;  %v6992_v15 = vpack.c.bf16 %v4008_v53, %v4008_v53  ;;  %v6993_v9 = vpack.c.bf16 %v4009_v10, %v4009_v10  ;;  %v4399_v17 = vunpack.c.l.b16 %v6991_v11  ;;  %v4956_v11 = vld [vmem:[#allocation4 + $0x24] sm:$0x1] }
 0x21f   : > { %v4398_v19 = vunpack.c.l.b16 %v6990_v4  ;;  %v4486_v20 = vrot.slane %v4396_v0, 6  ;;  %v4488_v24 = vrot.slane %v4397_v16, 5  ;;  %v5461_v26 = vsel %vm8347_vm13, %v6917_v18, %v5460_v63  ;;  %v4644_v18 = vld [vmem:[#allocation4 + $0x20] sm:$0xf]  ;;  %v5262_v4 = vld [vmem:[#allocation4 + $0x24] sm:$0x1] }
 0x220   : > { %v4400_v27 = vunpack.c.l.b16 %v6992_v15  ;;  %v4401_v23 = vunpack.c.l.b16 %v6993_v9  ;;  %v4492_v28 = vrot.slane %v4399_v17, 3  ;;  %v7023_v31 = vpack.c.bf16 %v4010_v14, %v4010_v14  ;;  %5486 = vrot.lane.b32.xlu0 %v5461_v26, %s7601_s23  ;;  %v4645_v9 = vld [vmem:[#allocation4 + $0x24] sm:$0x1] }
 0x221   : > { %v4487_v35 = vsel %vm4429_vm3, %v4486_v20, %v4485_v8  ;;  %v4490_v37 = vrot.slane %v4398_v19, 4  ;;  %v6910_v38 = vrot.slane %v5116_v41, 9  ;;  %v6903_v39 = vrot.slane %v4808_v5, 9 }
 0x222   : > { %v4489_v43 = vsel %vm4432_vm5, %v4488_v24, %v4487_v35  ;;  %v4494_v48 = vrot.slane %v4400_v27, 2  ;;  %v4496_v47 = vrot.slane %v4401_v23, 1  ;;  %v4600_v63 = vsel %vm8301_vm11, %v7023_v31, %v4599_v56 }
 0x223   : > { %v4491_v49 = vsel %vm4435_vm7, %v4490_v37, %v4489_v43  ;;  %4601 = vst [vmem:[#allocation4 + $0x2c] sm:$0x1] %v4600_v63  ;;  %v5157_v50 = vsel %vm8347_vm13, %v6910_v38, %v5156_v12  ;;  %v4854_v54 = vsel %vm8347_vm13, %v6903_v39, %v4853_v13  ;;  %v5008_v55 = vshrl.u32 %v4955_v33, 16 }
 0x224   : > { %v4493_v57 = vsel %vm4438_vm8, %v4492_v28, %v4491_v49  ;;  %5180 = vrot.lane.b32.xlu1 %v5157_v50, %s7599_s16  ;;  %4875 = vrot.lane.b32.xlu0 %v4854_v54, %s7597_s27  ;;  %v4917_v51 = vpop.permute.xlu0 %4916  ;;  %v5011_v3 = vshll.u32 %v4955_v33, 16  ;;  %v5302_v60 = vshrl.u32 %v5261_v42, 16  ;;  %v5305_v62 = vshll.u32 %v5261_v42, 16 }
 0x225   : > { %v4495_v46 = vsel %vm9223_vm9, %v4494_v48, %v4493_v57  ;;  %4941 = vst.msk [vmem:[#allocation3] sm:$0xf] %vm9222_vm14, %v4917_v51  ;;  %v5010_v12 = vrot.slane %v5008_v55, 4  ;;  %v4712_v25 = vshrl.u32 %v4644_v18, 16  ;;  %v4715_v32 = vshll.u32 %v4644_v18, 16 }
 0x226   : > { %v4497_v13 = vsel %vm4444_vm10, %v4496_v47, %v4495_v46  ;;  %v5013_v2 = vrot.slane %v5011_v3, 5  ;;  %v5304_v6 = vrot.slane %v5302_v60, 4  ;;  %v5307_v53 = vrot.slane %v5305_v62, 5 }
 0x227   : > { %v4545_v10 = vpack.c.b16 %v4497_v13, %v4497_v13  ;;  %v4714_v0 = vrot.slane %v4712_v25, 4  ;;  %v4717_v16 = vrot.slane %v4715_v32, 5  ;;  %v5017_v17 = vshll.u32 %v4956_v11, 16  ;;  %v8723_v25 = vpop.permute.xlu1 %5238 }
 0x228   : > { %v5014_v14 = vor.u32 %v5013_v2, %v5010_v12  ;;  %v5308_v15 = vor.u32 %v5307_v53, %v5304_v6  ;;  %v5311_v41 = vshll.u32 %v5262_v4, 16  ;;  %v4721_v19 = vshll.u32 %v4645_v9, 16 }
 0x229   : > { %v4597_v8 = vsel %vm8479_vm15, %v4545_v10, %v4596_v1  ;;  %v4718_v5 = vor.u32 %v4717_v16, %v4714_v0  ;;  %v5019_v28 = vrot.slane %v5017_v17, 5  ;;  %vm5198_vm12 = vcmask 191648  }
 0x22a   : > { %4598 = vst [vmem:[#allocation4 + $0x28] sm:$0xf] %v4597_v8  ;;  %v5015_v20 = vrot.slane %v5014_v14, 4  ;;  %v5309_v24 = vrot.slane %v5308_v15, 4  ;;  %v5425_v56 = vld [vmem:[#allocation4 + $0x2c] sm:$0x1] }
 0x22b   : > { %v7100_v26 = vpop.f32.mrb[20].mxu0  ;;  %v5119_v27 = vld [vmem:[#allocation4 + $0x2c] sm:$0x1]  ;;  %v5313_v31 = vrot.slane %v5311_v41, 5  ;;  %v4719_v37 = vrot.slane %v4718_v5, 4  ;;  %v4723_v38 = vrot.slane %v4721_v19, 5 }
 0x22c   : > { %v3201_v23 = vpop.f32.mrb[21].mxu0  ;;  %v5464_v39 = vrot.slane %v5425_v56, 5  ;;  %v4811_v42 = vld [vmem:[#allocation4 + $0x2c] sm:$0x1]  ;;  %v5020_v63 = vsel %vm8341_vm1, %v5015_v20, %v5019_v28  ;;  %v5160_v49 = vrot.slane %v5119_v27, 5  ;;  %v8740_v28 = vpop.permute.xlu1 %5399 }
 0x22d   : > { %v3258_v33 = vmax.f32 %v3201_v23, %v7100_v26  ;;  %v7101_v35 = vpop.f32.mrb[22].mxu0  ;;  %v5314_v18 = vsel %vm8341_vm1, %v5309_v24, %v5313_v31  ;;  %v4857_v12 = vrot.slane %v4811_v42, 5  ;;  %v4724_v53 = vsel %vm8341_vm1, %v4719_v37, %v4723_v38 }
 0x22e   : > { %v3204_v43 = vpop.f32.mrb[23].mxu0 }
 0x22f   : > { %v3450_v50 = vcombine.high %v3258_v33, %v3258_v33  ;;  %v3457_v54 = vrot.slane %v3258_v33, %v8417_v34  ;;  %v3259_v55 = vmax.f32 %v3204_v43, %v7101_v35 }
 0x231   : > { %v5211_v48 = vld [vmem:[#allocation4 + $0x28] sm:$0xf]  ;;  %v3464_v32 = vrot.slane %v3450_v50, %v8417_v34  ;;  %v3465_v13 = vcombine.high %v3457_v54, %v3457_v54  ;;  %v6802_v1 = vrot.slane %v3457_v54, 9  ;;  %v3467_v2 = vcombine.high %v3259_v55, %v3259_v55 }
 0x232   : > { %v4904_v47 = vld [vmem:[#allocation4 + $0x28] sm:$0xf]  ;;  %5230 = vrot.lane.b32.xlu1 %v5211_v48, %s7592_s21  ;;  %v3474_v6 = vrot.slane %v3259_v55, %v8417_v34 }
 0x233   : > { %4924 = vrot.lane.b32.xlu0 %v4904_v47, %s7589_s14  ;;  %v5424_v57 = vld [vmem:[#allocation4 + $0x28] sm:$0xe]  ;;  %v3466_v0 = vcombine.high %v3464_v32, %v3464_v32  ;;  %v6803_v16 = vrot.slane %v3465_v13, 9  ;;  %v6804_v8 = vrot.slane %v3464_v32, 9  ;;  %v3848_v14 = vmax.f32 %v3457_v54, %v6802_v1  ;;  %v4870_v1 = vpop.permute.xlu1 %4869 }
 0x234   : > { %v5118_v51 = vld [vmem:[#allocation4 + $0x28] sm:$0xe]  ;;  %v6918_v60 = vrot.slane %v5424_v57, 9  ;;  %v3481_v15 = vrot.slane %v3467_v2, %v8417_v34  ;;  %v3482_v9 = vcombine.high %v3474_v6, %v3474_v6  ;;  %v6806_v17 = vrot.slane %v3474_v6, 9 }
 0x235   : > { %v4810_v3 = vld [vmem:[#allocation4 + $0x28] sm:$0xe]  ;;  %v6911_v62 = vrot.slane %v5118_v51, 9  ;;  %v6805_v5 = vrot.slane %v3466_v0, 9  ;;  %v3849_v19 = vmax.f32 %v3465_v13, %v6803_v16  ;;  %v3850_v20 = vmax.f32 %v3464_v32, %v6804_v8  ;;  %v5175_v2 = vpop.permute.xlu0 %5174 }
 0x236   : > { %v6904_v46 = vrot.slane %v4810_v3, 9  ;;  %v5465_v10 = vsel %vm8347_vm13, %v6918_v60, %v5464_v39  ;;  %v4625_v4 = vld [vmem:[#allocation4 + $0x28] sm:$0xf]  ;;  %5083 = vrot.lane.b32.xlu1 %v5020_v63, %s7600_s17  ;;  %v3947_v24 = vadd.f32 %v8421_v36, %v3848_v14  ;;  %v3483_v56 = vcombine.high %v3481_v15, %v3481_v15 }
 0x237   : > { %v5161_v11 = vsel %vm8347_vm13, %v6911_v62, %v5160_v49  ;;  %5389 = vrot.lane.b32.xlu0 %v5314_v18, %s7596_s26  ;;  %4633 = vst.msk [vmem:[#allocation3 + $0x14] sm:$0xf] %vm9250_vm2, %v4625_v4  ;;  %v6807_v26 = vrot.slane %v3482_v9, 9  ;;  %v6808_v27 = vrot.slane %v3481_v15, 9  ;;  %v3852_v23 = vmax.f32 %v3474_v6, %v6806_v17  ;;  %v4957_v57 = vld [vmem:[#allocation4 + $0x28] sm:$0xf] }
 0x238   : > { %v4858_v41 = vsel %vm8347_vm13, %v6904_v46, %v4857_v12  ;;  %v3851_v31 = vmax.f32 %v3466_v0, %v6805_v5  ;;  %v3948_v33 = vadd.f32 %v8441_v58, %v3849_v19  ;;  %v3949_v35 = vadd.f32 %v8430_v45, %v3850_v20  ;;  %v4605_v5 = vld [vmem:[#allocation4 + $0x34] sm:$0x1] }
 0x239   : > { %v4011_v37 = vmax.f32 %v3947_v24, 0.0  ;;  %v6809_v38 = vrot.slane %v3483_v56, 9  ;;  %v3853_v39 = vmax.f32 %v3482_v9, %v6807_v26  ;;  %v3854_v42 = vmax.f32 %v3481_v15, %v6808_v27  ;;  %v5263_v15 = vld [vmem:[#allocation4 + $0x28] sm:$0xf] }
 0x23a   : > { %5488 = vrot.lane.b32.xlu1 %v5465_v10, %s7601_s23  ;;  %v3951_v43 = vadd.f32 %v8425_v40, %v3852_v23  ;;  %v3950_v48 = vadd.f32 %v8444_v59, %v3851_v31  ;;  %v4012_v47 = vmax.f32 %v3948_v33, 0.0  ;;  %v4013_v63 = vmax.f32 %v3949_v35, 0.0  ;;  %v4646_v35 = vld [vmem:[#allocation4 + $0x28] sm:$0xf] }
 0x23b   : > { %4775 = vrot.lane.b32.xlu0 %v4724_v53, %s7595_s25  ;;  %v6995_v18 = vpack.c.bf16 %v4011_v37, %v4011_v37  ;;  %v3855_v49 = vmax.f32 %v3483_v56, %v6809_v38  ;;  %v3952_v50 = vadd.f32 %v8448_v61, %v3853_v39  ;;  %v3953_v54 = vadd.f32 %v8435_v52, %v3854_v42 }
 0x23c   : > { %v4015_v55 = vmax.f32 %v3951_v43, 0.0  ;;  %v4014_v51 = vmax.f32 %v3950_v48, 0.0  ;;  %v6996_v3 = vpack.c.bf16 %v4012_v47, %v4012_v47  ;;  %v6997_v60 = vpack.c.bf16 %v4013_v63, %v4013_v63 }
 0x23d   : > { %v4403_v62 = vunpack.c.l.b16 %v6995_v18  ;;  %v3954_v46 = vadd.f32 %v8452_v7, %v3855_v49  ;;  %v4016_v12 = vmax.f32 %v3952_v50, 0.0  ;;  %v4017_v32 = vmax.f32 %v3953_v54, 0.0  ;;  %v7515_v54 = vld [vmem:[%s9211_s3] sm:$0xff]  }
 0x23e   : > { %4877 = vrot.lane.b32.xlu1 %v4858_v41, %s7597_s27  ;;  %v6999_v13 = vpack.c.bf16 %v4015_v55, %v4015_v55  ;;  %v6998_v6 = vpack.c.bf16 %v4014_v51, %v4014_v51  ;;  %v4404_v53 = vunpack.c.l.b16 %v6996_v3  ;;  %v4405_v10 = vunpack.c.l.b16 %v6997_v60  ;;  %v4958_v3 = vld [vmem:[#allocation4 + $0x2c] sm:$0x1]  ;;  %7110 = vmatprep.subr.bf16.mxu1 %v7515_v54 }
 0x23f   : > { %5182 = vrot.lane.b32.xlu0 %v5161_v11, %s7599_s16  ;;  %v5022_v4 = vshrl.u32 %v4957_v57, 16  ;;  %v4018_v0 = vmax.f32 %v3954_v46, 0.0  ;;  %v7000_v16 = vpack.c.bf16 %v4016_v12, %v4016_v12  ;;  %v7001_v8 = vpack.c.bf16 %v4017_v32, %v4017_v32  ;;  %v4602_v32 = vld [vmem:[#allocation4 + $0x30] sm:$0xf]  ;;  %7111 = vmatpush3.bf16.msra.mxu1 %v7515_v54 }
 0x240   : > { %v4407_v14 = vunpack.c.l.b16 %v6999_v13  ;;  %v4406_v11 = vunpack.c.l.b16 %v6998_v6  ;;  %v4498_v9 = vrot.slane %v4403_v62, 7  ;;  %v4499_v17 = vrot.slane %v4404_v53, 6 }
 0x241   : > { %v4501_v41 = vrot.slane %v4405_v10, 5  ;;  %v4408_v19 = vunpack.c.l.b16 %v7000_v16  ;;  %v4409_v20 = vunpack.c.l.b16 %v7001_v8  ;;  %v7024_v24 = vpack.c.bf16 %v4018_v0, %v4018_v0  ;;  %v5264_v10 = vld [vmem:[#allocation4 + $0x2c] sm:$0x1] }
 0x242   : > { %v4500_v56 = vsel %vm4429_vm3, %v4499_v17, %v4498_v9  ;;  %v4503_v26 = vrot.slane %v4406_v11, 4  ;;  %v5025_v31 = vshll.u32 %v4957_v57, 16  ;;  %v5316_v33 = vshrl.u32 %v5263_v15, 16 }
 0x243   : > { %v4502_v37 = vsel %vm4432_vm5, %v4501_v41, %v4500_v56  ;;  %v4505_v38 = vrot.slane %v4407_v14, 3  ;;  %v4606_v39 = vsel %vm8301_vm11, %v7024_v24, %v4605_v5  ;;  %vm9221_vm2 = vcmask 224448   ;;  %v7516_v5 = vld [vmem:[%s9211_s3 + $0x8] sm:$0xff]  }
 0x244   : > { %v5225_v27 = vpop.permute.xlu0 %5224  ;;  %v4504_v42 = vsel %vm4435_vm7, %v4503_v26, %v4502_v37  ;;  %v4507_v43 = vrot.slane %v4408_v19, 2  ;;  %4607 = vst [vmem:[#allocation4 + $0x34] sm:$0x1] %v4606_v39  ;;  %v5024_v48 = vrot.slane %v5022_v4, 4  ;;  %v5319_v47 = vshll.u32 %v5263_v15, 16  ;;  %7112 = vmatprep.subr.bf16.mxu1 %v7516_v5 }
 0x245   : > { %v4919_v23 = vpop.permute.xlu1 %4918  ;;  %v4506_v63 = vsel %vm4438_vm8, %v4505_v38, %v4504_v42  ;;  %v4509_v18 = vrot.slane %v4409_v20, 1  ;;  %v4726_v49 = vshrl.u32 %v4646_v35, 16  ;;  %v4729_v50 = vshll.u32 %v4646_v35, 16  ;;  %v4647_v4 = vld [vmem:[#allocation4 + $0x2c] sm:$0x1]  ;;  %7113 = vmatpush3.bf16.msra.mxu1 %v7516_v5 }
 0x246   : > { %v4508_v55 = vsel %vm9223_vm9, %v4507_v43, %v4506_v63  ;;  %v5027_v60 = vrot.slane %v5025_v31, 5  ;;  %v5318_v62 = vrot.slane %v5316_v33, 4  ;;  %v5321_v46 = vrot.slane %v5319_v47, 5  ;;  %v8787_v39 = vld [vmem:[%s9211_s3 + $0x10] ss:$0 sps:$4 sm:$0x33]  }
 0x247   : > { %v4510_v12 = vsel %vm4444_vm10, %v4509_v18, %v4508_v55  ;;  %v4728_v13 = vrot.slane %v4726_v49, 4  ;;  %v4731_v6 = vrot.slane %v4729_v50, 5  ;;  %v5031_v0 = vshll.u32 %v4958_v3, 16 }
 0x248   : > { %v5078_v57 = vpop.permute.xlu0 %5077  ;;  %v4547_v53 = vpack.c.b16 %v4510_v12, %v4510_v12  ;;  %v5028_v8 = vor.u32 %v5027_v60, %v5024_v48  ;;  %v5322_v14 = vor.u32 %v5321_v46, %v5318_v62  ;;  %v5325_v11 = vshll.u32 %v5264_v10, 16 }
 0x249   : > { %v4770_v51 = vpop.permute.xlu1 %4769  ;;  %5102 = vst.msk [vmem:[#allocation3] sm:$0xf] %vm9225_vm0, %v5078_v57  ;;  %v4732_v15 = vor.u32 %v4731_v6, %v4728_v13  ;;  %v4735_v9 = vshll.u32 %v4647_v4, 16 }
 0x24a   : > { %4793 = vst.msk [vmem:[#allocation3 + $0x4] sm:$0xf] %vm9224_vm4, %v4770_v51  ;;  %v4603_v16 = vsel %vm8479_vm15, %v4547_v53, %v4602_v32  ;;  %v5029_v20 = vrot.slane %v5028_v8, 4  ;;  %v5323_v24 = vrot.slane %v5322_v14, 4  ;;  %v5327_v31 = vrot.slane %v5325_v11, 5 }
 0x24b   : > { %5199 = vst.msk [vmem:[#allocation3] sm:$0xf] %vm5198_vm12, %v5175_v2  ;;  %4604 = vst [vmem:[#allocation4 + $0x30] sm:$0xf] %v4603_v16  ;;  %v4813_v2 = vld [vmem:[#allocation4 + $0x34] sm:$0x1] }
 0x24c   : > { %4893 = vst.msk [vmem:[#allocation3 + $0x4] sm:$0xf] %vm4891_vm6, %v4870_v1  ;;  %v7104_v17 = vpop.f32.mrb[24].mxu0  ;;  %v5033_v1 = vrot.slane %v5031_v0, 5  ;;  %v8772_v41 = vld [vmem:[#allocation4 + $0x34] sm:$0x1]  ;;  %v5328_v50 = vsel %vm8341_vm1, %v5323_v24, %v5327_v31 }
 0x24d   : > { %4942 = vst.msk [vmem:[#allocation3 + $0x4] sm:$0xf] %vm9222_vm14, %v4919_v23  ;;  %v3217_v19 = vpop.f32.mrb[25].mxu0  ;;  %v8777_v56 = vrot.slane %v4732_v15, 4  ;;  %v8779_v26 = vld [vmem:[#allocation4 + $0x34] sm:$0x1] }
 0x24e   : > { %5249 = vst.msk [vmem:[#allocation3] sm:$0xf] %vm9221_vm2, %v5225_v27  ;;  %v3260_v27 = vmax.f32 %v3217_v19, %v7104_v17  ;;  %v7105_v23 = vpop.f32.mrb[26].mxu0  ;;  %v8781_v33 = vrot.slane %v4735_v9, 5  ;;  %v4861_v35 = vrot.slane %v4813_v2, 5  ;;  %v5164_v38 = vrot.slane %v8772_v41, 5 }
 0x24f   : > { %v3220_v37 = vpop.f32.mrb[27].mxu0  ;;  %vm5576_vm2 = vcmask 1041408   ;;  %v5468_v47 = vrot.slane %v8779_v26, 5  ;;  %v5034_v49 = vsel %vm8341_vm1, %v5029_v20, %v5033_v1  ;;  %vm9251_vm14 = vcmask 27648  }
 0x250   : > { %v3484_v42 = vcombine.high %v3260_v27, %v3260_v27  ;;  %v3491_v43 = vrot.slane %v3260_v27, %v8417_v34  ;;  %v3261_v48 = vmax.f32 %v3220_v37, %v7105_v23  ;;  %v4738_v54 = vsel %vm8341_vm1, %v8777_v56, %v8781_v33  ;;  %7200 = vmatprep.subr.msk.bf16.mxu1 %vm5576_vm2, %v8787_v39 }
 0x252   : > { %v5212_v63 = vld [vmem:[#allocation4 + $0x30] sm:$0xf]  ;;  %v3498_v57 = vrot.slane %v3484_v42, %v8417_v34  ;;  %v3499_v51 = vcombine.high %v3491_v43, %v3491_v43  ;;  %v6810_v3 = vrot.slane %v3491_v43, 9  ;;  %v3501_v60 = vcombine.high %v3261_v48, %v3261_v48 }
 0x253   : > { %v4905_v18 = vld [vmem:[#allocation4 + $0x30] sm:$0xf]  ;;  %5232 = vrot.lane.b32.xlu0 %v5212_v63, %s7592_s21  ;;  %v3508_v12 = vrot.slane %v3261_v48, %v8417_v34 }
 0x254   : > { %v4812_v55 = vld [vmem:[#allocation4 + $0x30] sm:$0xe]  ;;  %4926 = vrot.lane.b32.xlu1 %v4905_v18, %s7589_s14  ;;  %v3500_v53 = vcombine.high %v3498_v57, %v3498_v57  ;;  %v6811_v10 = vrot.slane %v3499_v51, 9  ;;  %v6812_v4 = vrot.slane %v3498_v57, 9  ;;  %v3856_v0 = vmax.f32 %v3491_v43, %v6810_v3 }
 0x255   : > { %v8804_v62 = vld [vmem:[#allocation4 + $0x30] sm:$0xe]  ;;  %v6905_v32 = vrot.slane %v4812_v55, 9  ;;  %v3515_v16 = vrot.slane %v3501_v60, %v8417_v34  ;;  %v3516_v8 = vcombine.high %v3508_v12, %v3508_v12  ;;  %v6814_v14 = vrot.slane %v3508_v12, 9 }
 0x256   : > { %v8806_v46 = vld [vmem:[#allocation4 + $0x30] sm:$0xe]  ;;  %v6912_v13 = vrot.slane %v8804_v62, 9  ;;  %v6813_v9 = vrot.slane %v3500_v53, 9  ;;  %v3857_v2 = vmax.f32 %v3499_v51, %v6811_v10  ;;  %v3858_v17 = vmax.f32 %v3498_v57, %v6812_v4  ;;  %v8818_v5 = vpop.permute.xlu0 %4871 }
 0x257   : > { %v6919_v6 = vrot.slane %v8806_v46, 9  ;;  %v4862_v15 = vsel %vm8347_vm13, %v6905_v32, %v4861_v35  ;;  %v4626_v11 = vld [vmem:[#allocation4 + $0x30] sm:$0xf]  ;;  %v3955_v1 = vadd.f32 %v8421_v36, %v3856_v0  ;;  %5085 = vrot.lane.b32.xlu0 %v5034_v49, %s7600_s17  ;;  %v3517_v19 = vcombine.high %v3515_v16, %v3515_v16 }
 0x258   : > { %5391 = vrot.lane.b32.xlu1 %v5328_v50, %s7596_s26  ;;  %4634 = vst.msk [vmem:[#allocation3 + $0x18] sm:$0xf] %vm9251_vm14, %v4626_v11  ;;  %v6815_v20 = vrot.slane %v3516_v8, 9  ;;  %v6816_v24 = vrot.slane %v3515_v16, 9  ;;  %v3860_v56 = vmax.f32 %v3508_v12, %v6814_v14  ;;  %v3859_v27 = vmax.f32 %v3500_v53, %v6813_v9  ;;  %v5177_v53 = vpop.permute.xlu1 %5176  ;;  %v5265_v62 = vld [vmem:[#allocation4 + $0x30] sm:$0xf] }
 0x259   : > { %v3956_v23 = vadd.f32 %v8441_v58, %v3857_v2  ;;  %v3957_v31 = vadd.f32 %v8430_v45, %v3858_v17  ;;  %v4019_v33 = vmax.f32 %v3955_v1, 0.0  ;;  %v6817_v35 = vrot.slane %v3517_v19, 9 }
 0x25a   : > { %v3861_v37 = vmax.f32 %v3516_v8, %v6815_v20  ;;  %v3862_v42 = vmax.f32 %v3515_v16, %v6816_v24  ;;  %v3959_v43 = vadd.f32 %v8425_v40, %v3860_v56  ;;  %v3958_v48 = vadd.f32 %v8444_v59, %v3859_v27  ;;  %v8829_v8 = vpop.permute.xlu0 %5482  ;;  %v4611_v27 = vld [vmem:[#allocation4 + $0x3c] sm:$0x1] }
 0x25b   : > { %v4020_v63 = vmax.f32 %v3956_v23, 0.0  ;;  %v4021_v18 = vmax.f32 %v3957_v31, 0.0  ;;  %v7003_v49 = vpack.c.bf16 %v4019_v33, %v4019_v33  ;;  %4879 = vrot.lane.b32.xlu0 %v4862_v15, %s7597_s27  ;;  %v3863_v50 = vmax.f32 %v3517_v19, %v6817_v35  ;;  %v4959_v19 = vld [vmem:[#allocation4 + $0x30] sm:$0xf] }
 0x25c   : > { %4777 = vrot.lane.b32.xlu1 %v4738_v54, %s7595_s25  ;;  %v3960_v55 = vadd.f32 %v8448_v61, %v3861_v37  ;;  %v3961_v57 = vadd.f32 %v8435_v52, %v3862_v42  ;;  %v4023_v51 = vmax.f32 %v3959_v43, 0.0  ;;  %v4022_v3 = vmax.f32 %v3958_v48, 0.0  ;;  %v4648_v48 = vld [vmem:[#allocation4 + $0x30] sm:$0xf] }
 0x25d   : > { %v7004_v60 = vpack.c.bf16 %v4020_v63, %v4020_v63  ;;  %v7005_v12 = vpack.c.bf16 %v4021_v18, %v4021_v18  ;;  %v4411_v32 = vunpack.c.l.b16 %v7003_v49  ;;  %v3962_v10 = vadd.f32 %v8452_v7, %v3863_v50 }
 0x25e   : > { %v4024_v4 = vmax.f32 %v3960_v55, 0.0  ;;  %v4025_v0 = vmax.f32 %v3961_v57, 0.0  ;;  %v7007_v16 = vpack.c.bf16 %v4023_v51, %v4023_v51  ;;  %v7006_v54 = vpack.c.bf16 %v4022_v3, %v4022_v3 }
 0x25f   : > { %v4412_v14 = vunpack.c.l.b16 %v7004_v60  ;;  %v4413_v15 = vunpack.c.l.b16 %v7005_v12  ;;  %v4511_v11 = vrot.slane %v4411_v32, 7  ;;  %v4026_v9 = vmax.f32 %v3962_v10, 0.0 }
 0x260   : > { %v7008_v2 = vpack.c.bf16 %v4024_v4, %v4024_v4  ;;  %v7009_v17 = vpack.c.bf16 %v4025_v0, %v4025_v0  ;;  %v4415_v1 = vunpack.c.l.b16 %v7007_v16  ;;  %vm5409_vm14 = vcmask 257248  }
 0x261   : > { %v4414_v20 = vunpack.c.l.b16 %v7006_v54  ;;  %v4512_v24 = vrot.slane %v4412_v14, 6  ;;  %v4514_v56 = vrot.slane %v4413_v15, 5  ;;  %v5165_v23 = vsel %vm8347_vm13, %v6912_v13, %v5164_v38  ;;  %v4608_v14 = vld [vmem:[#allocation4 + $0x38] sm:$0xf] }
 0x262   : > { %v4416_v31 = vunpack.c.l.b16 %v7008_v2  ;;  %v4417_v33 = vunpack.c.l.b16 %v7009_v17  ;;  %v4518_v35 = vrot.slane %v4415_v1, 3  ;;  %v7025_v37 = vpack.c.bf16 %v4026_v9, %v4026_v9  ;;  %5184 = vrot.lane.b32.xlu1 %v5165_v23, %s7599_s16  ;;  %v4960_v17 = vld [vmem:[#allocation4 + $0x34] sm:$0x1] }
 0x263   : > { %v4513_v63 = vsel %vm4429_vm3, %v4512_v24, %v4511_v11  ;;  %v4516_v18 = vrot.slane %v4414_v20, 4  ;;  %v5469_v41 = vsel %vm8347_vm13, %v6919_v6, %v5468_v47  ;;  %v5036_v38 = vshrl.u32 %v4959_v19, 16  ;;  %v4649_v1 = vld [vmem:[#allocation4 + $0x34] sm:$0x1] }
 0x264   : > { %v5227_v42 = vpop.permute.xlu1 %5226  ;;  %v4515_v13 = vsel %vm4432_vm5, %v4514_v56, %v4513_v63  ;;  %v4520_v49 = vrot.slane %v4416_v31, 2  ;;  %v4522_v50 = vrot.slane %v4417_v33, 1  ;;  %v4612_v55 = vsel %vm8301_vm11, %v7025_v37, %v4611_v27  ;;  %5490 = vrot.lane.b32.xlu0 %v5469_v41, %s7601_s23 }
 0x265   : > { %v4921_v43 = vpop.permute.xlu0 %4920  ;;  %v4517_v57 = vsel %vm4435_vm7, %v4516_v18, %v4515_v13  ;;  %4613 = vst [vmem:[#allocation4 + $0x3c] sm:$0x1] %v4612_v55  ;;  %v5038_v26 = vrot.slane %v5036_v38, 4  ;;  %v5039_v51 = vshll.u32 %v4959_v19, 16  ;;  %v4740_v46 = vshrl.u32 %v4648_v48, 16 }
 0x266   : > { %v4519_v3 = vsel %vm4438_vm8, %v4518_v35, %v4517_v57  ;;  %v4743_v60 = vshll.u32 %v4648_v48, 16  ;;  %v5330_v12 = vshrl.u32 %v5265_v62, 16  ;;  %v5333_v32 = vshll.u32 %v5265_v62, 16  ;;  %v5266_v19 = vld [vmem:[#allocation4 + $0x34] sm:$0x1] }
 0x267   : > { %v4521_v10 = vsel %vm9223_vm9, %v4520_v49, %v4519_v3  ;;  %v5041_v4 = vrot.slane %v5039_v51, 5  ;;  %v4742_v0 = vrot.slane %v4740_v46, 4  ;;  %v5578_v16 = vsel %vm5576_vm2, %v8787_v39, 0 }
 0x268   : > { %v5080_v47 = vpop.permute.xlu1 %5079  ;;  %v4523_v54 = vsel %vm4444_vm10, %v4522_v50, %v4521_v10  ;;  %v4745_v15 = vrot.slane %v4743_v60, 5  ;;  %v5332_v11 = vrot.slane %v5330_v12, 4  ;;  %v5335_v9 = vrot.slane %v5333_v32, 5  ;;  %7115 = vmatpush3.bf16.msra.mxu1 %v5578_v16  ;;  %v7108_v31 = vpop.f32.mrb[28].mxu0 }
 0x269   : > { %v4772_v6 = vpop.permute.xlu0 %4771  ;;  %5103 = vst.msk [vmem:[#allocation3 + $0x4] sm:$0xf] %vm9225_vm0, %v5080_v47  ;;  %v4549_v2 = vpack.c.b16 %v4523_v54, %v4523_v54  ;;  %vm9252_vm9 = vcmask 126048   ;;  %vm9253_vm0 = vcmask 224448   ;;  %v5045_v56 = vshll.u32 %v4960_v17, 16  ;;  %v3233_v37 = vpop.f32.mrb[29].mxu0 }
 0x26a   : > { %4794 = vst.msk [vmem:[#allocation3 + $0x8] sm:$0xf] %vm9224_vm4, %v4772_v6  ;;  %vm5506_vm4 = vcmask 290048   ;;  %v4746_v20 = vor.u32 %v4745_v15, %v4742_v0  ;;  %v5336_v24 = vor.u32 %v5335_v9, %v5332_v11  ;;  %v4749_v27 = vshll.u32 %v4649_v1, 16  ;;  %v7109_v41 = vpop.f32.mrb[30].mxu0 }
 0x26b   : > { %5200 = vst.msk [vmem:[#allocation3 + $0x4] sm:$0xf] %vm5198_vm12, %v5177_v53  ;;  %v4609_v53 = vsel %vm8479_vm15, %v4549_v2, %v4608_v14  ;;  %v5339_v23 = vshll.u32 %v5266_v19, 16  ;;  %v3262_v18 = vmax.f32 %v3233_v37, %v7108_v31  ;;  %v5047_v38 = vrot.slane %v5045_v56, 5  ;;  %v3236_v62 = vpop.f32.mrb[31].mxu0 }
 0x26c   : > { %4894 = vst.msk [vmem:[#allocation3 + $0x8] sm:$0xf] %vm4891_vm6, %v8818_v5  ;;  %v5042_v5 = vor.u32 %v5041_v4, %v5038_v26  ;;  %4610 = vst [vmem:[#allocation4 + $0x38] sm:$0xf] %v4609_v53  ;;  %v4815_v33 = vld [vmem:[#allocation4 + $0x3c] sm:$0x1]  ;;  %v3263_v26 = vmax.f32 %v3236_v62, %v7109_v41 }
 0x26d   : > { %4943 = vst.msk [vmem:[#allocation3 + $0x8] sm:$0xf] %vm9252_vm9, %v4921_v43  ;;  %v5386_v39 = vpop.permute.xlu0 %5385  ;;  %v8867_v35 = vld [vmem:[#allocation4 + $0x3c] sm:$0x1]  ;;  %v4747_v43 = vrot.slane %v4746_v20, 4  ;;  %v8869_v48 = vrot.slane %v5336_v24, 4  ;;  %v3518_v55 = vcombine.high %v3262_v18, %v3262_v18  ;;  %v3525_v57 = vrot.slane %v3262_v18, %v8417_v34 }
 0x26e   : > { %5250 = vst.msk [vmem:[#allocation3 + $0x4] sm:$0xf] %vm9253_vm0, %v5227_v42  ;;  %v5043_v42 = vrot.slane %v5042_v5, 4  ;;  %v8871_v63 = vld [vmem:[#allocation4 + $0x3c] sm:$0x1]  ;;  %v4751_v13 = vrot.slane %v4749_v27, 5  ;;  %v3535_v0 = vcombine.high %v3263_v26, %v3263_v26  ;;  %v3542_v14 = vrot.slane %v3263_v26, %v8417_v34 }
 0x26f   : > { %5410 = vst.msk [vmem:[#allocation3] sm:$0xf] %vm5409_vm14, %v5386_v39  ;;  %v4865_v49 = vrot.slane %v4815_v33, 5  ;;  %v5168_v50 = vrot.slane %v8867_v35, 5  ;;  %v5472_v51 = vrot.slane %v8871_v63, 5  ;;  %v3532_v32 = vrot.slane %v3518_v55, %v8417_v34 }
 0x270   : > { %5507 = vst.msk [vmem:[#allocation3] sm:$0xf] %vm5506_vm4, %v8829_v8  ;;  %v5341_v8 = vrot.slane %v5339_v23, 5  ;;  %v5048_v47 = vsel %vm8341_vm1, %v5043_v42, %v5047_v38  ;;  %v4752_v6 = vsel %vm8341_vm1, %v4747_v43, %v4751_v13  ;;  %v3533_v10 = vcombine.high %v3525_v57, %v3525_v57 }
 0x271   : > { %v6818_v4 = vrot.slane %v3525_v57, 9  ;;  %v3534_v2 = vcombine.high %v3532_v32, %v3532_v32  ;;  %v6820_v39 = vrot.slane %v3532_v32, 9  ;;  %v3549_v19 = vrot.slane %v3535_v0, %v8417_v34 }
 0x272   : > { %v5342_v60 = vsel %vm8341_vm1, %v8869_v48, %v5341_v8  ;;  %v6819_v17 = vrot.slane %v3533_v10, 9  ;;  %v3550_v53 = vcombine.high %v3542_v14, %v3542_v14  ;;  %v6822_v5 = vrot.slane %v3542_v14, 9  ;;  %v8897_v33 = vpop.permute.xlu1 %4873 }
 0x273   : > { %v5213_v46 = vld [vmem:[#allocation4 + $0x38] sm:$0xf]  ;;  %v3864_v1 = vmax.f32 %v3525_v57, %v6818_v4  ;;  %v6821_v56 = vrot.slane %v3534_v2, 9  ;;  %v3866_v23 = vmax.f32 %v3532_v32, %v6820_v39  ;;  %vm9254_vm9 = vcmask 27648  }
 0x274   : > { %v4906_v3 = vld [vmem:[#allocation4 + $0x38] sm:$0xf]  ;;  %5234 = vrot.lane.b32.xlu1 %v5213_v46, %s7592_s21  ;;  %v3865_v27 = vmax.f32 %v3533_v10, %v6819_v17  ;;  %v3551_v37 = vcombine.high %v3549_v19, %v3549_v19  ;;  %v6823_v42 = vrot.slane %v3550_v53, 9  ;;  %v6824_v43 = vrot.slane %v3549_v19, 9 }
 0x275   : > { %v4814_v12 = vld [vmem:[#allocation4 + $0x38] sm:$0xe]  ;;  %4928 = vrot.lane.b32.xlu0 %v4906_v3, %s7589_s14  ;;  %v3963_v31 = vadd.f32 %v8421_v36, %v3864_v1  ;;  %v3868_v48 = vmax.f32 %v3542_v14, %v6822_v5  ;;  %v3867_v18 = vmax.f32 %v3534_v2, %v6821_v56  ;;  %v3965_v38 = vadd.f32 %v8430_v45, %v3866_v23 }
 0x276   : > { %v8886_v16 = vld [vmem:[#allocation4 + $0x38] sm:$0xe]  ;;  %v6906_v15 = vrot.slane %v4814_v12, 9  ;;  %v3964_v41 = vadd.f32 %v8441_v58, %v3865_v27  ;;  %v6825_v13 = vrot.slane %v3551_v37, 9  ;;  %v3869_v36 = vmax.f32 %v3550_v53, %v6823_v42  ;;  %v8910_v4 = vpop.permute.xlu1 %5484 }
 0x277   : > { %v8888_v54 = vld [vmem:[#allocation4 + $0x38] sm:$0xe]  ;;  %v6913_v11 = vrot.slane %v8886_v16, 9  ;;  %v4027_v62 = vmax.f32 %v3963_v31, 0.0  ;;  %v3870_v8 = vmax.f32 %v3549_v19, %v6824_v43  ;;  %v3966_v55 = vadd.f32 %v8444_v59, %v3867_v18 }
 0x278   : > { %v6920_v9 = vrot.slane %v8888_v54, 9  ;;  %v4866_v20 = vsel %vm8347_vm13, %v6906_v15, %v4865_v49  ;;  %v4627_v24 = vld [vmem:[#allocation4 + $0x38] sm:$0xf]  ;;  %5087 = vrot.lane.b32.xlu1 %v5048_v47, %s7600_s17  ;;  %v3967_v49 = vadd.f32 %v8425_v40, %v3868_v48  ;;  %v4028_v57 = vmax.f32 %v3964_v41, 0.0  ;;  %v5179_v40 = vpop.permute.xlu0 %5178 }
 0x279   : > { %4779 = vrot.lane.b32.xlu0 %v4752_v6, %s7595_s25  ;;  %4635 = vst.msk [vmem:[#allocation3 + $0x1c] sm:$0xf] %vm9254_vm9, %v4627_v24  ;;  %v4029_v26 = vmax.f32 %v3965_v38, 0.0  ;;  %v7011_v46 = vpack.c.bf16 %v4027_v62, %v4027_v62  ;;  %v3871_v3 = vmax.f32 %v3551_v37, %v6825_v13  ;;  %v3968_v58 = vadd.f32 %v8448_v61, %v3869_v36  ;;  %v4617_v24 = vld [vmem:[#allocation4 + $0x44] sm:$0x1]  ;;  %vm9264_vm9 = vmmov %vm9253_vm0 }
 0x27a   : > { %v3969_v45 = vadd.f32 %v8435_v52, %v3870_v8  ;;  %v4031_v47 = vmax.f32 %v3967_v49, 0.0  ;;  %v4030_v6 = vmax.f32 %v3966_v55, 0.0  ;;  %v7012_v12 = vpack.c.bf16 %v4028_v57, %v4028_v57  ;;  %v4961_v42 = vld [vmem:[#allocation4 + $0x38] sm:$0xf]  ;;  %v4614_v55 = vld [vmem:[#allocation4 + $0x40] sm:$0xf] }
 0x27b   : > { %v7013_v32 = vpack.c.bf16 %v4029_v26, %v4029_v26  ;;  %v4419_v10 = vunpack.c.l.b16 %v7011_v46  ;;  %v3970_v59 = vadd.f32 %v8452_v7, %v3871_v3  ;;  %v4032_v0 = vmax.f32 %v3968_v58, 0.0  ;;  %v4650_v16 = vld [vmem:[#allocation4 + $0x38] sm:$0xf] }
 0x27c   : > { %4881 = vrot.lane.b32.xlu1 %v4866_v20, %s7597_s27  ;;  %v4033_v14 = vmax.f32 %v3969_v45, 0.0  ;;  %v7014_v15 = vpack.c.bf16 %v4030_v6, %v4030_v6  ;;  %v4420_v2 = vunpack.c.l.b16 %v7012_v12  ;;  %v5169_v7 = vsel %vm8347_vm13, %v6913_v11, %v5168_v50  ;;  %v5267_v57 = vld [vmem:[#allocation4 + $0x38] sm:$0xf] }
 0x27d   : > { %5393 = vrot.lane.b32.xlu0 %v5342_v60, %s7596_s26  ;;  %v7015_v60 = vpack.c.bf16 %v4031_v47, %v4031_v47  ;;  %v4421_v17 = vunpack.c.l.b16 %v7013_v32  ;;  %v4524_v39 = vrot.slane %v4419_v10, 7  ;;  %v4034_v61 = vmax.f32 %v3970_v59, 0.0  ;;  %v4962_v10 = vld [vmem:[#allocation4 + $0x3c] sm:$0x1] }
 0x27e   : > { %v7016_v1 = vpack.c.bf16 %v4032_v0, %v4032_v0  ;;  %v7017_v52 = vpack.c.bf16 %v4033_v14, %v4033_v14  ;;  %v4422_v53 = vunpack.c.l.b16 %v7014_v15  ;;  %v4525_v5 = vrot.slane %v4420_v2, 6 }
 0x27f   : > { %v4423_v19 = vunpack.c.l.b16 %v7015_v60  ;;  %v4527_v20 = vrot.slane %v4421_v17, 5  ;;  %v7026_v37 = vpack.c.bf16 %v4034_v61, %v4034_v61  ;;  %v5473_v35 = vsel %vm8347_vm13, %v6920_v9, %v5472_v51  ;;  %v5268_v17 = vld [vmem:[#allocation4 + $0x3c] sm:$0x1] }
 0x280   : > { %v4424_v23 = vunpack.c.l.b16 %v7016_v1  ;;  %v4425_v31 = vunpack.c.l.b16 %v7017_v52  ;;  %v4526_v43 = vsel %vm4429_vm3, %v4525_v5, %v4524_v39  ;;  %v4529_v48 = vrot.slane %v4422_v53, 4  ;;  %5492 = vrot.lane.b32.xlu1 %v5473_v35, %s7601_s23 }
 0x281   : > { %5186 = vrot.lane.b32.xlu0 %v5169_v7, %s7599_s16  ;;  %v4528_v50 = vsel %vm4432_vm5, %v4527_v20, %v4526_v43  ;;  %v4531_v11 = vrot.slane %v4423_v19, 3  ;;  %v4618_v18 = vsel %vm8301_vm11, %v7026_v37, %v4617_v24  ;;  %v5050_v13 = vshrl.u32 %v4961_v42, 16 }
 0x282   : > { %v4530_v41 = vsel %vm4435_vm7, %v4529_v48, %v4528_v50  ;;  %v4533_v38 = vrot.slane %v4424_v23, 2  ;;  %4619 = vst [vmem:[#allocation4 + $0x44] sm:$0x1] %v4618_v18  ;;  %v5053_v54 = vshll.u32 %v4961_v42, 16  ;;  %v4535_v51 = vrot.slane %v4425_v31, 1  ;;  %vm9258_vm7 = vmmov %vm9253_vm0 }
 0x283   : > { %v4532_v36 = vsel %vm4438_vm8, %v4531_v11, %v4530_v41  ;;  %vm9255_vm3 = vcmask 158848   ;;  %vm9256_vm5 = vcmask 60448   ;;  %v4754_v9 = vshrl.u32 %v4650_v16, 16 }
 0x284   : > { %v5229_v56 = vpop.permute.xlu0 %5228  ;;  %v4757_v44 = vshll.u32 %v4650_v16, 16  ;;  %vm9257_vm11 = vcmask 1046534   ;;  %vm9259_vm8 = vcmask 126048   ;;  %v5052_v3 = vrot.slane %v5050_v13, 4  ;;  %vm9263_vm2 = vmmov %vm9255_vm3 }
 0x285   : > { %v4923_v27 = vpop.permute.xlu1 %4922  ;;  %v4534_v8 = vsel %vm9257_vm11, %v4533_v38, %v4532_v36  ;;  %v5055_v58 = vrot.slane %v5053_v54, 5  ;;  %v4756_v45 = vrot.slane %v4754_v9, 4  ;;  %v5347_v12 = vshll.u32 %v5267_v57, 16  ;;  %vm9267_vm11 = vmmov %vm9263_vm2 }
 0x286   : > { %v4536_v49 = vsel %vm4444_vm10, %v4535_v51, %v4534_v8  ;;  %v4759_v47 = vrot.slane %v4757_v44, 5  ;;  %v5059_v15 = vshll.u32 %v4962_v10, 16  ;;  %vm5563_vm10 = vcmask 293888  }
 0x287   : > { %v4551_v26 = vpack.c.b16 %v4536_v49, %v4536_v49  ;;  %v5056_v32 = vor.u32 %v5055_v58, %v5052_v3  ;;  %v5349_v14 = vrot.slane %v5347_v12, 5  ;;  %v5353_v7 = vshll.u32 %v5268_v17, 16 }
 0x288   : > { %v5082_v62 = vpop.permute.xlu0 %5081  ;;  %v4760_v59 = vor.u32 %v4759_v47, %v4756_v45  ;;  %v5061_v20 = vrot.slane %v5059_v15, 5  ;;  %v5432_v45 = vld [vmem:[#allocation4 + $0x48] sm:$0xe]  ;;  %v5433_v47 = vld [vmem:[#allocation4 + $0x4c] sm:$0x1] }
 0x289   : > { %v4774_v63 = vpop.permute.xlu1 %4773  ;;  %5104 = vst.msk [vmem:[#allocation3 + $0x8] sm:$0xf] %vm9255_vm3, %v5082_v62  ;;  %v4615_v6 = vsel %vm8479_vm15, %v4551_v26, %v4614_v55  ;;  %v5057_v60 = vrot.slane %v5056_v32, 4  ;;  %v5270_v61 = vld [vmem:[#allocation4 + $0x44] sm:$0x1]  ;;  %v5355_v38 = vrot.slane %v5353_v7, 5  ;;  %vm9260_vm15 = vmmov %vm9255_vm3 }
 0x28a   : > { %4795 = vst.msk [vmem:[#allocation3 + $0xc] sm:$0xf] %vm9256_vm5, %v4774_v63  ;;  %4616 = vst [vmem:[#allocation4 + $0x40] sm:$0xf] %v4615_v6  ;;  %v4761_v39 = vrot.slane %v4760_v59, 4  ;;  %v6922_v10 = vrot.slane %v5432_v45, 9 }
 0x28b   : > { %5201 = vst.msk [vmem:[#allocation3 + $0x8] sm:$0xf] %vm5198_vm12, %v5179_v40  ;;  %v4651_v40 = vld [vmem:[#allocation4 + $0x3c] sm:$0x1]  ;;  %v5062_v48 = vsel %vm8341_vm1, %v5057_v60, %v5061_v20  ;;  %v5125_v54 = vld [vmem:[#allocation4 + $0x44] sm:$0x1] }
 0x28c   : > { %4895 = vst.msk [vmem:[#allocation3 + $0xc] sm:$0xf] %vm4891_vm6, %v8897_v33  ;;  %v5344_v33 = vshrl.u32 %v5267_v57, 16  ;;  %v4763_v2 = vshll.u32 %v4651_v40, 16  ;;  %v4964_v36 = vld [vmem:[#allocation4 + $0x44] sm:$0x1] }
 0x28d   : > { %5251 = vst.msk [vmem:[#allocation3 + $0x8] sm:$0xf] %vm9258_vm7, %v5229_v56  ;;  %v5388_v46 = vpop.permute.xlu1 %5387  ;;  %v5367_v56 = vshll.u32 %v5270_v61, 16  ;;  %v5431_v44 = vld [vmem:[#allocation4 + $0x44] sm:$0x1]  ;;  %v5073_v3 = vshll.u32 %v4964_v36, 16 }
 0x28e   : > { %4944 = vst.msk [vmem:[#allocation3 + $0xc] sm:$0xf] %vm9259_vm8, %v4923_v27  ;;  %v5346_v0 = vrot.slane %v5344_v33, 4  ;;  %v4765_v24 = vrot.slane %v4763_v2, 5  ;;  %v5476_v58 = vrot.slane %v5431_v44, 5  ;;  %v5480_v40 = vrot.slane %v5433_v47, 5 }
 0x28f   : > { %5411 = vst.msk [vmem:[#allocation3 + $0x4] sm:$0xf] %vm5409_vm14, %v5388_v46  ;;  %v5369_v13 = vrot.slane %v5367_v56, 5  ;;  %v5172_v46 = vrot.slane %v5125_v54, 5  ;;  %v5075_v32 = vrot.slane %v5073_v3, 5  ;;  %v9031_v3 = vsub.s32 0, %v8409_v30 }
 0x290   : > { %5508 = vst.msk [vmem:[#allocation3 + $0x4] sm:$0xf] %vm5506_vm4, %v8910_v4  ;;  %v5350_v4 = vor.u32 %v5349_v14, %v5346_v0  ;;  %v4766_v35 = vsel %vm8341_vm1, %v4761_v39, %v4765_v24  ;;  %v5481_v60 = vsel %vm8347_vm13, %v6922_v10, %v5480_v40  ;;  %v6950_v54 = vld [vmem:[%s9212_s4] ss:$0 sm:$0xff] }
 0x291   : > { %v5214_v1 = vld [vmem:[#allocation4 + $0x40] sm:$0xf]  ;;  %v9022_v36 = vrot.slane %v6950_v54, %v8417_v34 }
 0x292   : > { %v4907_v52 = vld [vmem:[#allocation4 + $0x40] sm:$0xf]  ;;  %5236 = vrot.lane.b32.xlu0 %v5214_v1, %s7592_s21  ;;  %v5487_v43 = vpop.permute.xlu0 %5486  ;;  %v5351_v16 = vrot.slane %v5350_v4, 4 }
 0x293   : > { %v5269_v19 = vld [vmem:[#allocation4 + $0x40] sm:$0xf]  ;;  %4930 = vrot.lane.b32.xlu1 %v4907_v52, %s7589_s14  ;;  %s7603_s14 = smov 48  }
 0x294   : > { %v5358_v53 = vshrl.u32 %v5269_v19, 16  ;;  %v5361_v5 = vshll.u32 %v5269_v19, 16  ;;  %v4963_v27 = vld [vmem:[#allocation4 + $0x40] sm:$0xf]  ;;  %v5356_v51 = vsel %vm8341_vm1, %v5351_v16, %v5355_v38 }
 0x295   : > { %v5064_v37 = vshrl.u32 %v4963_v27, 16  ;;  %v5067_v42 = vshll.u32 %v4963_v27, 16  ;;  %v5124_v11 = vld [vmem:[#allocation4 + $0x40] sm:$0xe] }
 0x296   : > { %v5360_v23 = vrot.slane %v5358_v53, 4  ;;  %v5363_v31 = vrot.slane %v5361_v5, 5  ;;  %5089 = vrot.lane.b32.xlu0 %v5062_v48, %s7600_s17  ;;  %v5430_v62 = vld [vmem:[#allocation4 + $0x40] sm:$0xe]  ;;  %v6914_v9 = vrot.slane %v5124_v11, 9  ;;  %v5181_v57 = vpop.permute.xlu1 %5180  ;;  %v4876_v26 = vpop.permute.xlu0 %4875 }
 0x297   : > { %v7514_v22 = vld [vmem:[#allocation3] sm:$0xff]   ;;  %4781 = vrot.lane.b32.xlu1 %v4766_v35, %s7595_s25  ;;  %v5066_v18 = vrot.slane %v5064_v37, 4  ;;  %v5069_v41 = vrot.slane %v5067_v42, 5  ;;  %v6921_v55 = vrot.slane %v5430_v62, 9  ;;  %s6952_s25 = sshll.u32 %s7688_s13, 4  ;;  %s7616_s13 = smov [#allocation6]  }
 0x298   : > { %7116 = vmatprep.mubr.msk.bf16.mxu1 %vm5563_vm10, %v7514_v22  ;;  %v5364_v50 = vor.u32 %v5363_v31, %v5360_v23  ;;  %v5173_v6 = vsel %vm8347_vm13, %v6914_v9, %v5172_v46  ;;  %s9166_s24 = scalar_lea.hbm %s9217_s9, %s6952_s25 }
 0x299   : > { %v5070_v8 = vor.u32 %v5069_v41, %v5066_v18  ;;  %v5477_v12 = vsel %vm8347_vm13, %v6921_v55, %v5476_v58  ;;  %vm9262_vm13 = vmmov %vm9259_vm8  ;;  %v9034_v58 = vrot.slane %v9022_v36, 1 }
 0x29a   : > { %v5365_v63 = vrot.slane %v5364_v50, 4 }
 0x29b   : > { %5395 = vrot.lane.b32.xlu1 %v5356_v51, %s7596_s26  ;;  %v5071_v33 = vrot.slane %v5070_v8, 4 }
 0x29c   : > { %v5370_v49 = vsel %vm8341_vm1, %v5365_v63, %v5369_v13 }
 0x29d   : > { %5397 = vrot.lane.b32.xlu0 %v5370_v49, %s7596_s26  ;;  %v5076_v14 = vsel %vm8341_vm1, %v5071_v33, %v5075_v32  ;;  %vm9261_vm1 = vmmov %vm9256_vm5  ;;  %s7602_s26 = smov 40  }
 0x29e   : > { %vm9265_vm3 = vmmov %vm9261_vm1 }
 0x29f   : > { %5188 = vrot.lane.b32.xlu1 %v5173_v6, %s7599_s16  ;;  %vm9266_vm5 = vmmov %vm9259_vm8  ;;  %s7611_s16 = smov 72  }
 0x2a0   : > { %vm9268_vm7 = vmmov %vm9261_vm1 }
 0x2a1   : > { %5494 = vrot.lane.b32.xlu0 %v5477_v12, %s7601_s23  ;;  %vm9269_vm8 = vmmov %vm9253_vm0 }
 0x2a3   : > { %5091 = vrot.lane.b32.xlu1 %v5076_v14, %s7600_s17 }
 0x2a4   : > { %v5231_v59 = vpop.permute.xlu1 %5230 }
 0x2a5   : > { %v4925_v0 = vpop.permute.xlu0 %4924 }
 0x2a7   : > { %5496 = vrot.lane.b32.xlu1 %v5481_v60, %s7601_s23 }
 0x2a8   : > { %v5084_v15 = vpop.permute.xlu1 %5083 }
 0x2a9   : > { %v5390_v2 = vpop.permute.xlu0 %5389  ;;  %5105 = vst.msk [vmem:[#allocation3 + $0xc] sm:$0xf] %vm9260_vm15, %v5084_v15  ;;  %vm9270_vm15 = vmmov %vm9266_vm5 }
 0x2aa   : > { %5412 = vst.msk [vmem:[#allocation3 + $0x8] sm:$0xf] %vm5409_vm14, %v5390_v2 }
 0x2ab   : > { %5202 = vst.msk [vmem:[#allocation3 + $0xc] sm:$0xf] %vm5198_vm12, %v5181_v57 }
 0x2ac   : > { %5509 = vst.msk [vmem:[#allocation3 + $0x8] sm:$0xf] %vm5506_vm4, %v5487_v43  ;;  %v5489_v29 = vpop.permute.xlu1 %5488 }
 0x2ad   : > { %5252 = vst.msk [vmem:[#allocation3 + $0xc] sm:$0xf] %vm9253_vm0, %v5231_v59  ;;  %v4776_v21 = vpop.permute.xlu0 %4775  ;;  %vm9271_vm0 = vmmov %vm9263_vm2 }
 0x2ae   : > { %4796 = vst.msk [vmem:[#allocation3 + $0x10] sm:$0xf] %vm9261_vm1, %v4776_v21 }
 0x2af   : > { %4896 = vst.msk [vmem:[#allocation3 + $0x10] sm:$0xf] %vm4891_vm6, %v4876_v26 }
 0x2b0   : > { %4945 = vst.msk [vmem:[#allocation3 + $0x10] sm:$0xf] %vm9262_vm13, %v4925_v0  ;;  %v4878_v39 = vpop.permute.xlu1 %4877  ;;  %vm9272_vm13 = vmmov %vm9269_vm8 }
 0x2b1   : > { %v5183_v17 = vpop.permute.xlu0 %5182 }
 0x2c5   : > { %v5233_v22 = vpop.permute.xlu0 %5232 }
 0x2c6   : > { %v4927_v61 = vpop.permute.xlu1 %4926 }
 0x2c9   : > { %v5086_v1 = vpop.permute.xlu0 %5085 }
 0x2ca   : > { %v5392_v52 = vpop.permute.xlu1 %5391  ;;  %5106 = vst.msk [vmem:[#allocation3 + $0x10] sm:$0xf] %vm9263_vm2, %v5086_v1  ;;  %vm9273_vm2 = vmmov %vm9266_vm5 }
 0x2cb   : > { %5413 = vst.msk [vmem:[#allocation3 + $0xc] sm:$0xf] %vm5409_vm14, %v5392_v52 }
 0x2cc   : > { %5203 = vst.msk [vmem:[#allocation3 + $0x10] sm:$0xf] %vm5198_vm12, %v5183_v17 }
 0x2cd   : > { %5510 = vst.msk [vmem:[#allocation3 + $0xc] sm:$0xf] %vm5506_vm4, %v5489_v29  ;;  %v4880_v53 = vpop.permute.xlu0 %4879 }
 0x2ce   : > { %5253 = vst.msk [vmem:[#allocation3 + $0x10] sm:$0xf] %vm9264_vm9, %v5233_v22  ;;  %v4778_v4 = vpop.permute.xlu1 %4777  ;;  %vm9274_vm9 = vmmov %vm9271_vm0 }
 0x2cf   : > { %4797 = vst.msk [vmem:[#allocation3 + $0x14] sm:$0xf] %vm9265_vm3, %v4778_v4  ;;  %vm5883_vm3 = vcmask 254144  }
 0x2d0   : > { %4897 = vst.msk [vmem:[#allocation3 + $0x14] sm:$0xf] %vm4891_vm6, %v4878_v39 }
 0x2d1   : > { %4946 = vst.msk [vmem:[#allocation3 + $0x14] sm:$0xf] %vm9266_vm5, %v4927_v61  ;;  %vm5893_vm5 = vcmask 319744  }
 0x2d4   : > { %v7518_v19 = vld [vmem:[#allocation3 + $0x8] sm:$0xff]   ;;  %v5185_v5 = vpop.permute.xlu1 %5184 }
 0x2d5   : > { %7117 = vmatmul.mubr.msk.bf16.vlgmr.msra.gmra.mrb[0].mxu1 %vm5563_vm10, %v7518_v19 }
 0x2d6   : > { %v5491_v20 = vpop.permute.xlu0 %5490 }
 0x2e6   : > { %v5235_v24 = vpop.permute.xlu1 %5234 }
 0x2e7   : > { %v4929_v7 = vpop.permute.xlu0 %4928 }
 0x2ea   : > { %v5088_v56 = vpop.permute.xlu1 %5087 }
 0x2eb   : > { %v4780_v27 = vpop.permute.xlu0 %4779  ;;  %5107 = vst.msk [vmem:[#allocation3 + $0x14] sm:$0xf] %vm9267_vm11, %v5088_v56  ;;  %vm5903_vm11 = vcmask 385344  }
 0x2ec   : > { %4798 = vst.msk [vmem:[#allocation3 + $0x18] sm:$0xf] %vm9268_vm7, %v4780_v27  ;;  %vm5913_vm7 = vcmask 450944  }
 0x2ed   : > { %5204 = vst.msk [vmem:[#allocation3 + $0x14] sm:$0xf] %vm5198_vm12, %v5185_v5 }
 0x2ee   : > { %4898 = vst.msk [vmem:[#allocation3 + $0x18] sm:$0xf] %vm4891_vm6, %v4880_v53  ;;  %v4882_v31 = vpop.permute.xlu1 %4881 }
 0x2ef   : > { %5254 = vst.msk [vmem:[#allocation3 + $0x14] sm:$0xf] %vm9269_vm8, %v5235_v24  ;;  %v5394_v23 = vpop.permute.xlu0 %5393 }
 0x2f0   : > { %4947 = vst.msk [vmem:[#allocation3 + $0x18] sm:$0xf] %vm9270_vm15, %v4929_v7  ;;  %vm5933_vm15 = vcmask 582144  }
 0x2f1   : > { %5414 = vst.msk [vmem:[#allocation3 + $0x10] sm:$0xf] %vm5409_vm14, %v5394_v23 }
 0x2f2   : > { %5511 = vst.msk [vmem:[#allocation3 + $0x10] sm:$0xf] %vm5506_vm4, %v5491_v20  ;;  %v5493_v42 = vpop.permute.xlu1 %5492 }
 0x2f3   : > { %v5187_v37 = vpop.permute.xlu0 %5186 }
 0x304   : > { %v5237_v43 = vpop.permute.xlu0 %5236 }
 0x305   : > { %v4931_v48 = vpop.permute.xlu1 %4930 }
 0x308   : > { %v5090_v35 = vpop.permute.xlu0 %5089 }
 0x309   : > { %v4782_v16 = vpop.permute.xlu1 %4781  ;;  %5108 = vst.msk [vmem:[#allocation3 + $0x18] sm:$0xf] %vm9271_vm0, %v5090_v35  ;;  %vm5943_vm0 = vcmask 647744  }
 0x30a   : > { %4799 = vst.msk [vmem:[#allocation3 + $0x1c] sm:$0xf] %vm9261_vm1, %v4782_v16  ;;  %v6006_v16 = vld [vmem:[%s9213_s5] sm:$0xff]  ;;  %vm5953_vm1 = vcmask 713344  }
 0x30b   : > { %5205 = vst.msk [vmem:[#allocation3 + $0x18] sm:$0xf] %vm5198_vm12, %v5187_v37 }
 0x30c   : > { %4899 = vst.msk [vmem:[#allocation3 + $0x1c] sm:$0xf] %vm4891_vm6, %v4882_v31  ;;  %vm9275_vm6 = vmmov %vm9269_vm8  ;;  %vm5923_vm8 = vcmask 516544  }
 0x30d   : > { %5255 = vst.msk [vmem:[#allocation3 + $0x18] sm:$0xf] %vm9272_vm13, %v5237_v43  ;;  %v5396_v50 = vpop.permute.xlu1 %5395  ;;  %vm5963_vm13 = vcmask 778944  }
 0x30e   : > { %4948 = vst.msk [vmem:[#allocation3 + $0x1c] sm:$0xf] %vm9273_vm2, %v4931_v48  ;;  %vm5973_vm2 = vcmask 844544  }
 0x30f   : > { %5415 = vst.msk [vmem:[#allocation3 + $0x14] sm:$0xf] %vm5409_vm14, %v5396_v50  ;;  %v5398_v11 = vpop.permute.xlu0 %5397  ;;  %v6007_v50 = vld [vmem:[%s9213_s5 + $0x8] sm:$0xff] }
 0x310   : > { %5512 = vst.msk [vmem:[#allocation3 + $0x14] sm:$0xf] %vm5506_vm4, %v5493_v42 }
 0x311   : > { %5416 = vst.msk [vmem:[#allocation3 + $0x18] sm:$0xf] %vm5409_vm14, %v5398_v11  ;;  %v5189_v18 = vpop.permute.xlu1 %5188  ;;  %v6008_v11 = vld [vmem:[%s9213_s5 + $0x10] sm:$0xff] }
 0x313   : > { %v5495_v41 = vpop.permute.xlu0 %5494 }
 0x314   : > { %5513 = vst.msk [vmem:[#allocation3 + $0x18] sm:$0xf] %vm5506_vm4, %v5495_v41 }
 0x315   : > { %v5092_v38 = vpop.permute.xlu1 %5091 }
 0x316   : > { %5109 = vst.msk [vmem:[#allocation3 + $0x1c] sm:$0xf] %vm9274_vm9, %v5092_v38  ;;  %vm5983_vm9 = vcmask 910144  }
 0x317   : > { %v7519_v62 = vld [vmem:[#allocation3 + $0x10] sm:$0xff]   ;;  %5206 = vst.msk [vmem:[#allocation3 + $0x1c] sm:$0xf] %vm5198_vm12, %v5189_v18  ;;  %vm7609_vm12 = vmmov 0  }
 0x318   : > { %5256 = vst.msk [vmem:[#allocation3 + $0x1c] sm:$0xf] %vm9275_vm6, %v8723_v25  ;;  %7120 = vmatprep.mubr.msk.bf16.mxu1 %vm5563_vm10, %v7519_v62  ;;  %v7604_v62 = vmov 0.0|0.0   ;;  %vm5993_vm6 = vcmask 975744  }
 0x319   : > { %5417 = vst.msk [vmem:[#allocation3 + $0x1c] sm:$0xf] %vm5409_vm14, %v8740_v28  ;;  %v5497_v63 = vpop.permute.xlu1 %5496  ;;  %v9026_v28 = vcombine.high %v9022_v36, %v9022_v36  ;;  %7170 = vmatprep.subr.bf16.mxu1 %v7604_v62  ;;  %vm5863_vm14 = vcmask 122944  }
 0x31a   : > { %5514 = vst.msk [vmem:[#allocation3 + $0x1c] sm:$0xf] %vm5506_vm4, %v5497_v63  ;;  %vm5853_vm4 = vcmask 57344   ;;  %v7171_v63 = vpack.c.bf16 %v6007_v50, %v6006_v16 }
 0x31b   : > { %v9038_v33 = vrot.slane %v9026_v28, 1 }
 0x31c   : > { %7172 = vmatpush3.bf16.msra.mxu1 %v7171_v63 }
 0x31d   : > { %7173 = vmatprep.subr.bf16.mxu1 %v7604_v62 }
 0x321   : > { %v7520_v13 = vld [vmem:[#allocation3 + $0x18] sm:$0xff]  }
 0x322   : > { %7121 = vmatmul.mubr.msk.bf16.gmra.mrb[4].mxu1 %vm5563_vm10, %v7520_v13  ;;  %v6009_v13 = vld [vmem:[%s9213_s5 + $0x18] sm:$0xff]  ;;  %vm5873_vm10 = vcmask 188544  }
 0x3a8   : > { %v7118_v51 = vpop.f32.mrb[0].mxu1 }
 0x3a9   : > { %v5614_v25 = vpop.f32.mrb[1].mxu1 }
 0x3aa   : > { %v7119_v9 = vpop.f32.mrb[2].mxu1 }
 0x3ab   : > { %v5646_v44 = vmax.f32 %v7118_v51, %v7119_v9  ;;  %v5617_v8 = vpop.f32.mrb[3].mxu1  ;;  %v7174_v51 = vpack.c.bf16 %v6009_v13, %v6008_v11  ;;  %v6011_v9 = vld [vmem:[%s9213_s5 + $0x28] sm:$0xff] }
 0x3ac   : > { %v5645_v49 = vmax.f32 %v5614_v25, %v5617_v8  ;;  %v6010_v25 = vld [vmem:[%s9213_s5 + $0x20] sm:$0xff] }
 0x3ad   : > { %v5670_v55 = vcombine.high %v5646_v44, %v5646_v44  ;;  %v5677_v57 = vrot.slane %v5646_v44, %v8417_v34  ;;  %7175 = vmatpush3.bf16.msra.mxu1 %v7174_v51 }
 0x3ae   : > { %v5653_v26 = vcombine.high %v5645_v49, %v5645_v49  ;;  %v5660_v46 = vrot.slane %v5645_v49, %v8417_v34  ;;  %v7177_v49 = vpack.c.bf16 %v6011_v9, %v6010_v25  ;;  %7176 = vmatprep.subr.bf16.mxu1 %v7604_v62 }
 0x3af   : > { %v5684_v45 = vrot.slane %v5670_v55, %v8417_v34  ;;  %v5685_v47 = vcombine.high %v5677_v57, %v5677_v57  ;;  %v6938_v6 = vrot.slane %v5677_v57, 9 }
 0x3b0   : > { %v5667_v12 = vrot.slane %v5653_v26, %v8417_v34  ;;  %v5668_v32 = vcombine.high %v5660_v46, %v5660_v46  ;;  %v6934_v10 = vrot.slane %v5660_v46, 9 }
 0x3b1   : > { %v5686_v40 = vcombine.high %v5684_v45, %v5684_v45  ;;  %v6939_v59 = vrot.slane %v5685_v47, 9  ;;  %v6940_v0 = vrot.slane %v5684_v45, 9  ;;  %v5789_v30 = vmax.f32 %v5677_v57, %v6938_v6  ;;  %7178 = vmatpush3.bf16.msra.mxu1 %v7177_v49  ;;  %v6019_v49 = vld [vmem:[%s9213_s5 + $0x68] sm:$0xff] }
 0x3b2   : > { %v5669_v14 = vcombine.high %v5667_v12, %v5667_v12  ;;  %v6935_v60 = vrot.slane %v5668_v32, 9  ;;  %v6936_v15 = vrot.slane %v5667_v12, 9  ;;  %v5785_v2 = vmax.f32 %v5660_v46, %v6934_v10  ;;  %7179 = vmatprep.subr.bf16.mxu1 %v7604_v62  ;;  %v6012_v10 = vld [vmem:[%s9213_s5 + $0x30] sm:$0xff] }
 0x3b3   : > { %v6941_v21 = vrot.slane %v5686_v40, 9  ;;  %v5790_v29 = vmax.f32 %v5685_v47, %v6939_v59  ;;  %v5791_v17 = vmax.f32 %v5684_v45, %v6940_v0  ;;  %v5825_v39 = vadd.f32 %v9022_v36, %v5789_v30 }
 0x3b4   : > { %v6937_v22 = vrot.slane %v5669_v14, 9  ;;  %v5786_v61 = vmax.f32 %v5668_v32, %v6935_v60  ;;  %v5787_v1 = vmax.f32 %v5667_v12, %v6936_v15  ;;  %v5821_v52 = vadd.f32 %v9022_v36, %v5785_v2 }
 0x3b5   : > { %v5792_v4 = vmax.f32 %v5686_v40, %v6941_v21  ;;  %v5841_v19 = vmax.f32 %v5825_v39, 0.0  ;;  %v5826_v53 = vadd.f32 %v9034_v58, %v5790_v29  ;;  %v5827_v5 = vadd.f32 %v9026_v28, %v5791_v17  ;;  %v6013_v40 = vld [vmem:[%s9213_s5 + $0x38] sm:$0xff] }
 0x3b6   : > { %v5822_v20 = vadd.f32 %v9034_v58, %v5786_v61  ;;  %v5837_v24 = vmax.f32 %v5821_v52, 0.0  ;;  %v5823_v23 = vadd.f32 %v9026_v28, %v5787_v1  ;;  %v5788_v31 = vmax.f32 %v5669_v14, %v6937_v22 }
 0x3b7   : > { %v5889_v7 = vrot.slane %v5841_v19, %v9031_v3  ;;  %v5842_v56 = vmax.f32 %v5826_v53, 0.0  ;;  %v5843_v27 = vmax.f32 %v5827_v5, 0.0  ;;  %v5828_v43 = vadd.f32 %v9038_v33, %v5792_v4 }
 0x3b8   : > { %5854 = vst.msk [vmem:[#allocation5] sm:$0x1] %vm5853_vm4, %v5837_v24  ;;  %v5838_v42 = vmax.f32 %v5822_v20, 0.0  ;;  %v5839_v35 = vmax.f32 %v5823_v23, 0.0  ;;  %v5824_v38 = vadd.f32 %v9038_v33, %v5788_v31  ;;  %v7180_v30 = vpack.c.bf16 %v6013_v40, %v6012_v10 }
 0x3b9   : > { %5890 = vrot.lane.b32.xlu1 %v5889_v7, %s7601_s23  ;;  %v5899_v37 = vrot.slane %v5842_v56, %v9031_v3  ;;  %v5909_v48 = vrot.slane %v5843_v27, %v9031_v3  ;;  %v5844_v41 = vmax.f32 %v5828_v43, 0.0  ;;  %v6014_v43 = vld [vmem:[%s9213_s5 + $0x40] sm:$0xff]  ;;  %s7614_s23 = smov 112   ;;  %vm6003_vm4 = vcmask 1041344  }
 0x3ba   : > { %v5859_v18 = vrot.slane %v5838_v42, %v9031_v3  ;;  %v5869_v54 = vrot.slane %v5839_v35, %v9031_v3  ;;  %v5840_v8 = vmax.f32 %v5824_v38, 0.0  ;;  %7181 = vmatpush3.bf16.msra.mxu1 %v7180_v30 }
 0x3bb   : > { %5900 = vrot.lane.b32.xlu0 %v5899_v37, %s7602_s26  ;;  %v5919_v44 = vrot.slane %v5844_v41, %v9031_v3  ;;  %7182 = vmatprep.subr.bf16.mxu1 %v7604_v62  ;;  %s7608_s26 = smov 64  }
 0x3bc   : > { %v5879_v55 = vrot.slane %v5840_v8, %v9031_v3  ;;  %v6018_v8 = vld [vmem:[%s9213_s5 + $0x60] sm:$0xff] }
 0x3bd   : > { %5910 = vrot.lane.b32.xlu1 %v5909_v48, %s7603_s14  ;;  %v6015_v48 = vld [vmem:[%s9213_s5 + $0x48] sm:$0xff]  ;;  %s7615_s14 = smov 120  }
 0x3be   : > { %v7183_v13 = vpack.c.bf16 %v6015_v48, %v6014_v43 }
 0x3bf   : > { %5860 = vrot.lane.b32.xlu0 %v5859_v18, %s7597_s27  ;;  %s7605_s27 = smov 56   ;;  %v6016_v18 = vld [vmem:[%s9213_s5 + $0x50] sm:$0xff] }
 0x3c0   : > { %7184 = vmatpush3.bf16.msra.mxu1 %v7183_v13 }
 0x3c1   : > { %5870 = vrot.lane.b32.xlu1 %v5869_v54, %s7600_s17  ;;  %s7606_s17 = smov 96   ;;  %7185 = vmatprep.subr.bf16.mxu1 %v7604_v62 }
 0x3c3   : > { %5920 = vrot.lane.b32.xlu0 %v5919_v44, %s7605_s27 }
 0x3c7   : > { %5880 = vrot.lane.b32.xlu0 %v5879_v55, %s7592_s21 }
 0x3f5   : > { %v7122_v57 = vpop.f32.mrb[4].mxu1 }
 0x3f6   : > { %v5630_v26 = vpop.f32.mrb[5].mxu1 }
 0x3f7   : > { %v7123_v46 = vpop.f32.mrb[6].mxu1 }
 0x3f8   : > { %v5648_v45 = vmax.f32 %v7122_v57, %v7123_v46  ;;  %v5633_v47 = vpop.f32.mrb[7].mxu1  ;;  %v7189_v46 = vpack.c.bf16 %v6019_v49, %v6018_v8 }
 0x3f9   : > { %v5647_v6 = vmax.f32 %v5630_v26, %v5633_v47  ;;  %v6021_v47 = vld [vmem:[%s9213_s5 + $0x78] sm:$0xff] }
 0x3fa   : > { %v5704_v12 = vcombine.high %v5648_v45, %v5648_v45  ;;  %v5711_v32 = vrot.slane %v5648_v45, %v8417_v34  ;;  %v6020_v45 = vld [vmem:[%s9213_s5 + $0x70] sm:$0xff] }
 0x3fb   : > { %v5687_v59 = vcombine.high %v5647_v6, %v5647_v6  ;;  %v5694_v0 = vrot.slane %v5647_v6, %v8417_v34  ;;  %v7192_v10 = vpack.c.bf16 %v6021_v47, %v6020_v45 }
 0x3fc   : > { %v5718_v14 = vrot.slane %v5704_v12, %v8417_v34  ;;  %v5719_v60 = vcombine.high %v5711_v32, %v5711_v32  ;;  %v6946_v15 = vrot.slane %v5711_v32, 9 }
 0x3fd   : > { %v5701_v2 = vrot.slane %v5687_v59, %v8417_v34  ;;  %v5702_v21 = vcombine.high %v5694_v0, %v5694_v0  ;;  %v6942_v29 = vrot.slane %v5694_v0, 9 }
 0x3fe   : > { %v5720_v17 = vcombine.high %v5718_v14, %v5718_v14  ;;  %v6947_v39 = vrot.slane %v5719_v60, 9  ;;  %v6948_v22 = vrot.slane %v5718_v14, 9  ;;  %v5797_v61 = vmax.f32 %v5711_v32, %v6946_v15 }
 0x3ff   : > { %v5703_v1 = vcombine.high %v5701_v2, %v5701_v2  ;;  %v6943_v52 = vrot.slane %v5702_v21, 9  ;;  %v6944_v4 = vrot.slane %v5701_v2, 9  ;;  %v5793_v19 = vmax.f32 %v5694_v0, %v6942_v29 }
 0x400   : > { %v6949_v53 = vrot.slane %v5720_v17, 9  ;;  %v5798_v5 = vmax.f32 %v5719_v60, %v6947_v39  ;;  %v5833_v20 = vadd.f32 %v9022_v36, %v5797_v61  ;;  %v5799_v31 = vmax.f32 %v5718_v14, %v6948_v22 }
 0x401   : > { %v6945_v24 = vrot.slane %v5703_v1, 9  ;;  %v5794_v7 = vmax.f32 %v5702_v21, %v6943_v52  ;;  %v5795_v34 = vmax.f32 %v5701_v2, %v6944_v4  ;;  %v5829_v56 = vadd.f32 %v9022_v36, %v5793_v19  ;;  %v6094_v52 = vld [vmem:[%s9215_s7] sm:$0xff]  ;;  %v6095_v4 = vld [vmem:[%s9215_s7 + $0x8] sm:$0xff] }
 0x402   : > { %v5849_v27 = vmax.f32 %v5833_v20, 0.0  ;;  %v5834_v23 = vadd.f32 %v9034_v58, %v5798_v5  ;;  %v5800_v11 = vmax.f32 %v5720_v17, %v6949_v53  ;;  %v5835_v25 = vadd.f32 %v9026_v28, %v5799_v31  ;;  %v6096_v5 = vld [vmem:[%s9215_s7 + $0x10] sm:$0xff]  ;;  %v6097_v20 = vld [vmem:[%s9215_s7 + $0x18] sm:$0xff] }
 0x403   : > { %v5796_v37 = vmax.f32 %v5703_v1, %v6945_v24  ;;  %v5830_v42 = vadd.f32 %v9034_v58, %v5794_v7  ;;  %v5845_v50 = vmax.f32 %v5829_v56, 0.0  ;;  %v5831_v36 = vadd.f32 %v9026_v28, %v5795_v34  ;;  %v6017_v58 = vld [vmem:[%s9213_s5 + $0x58] sm:$0xff]  ;;  %v6022_v7 = vld [vmem:[%s9214_s6] sm:$0x1] }
 0x404   : > { %v5969_v35 = vrot.slane %v5849_v27, %v9031_v3  ;;  %v5850_v16 = vmax.f32 %v5834_v23, 0.0  ;;  %v7186_v9 = vpack.c.bf16 %v6017_v58, %v6016_v18  ;;  %v5836_v44 = vadd.f32 %v9038_v33, %v5800_v11 }
 0x405   : > { %v5846_v38 = vmax.f32 %v5830_v42, 0.0  ;;  %v5832_v63 = vadd.f32 %v9038_v33, %v5796_v37  ;;  %v5929_v54 = vrot.slane %v5845_v50, %v9031_v3  ;;  %v5847_v51 = vmax.f32 %v5831_v36, 0.0 }
 0x406   : > { %5970 = vrot.lane.b32.xlu1 %v5969_v35, %s7606_s17  ;;  %v5979_v41 = vrot.slane %v5850_v16, %v9031_v3  ;;  %v7610_v28 = vmov 0.0   ;;  %v5851_v26 = vmax.f32 %v5835_v25, 0.0  ;;  %7187 = vmatpush3.bf16.msra.mxu1 %v7186_v9  ;;  %s7612_s17 = smov 80   ;;  %v5852_v12 = vmax.f32 %v5836_v44, 0.0 }
 0x407   : > { %v5939_v55 = vrot.slane %v5846_v38, %v9031_v3  ;;  %v5848_v57 = vmax.f32 %v5832_v63, 0.0  ;;  %7156 = vmatprep.mubr.msk.f32.mxu1 %vm7609_vm12, %v7610_v28  ;;  %v5949_v33 = vrot.slane %v5847_v51, %v9031_v3  ;;  %7188 = vmatprep.subr.bf16.mxu1 %v7604_v62  ;;  %v7195_v19 = vpack.c.bf16 %v6095_v4, %v6094_v52 }
 0x408   : > { %5980 = vrot.lane.b32.xlu0 %v5979_v41, %s7607_s22  ;;  %s7613_s22 = smov 88   ;;  %v5989_v32 = vrot.slane %v5851_v26, %v9031_v3  ;;  %v5999_v40 = vrot.slane %v5852_v12, %v9031_v3  ;;  %v7198_v24 = vpack.c.bf16 %v6097_v20, %v6096_v5 }
 0x409   : > { %v5959_v6 = vrot.slane %v5848_v57, %v9031_v3 }
 0x40a   : > { %5930 = vrot.lane.b32.xlu1 %v5929_v54, %s7608_s26  ;;  %7190 = vmatpush3.bf16.msra.mxu1 %v7189_v46 }
 0x40b   : > { %7191 = vmatprep.subr.bf16.mxu1 %v7604_v62 }
 0x40c   : > { %5940 = vrot.lane.b32.xlu0 %v5939_v55, %s7611_s16 }
 0x40e   : > { %5950 = vrot.lane.b32.xlu1 %v5949_v33, %s7612_s17  ;;  %7193 = vmatpush3.bf16.msra.mxu1 %v7192_v10 }
 0x40f   : > { %7194 = vmatprep.subr.bf16.mxu1 %v7604_v62 }
 0x410   : > { %5960 = vrot.lane.b32.xlu0 %v5959_v6, %s7613_s22  ;;  %s7525_s22 = sshll.u32 %s7616_s13, 4  ;;  %s7526_s22 = int_to_ptr.vmem [resolvable:$false] %s7525_s22 }
 0x412   : > { %5990 = vrot.lane.b32.xlu1 %v5989_v32, %s7614_s23  ;;  %s323_s23 = sand.u32 1, %s7575_s10  }
 0x413   : > { %s324_s26 = scalar_lea.vmem [#allocation6], %s323_s23  ;;  %s6176_s27 = scalar_lea.sflag [#allocation7], %s323_s23 }
 0x414   : > { %6000 = vrot.lane.b32.xlu0 %v5999_v40, %s7615_s14  ;;  %s6188_s16 = sshll.u32 %s324_s26, 4  ;;  %s7527_s14 = scalar_lea.vmem %s7526_s22, 32  ;;  %s9168_s16 = int_to_ptr.vmem [resolvable:$true] %s6188_s16 }
 0x415   : > { %s7521_s17 = scalar_lea.vmem %s9168_s16, 16  ;;  %p7528_p0 = scmp.lt.s32.totalorder %s9168_s16, %s7526_s22 }
 0x416   : > { %p7522_p11 = scmp.ne.s32.totalorder %s9168_s16, %s7521_s17  ;;  %p7529_p1 = scmp.lt.s32.totalorder %s7527_s14, %s7521_s17 }
 0x418   : > { %p7523_p12 = pnand %p7522_p11, %p7705_p5  ;;  %p7530_p2 = por %p7529_p1, %p7528_p0 }
 0x41a   : > { %p7524_p13 = pneg %p7523_p12 }
 0x41c   : > { %p7531_p3 = pnand %p7530_p2, %p7524_p13 }
 0x42b   : > { %v5891_v59 = vpop.permute.xlu1 %5890 }
 0x42d   : > { %v5901_v0 = vpop.permute.xlu0 %5900 }
 0x42f   : > { %v5911_v30 = vpop.permute.xlu1 %5910 }
 0x431   : > { %v5861_v14 = vpop.permute.xlu0 %5860 }
 0x432   : > { %5864 = vst.msk [vmem:[#allocation5] sm:$0x1] %vm5863_vm14, %v5861_v14  ;;  %vm6173_vm14 = vcmask 73728  }
 0x433   : > { %v5871_v60 = vpop.permute.xlu1 %5870 }
 0x434   : > { %5874 = vst.msk [vmem:[#allocation5] sm:$0x1] %vm5873_vm10, %v5871_v60 }
 0x435   : > { %v5921_v15 = vpop.permute.xlu0 %5920 }
 0x439   : > { %v5881_v2 = vpop.permute.xlu0 %5880 }
 0x43a   : > { %5884 = vst.msk [vmem:[#allocation5] sm:$0x1] %vm5883_vm3, %v5881_v2 }
 0x43b   : > { %5894 = vst.msk [vmem:[#allocation5] sm:$0x1] %vm5893_vm5, %v5891_v59 }
 0x43c   : > { %5904 = vst.msk [vmem:[#allocation5] sm:$0x1] %vm5903_vm11, %v5901_v0 }
 0x43d   : > { %5914 = vst.msk [vmem:[#allocation5] sm:$0x1] %vm5913_vm7, %v5911_v30 }
 0x43e   : > { %5924 = vst.msk [vmem:[#allocation5] sm:$0x1] %vm5923_vm8, %v5921_v15 }
 0x478   : > { %v5971_v3 = vpop.permute.xlu1 %5970 }
 0x47a   : > { %v5981_v21 = vpop.permute.xlu0 %5980 }
 0x47c   : > { %v5931_v29 = vpop.permute.xlu1 %5930 }
 0x47d   : > { %5934 = vst.msk [vmem:[#allocation5] sm:$0x1] %vm5933_vm15, %v5931_v29 }
 0x47e   : > { %v5941_v17 = vpop.permute.xlu0 %5940 }
 0x47f   : > { %5944 = vst.msk [vmem:[#allocation5] sm:$0x1] %vm5943_vm0, %v5941_v17 }
 0x480   : > { %v5951_v39 = vpop.permute.xlu1 %5950 }
 0x481   : > { %5954 = vst.msk [vmem:[#allocation5] sm:$0x1] %vm5953_vm1, %v5951_v39 }
 0x482   : > { %v5961_v22 = vpop.permute.xlu0 %5960 }
 0x483   : > { %5964 = vst.msk [vmem:[#allocation5] sm:$0x1] %vm5963_vm13, %v5961_v22 }
 0x484   : > { %5974 = vst.msk [vmem:[#allocation5] sm:$0x1] %vm5973_vm2, %v5971_v3  ;;  %v5991_v61 = vpop.permute.xlu1 %5990 }
 0x485   : > { %5984 = vst.msk [vmem:[#allocation5] sm:$0x1] %vm5983_vm9, %v5981_v21 }
 0x486   : > { %5994 = vst.msk [vmem:[#allocation5] sm:$0x1] %vm5993_vm6, %v5991_v61  ;;  %v6001_v1 = vpop.permute.xlu0 %6000 }
 0x487   : > { %6004 = vst.msk [vmem:[#allocation5] sm:$0x1] %vm6003_vm4, %v6001_v1 }
 0x48e   : > { %v6005_v53 = vld [vmem:[#allocation5] sm:$0x1] }
 0x48f   : > { %7157 = vmatmul.mubr.f32.vlgmr.msra.gmra.mrb[8].mxu1 %v6005_v53 }
 0x490   : > { %7196 = vmatpush3.bf16.msra.mxu1 %v7195_v19  ;;  %7167 = vmatprep.mubr.msk.f32.mxu1 %vm7609_vm12, %v7610_v28  ;;  %vm6099_vm12 = vcmask 261120  }
 0x491   : > { %7197 = vmatprep.subr.bf16.mxu1 %v7604_v62  ;;  %v6098_v62 = vld [vmem:[%s9216_s8] sm:$0x1] }
 0x494   : > { %7199 = vmatpush3.bf16.msra.mxu1 %v7198_v24 }
 0x562   : > { %v6089_v34 = vpop.f32.mrb[8].mxu1 }
 0x563   : > { %v6090_v56 = vadd.f32 %v6089_v34, %v6022_v7  ;;  %v7158_v27 = vpop.f32.mrb[9].mxu1 }
 0x565   : > { %v6093_v23 = vmax.f32 %v6090_v56, 0.0 }
 0x567   : > { %7168 = vmatmul.mubr.msk.f32.vlgmr.msra.gmra.mrb[10].mxu1 %vm6099_vm12, %v6093_v23 }
 0x63a   : > { %v6169_v31 = vpop.f32.mrb[10].mxu1 }
 0x63b   : > { %v6170_v37 = vadd.f32 %v6169_v31, %v6098_v62  ;;  %v7169_v42 = vpop.f32.mrb[11].mxu1 }
 0x63d   : > { %6174 = vst.msk [vmem:[%s324_s26] sm:$0x1] %vm6173_vm14, %v6170_v37 }
 0x63e   : > { %7534 = shalt.err (!%p7531_p3)
}
 0x63f   : > { %s7535_s23 = scalar_lea.hbm %s9166_s24, 16  ;;  %s7539_s26 = scalar_lea.hbm %s9217_s9, 32 }
 0x640   : > { %p7536_p4 = scmp.ne.s32.totalorder %s9166_s24, %s7535_s23  ;;  %p7540_p9 = scmp.lt.u32.totalorder %s9166_s24, %s9217_s9 }
 0x641   : > { %p7541_p10 = scmp.lt.u32.totalorder %s7539_s26, %s7535_s23  ;;  %p7543_p12 = scmp.lt.u32.totalorder %s7535_s23, %s9166_s24 }
 0x642   : > { %p7537_p7 = pnand %p7536_p4, %p7705_p5 }
 0x643   : > { %p7542_p11 = por %p7541_p10, %p7540_p9 }
 0x644   : > { %p7538_p8 = pneg %p7537_p7 }
 0x645   : > { %p7544_p13 = por %p7543_p12, %p7542_p11 }
 0x647   : > { %p7545_p0 = pnand %p7544_p13, %p7538_p8 }
 0x649   : > { %7548 = shalt.err (!%p7545_p0)
}
 0x64a   : > { %7202 = dma.vmem_to_hbm [thread:$0]  (%p7705_p5), %s9168_s16, 16, %s9166_s24, %s6176_s27  }
 0x64b PF: > { %p7208_p1 = scmp.ge.s32.totalorder %s7583_s12, 2  ;;  %s6200_s17 = sand.u32 1, %s7571_s30  }
 0x64c   : > { %s6201_s13 = scalar_lea.sflag [#allocation7], %s6200_s17 }
 0x64d   : > { %p7205_p2 = pnand %p7208_p1, %p7709_p6 }
 0x64f   : > { %7566 = dma.done.wait (!%p7205_p2), %s6201_s13, 16  }
 0x650   : > { %7568 = vsyncadd (!%p7205_p2), %s6201_s13, 4294967280  ;;  %p19_p3 = scmp.ge.s32.totalorder %s7692_s15, 4   ;;  %s9276_s30 = smov %s7575_s10 }
 0x651   : > { %s9277_s10 = smov %s7579_s11  ;;  %s9278_s11 = smov %s7703_s18 }
 0x652   : > { %s9279_s12 = smov %s7692_s15  ;;  %21 = sbr.rel (!%p19_p3) target bundleno = 3 (0x3), region = 96 }
 0x659   :  { %6205 = vsyncpa [#allocation7], 1 }
 0x65a   :  { %6207 = vsyncpa [#allocation7 + $0x1], 1 }

</bundles_post_ra>
